<compile_context>
chip_gen: v6e
topology: v6e:2x2x1
jax: 0.10.0
libtpu: 0.0.40
codegen_flags: <defaults>
</compile_context>

<pallas_src>
import functools

import numpy as np
import jax
import jax.numpy as jnp
from jax.experimental import pallas as pl
from jax.experimental.pallas import tpu as pltpu


# Strides of the five convs in the PyTorch nn.Sequential (static config).
CONV_STRIDES = (2, 1, 2, 1, 2)

_VMEM_LIMIT = 32 * 1024 * 1024  # safe on v5e/v6e (128 MiB) and v7x (64 MiB)


def _round_up(x, m):
    return (x + m - 1) // m * m


def _gelu_exact(x):
    # Matches torch.nn.GELU() default (erf-based).  Computed in f32.
    return 0.5 * x * (1.0 + jax.lax.erf(x * 0.7071067811865476))


# ----------------------------------------------------------------------------
# Single fused whole-network kernel
# ----------------------------------------------------------------------------
def _encoder_kernel(x_ref, sh_ref, u_ref, b_ref, o_ref, *, layers, out_rows):
    """layers: static tuple of (n_taps, has_row_select, apply_gelu)."""
    x = x_ref[...]                                   # (ROWS_PAD, COLS_PAD) bf16
    sh_i = 0
    u_i = 0
    y = None
    for li, (n_taps, has_sh, act) in enumerate(layers):
        acc = jnp.zeros(x.shape, jnp.float32)
        for _ in range(n_taps):
            if has_sh:
                # 0/1 row selection (vertical tap / flatten gather): exact.
                g = jnp.dot(sh_ref[sh_i], x,
                            preferred_element_type=jnp.float32
                            ).astype(jnp.bfloat16)
                sh_i += 1
            else:
                g = x
            acc = acc + jnp.dot(g, u_ref[u_i],
                                preferred_element_type=jnp.float32)
            u_i += 1
        y = acc + b_ref[li]                          # (R,C) + (1,C), f32
        if act:
            y = _gelu_exact(y)
        x = y.astype(jnp.bfloat16)                   # VMEM-resident handoff
    o_ref[...] = y[:out_rows, :].astype(o_ref.dtype)


def _encoder_pallas(packed, x_in, cfg):
    layers = cfg["layers"]
    rows_pad, cols_pad = cfg["rows_pad"], cfg["cols_pad"]
    out_rows = cfg["out_rows"]
    sh_pack, u_pack, b_pack = packed["sh"], packed["u"], packed["b"]
    n_sh, n_u = sh_pack.shape[0], u_pack.shape[0]
    n_gelu = sum(1 for l in layers if l[2])

    kernel = functools.partial(_encoder_kernel, layers=layers,
                               out_rows=out_rows)

    def _bytes(a):
        return int(a.size) * int(a.dtype.itemsize)

    cost = pl.CostEstimate(
        flops=2 * rows_pad * rows_pad * cols_pad * n_sh
        + 2 * rows_pad * cols_pad * cols_pad * n_u,
        transcendentals=n_gelu * rows_pad * cols_pad,
        bytes_accessed=_bytes(x_in) + _bytes(sh_pack) + _bytes(u_pack)
        + _bytes(b_pack) + out_rows * cols_pad * 4,
    )

    return pl.pallas_call(
        kernel,
        out_shape=jax.ShapeDtypeStruct((out_rows, cols_pad), jnp.float32),
        grid=(1,),
        in_specs=[
            pl.BlockSpec((rows_pad, cols_pad), lambda i: (0, 0)),
            pl.BlockSpec(sh_pack.shape, lambda i: (0, 0, 0)),
            pl.BlockSpec(u_pack.shape, lambda i: (0, 0, 0)),
            pl.BlockSpec(b_pack.shape, lambda i: (0, 0, 0)),
        ],
        out_specs=pl.BlockSpec((out_rows, cols_pad), lambda i: (0, 0)),
        compiler_params=pltpu.CompilerParams(
            dimension_semantics=("arbitrary",),
            vmem_limit_bytes=_VMEM_LIMIT,
        ),
        cost_estimate=cost,
    )(x_in, sh_pack, u_pack, b_pack)


# ----------------------------------------------------------------------------
# One-time parameter preparation (host-side; hoisted out of the jitted forward)
# ----------------------------------------------------------------------------
def prepare_encoder(params, *, batch, height, width):
    conv_params = params["conv"]
    lin_params = params["lin"]
    B = batch

    # Per-conv geometry (kernel 3x3, padding 1).
    H, W = height, width
    Cin = int(conv_params[0][0].shape[2])
    geoms = []
    for (w, _), s in zip(conv_params, CONV_STRIDES):
        assert w.shape[0] == 3 and w.shape[1] == 3 and int(w.shape[2]) == Cin
        Cout = int(w.shape[3])
        Ho = (H + 2 - 3) // s + 1
        Wo = (W + 2 - 3) // s + 1
        geoms.append((H, W, Cin, Ho, Wo, Cout, s))
        H, W, Cin = Ho, Wo, Cout
    Hf, Wf, Cf = H, W, Cin  # geometry after the conv stack

    (w0, b0), (w1, b1), (w2, b2) = lin_params
    assert int(w0.shape[0]) == Cf * Hf * Wf, \
        "Flatten->Linear(2*16*c_hid) implies 32x32 inputs"

    rows_pad = _round_up(max(B * g[0] for g in geoms), 8)
    col_widths = [128]
    for (Hl, Wl, Ci, Ho, Wo, Co, _) in geoms:
        col_widths += [Wl * Ci, Wo * Co]
    col_widths += [Wf * Cf, int(w0.shape[1]), int(w1.shape[1]), int(w2.shape[1])]
    cols_pad = _round_up(max(col_widths), 128)

    def _new_sh():
        return np.zeros((rows_pad, rows_pad), np.float32)

    def _new_u():
        return np.zeros((cols_pad, cols_pad), np.float32)

    def _new_b():
        return np.zeros((1, cols_pad), np.float32)

    sh_list, u_list, b_list, layers = [], [], [], []

    # --- 5 conv layers: 3 vertical taps each ------------------------------
    for (w, b), (Hl, Wl, Ci, Ho, Wo, Co, s) in zip(conv_params, geoms):
        w_np = np.asarray(w, np.float32)      # (3, 3, Cin, Cout) HWIO
        b_np = np.asarray(b, np.float32)
        for kh in range(3):
            sh = _new_sh()
            for bi in range(B):
                for i in range(Ho):
                    h = s * i + kh - 1
                    if 0 <= h < Hl:
                        sh[bi * Ho + i, bi * Hl + h] = 1.0
            u = _new_u()
            for j in range(Wo):
                for kw in range(3):
                    wi = s * j + kw - 1
                    if 0 <= wi < Wl:
                        u[wi * Ci:(wi + 1) * Ci, j * Co:(j + 1) * Co] = w_np[kh, kw]
            sh_list.append(sh)
            u_list.append(u)
        brow = _new_b()
        brow[0, :Wo * Co] = np.tile(b_np, Wo)
        b_list.append(brow)
        layers.append((3, True, True))

    # --- Flatten (PyTorch NCHW order) + Linear0 + GELU, as Hf row-taps -----
    w0_np = np.asarray(w0, np.float32)
    b0_np = np.asarray(b0, np.float32)
    # Map (h, w, c) flatten order -> torch's (c, h, w) rows of w0.
    perm = (np.arange(Cf * Hf * Wf).reshape(Cf, Hf, Wf)
            .transpose(1, 2, 0).reshape(-1))
    w0_hwc = w0_np[perm, :]
    N0 = w0_np.shape[1]
    for i in range(Hf):
        sh = _new_sh()
        for bi in range(B):
            sh[bi, bi * Hf + i] = 1.0
        u = _new_u()
        u[:Wf * Cf, :N0] = w0_hwc[i * Wf * Cf:(i + 1) * Wf * Cf, :]
        sh_list.append(sh)
        u_list.append(u)
    brow = _new_b()
    brow[0, :N0] = b0_np
    b_list.append(brow)
    layers.append((Hf, True, True))

    # --- Linear1 + GELU, Linear2 (no activation): plain dense layers -------
    for (wl, bl), act in (((w1, b1), True), ((w2, b2), False)):
        wl_np = np.asarray(wl, np.float32)
        bl_np = np.asarray(bl, np.float32)
        u = _new_u()
        u[:wl_np.shape[0], :wl_np.shape[1]] = wl_np
        u_list.append(u)
        brow = _new_b()
        brow[0, :bl_np.shape[0]] = bl_np
        b_list.append(brow)
        layers.append((1, False, act))

    packed = {
        "sh": jnp.asarray(np.stack(sh_list), jnp.bfloat16),   # (19, 64, 64)
        "u": jnp.asarray(np.stack(u_list), jnp.bfloat16),     # (21, 128, 128)
        "b": jnp.asarray(np.stack(b_list), jnp.float32),      # (8, 1, 128)
    }
    cfg = {
        "layers": tuple(layers),
        "rows_pad": rows_pad,
        "cols_pad": cols_pad,
        "out_rows": min(rows_pad, _round_up(max(B, 8), 8)),
        "batch": B,
        "in_geom": (height, width, int(conv_params[0][0].shape[2])),
        "out_dim": int(w2.shape[1]),
    }
    return packed, cfg


def make_encoder_forward(cfg):
    Hin, Win, Cin = cfg["in_geom"]
    B = cfg["batch"]
    rows_pad, cols_pad = cfg["rows_pad"], cfg["cols_pad"]
    out_dim = cfg["out_dim"]

    @jax.jit
    def forward(packed, x_nchw):
        # NCHW -> NHWC -> rows=(b,h), lanes=(w,c); zero-pad to the kernel's
        # uniform working shape; bf16 for the MXU.  (Cheap, input-sized glue.)
        x = jnp.transpose(x_nchw.astype(jnp.float32), (0, 2, 3, 1))
        x = x.reshape(B * Hin, Win * Cin)
        x = jnp.pad(x, ((0, rows_pad - B * Hin), (0, cols_pad - Win * Cin)))
        x = x.astype(jnp.bfloat16)
        out = _encoder_pallas(packed, x, cfg)
        return out[:B, :out_dim]

    return forward


# ----------------------------------------------------------------------------
# Parameter initialization (deterministic, PyTorch-default-like uniform init)
# ----------------------------------------------------------------------------
def _uniform(key, shape, fan_in):
    bound = 1.0 / np.sqrt(float(fan_in))
    return jax.random.uniform(key, shape, jnp.float32, -bound, bound)


def init_encoder_params(key, num_input_channels, base_channel_size):
    c_hid = base_channel_size
    conv_cfg = [
        (num_input_channels, c_hid),
        (c_hid, c_hid),
        (c_hid, 2 * c_hid),
        (2 * c_hid, 2 * c_hid),
        (2 * c_hid, 2 * c_hid),
    ]
    lin_cfg = [
        (2 * 16 * c_hid, 2 * 16),
        (2 * 16, 8),
        (8, 2),
    ]
    params = {"conv": [], "lin": []}
    keys = jax.random.split(key, 2 * (len(conv_cfg) + len(lin_cfg)))
    k = 0
    for cin, cout in conv_cfg:
        fan_in = cin * 9
        w = _uniform(keys[k], (3, 3, cin, cout), fan_in); k += 1
        b = _uniform(keys[k], (cout,), fan_in); k += 1
        params["conv"].append((w, b))
    for fin, fout in lin_cfg:
        w = _uniform(keys[k], (fin, fout), fin); k += 1
        b = _uniform(keys[k], (fout,), fin); k += 1
        params["lin"].append((w, b))
    return params


# ----------------------------------------------------------------------------
# Pure-JAX f32 reference (for a tolerance check against the bf16 kernel)
# ----------------------------------------------------------------------------
def encoder_reference(params, x_nchw):
    x = x_nchw.astype(jnp.float32)
    for (w, b), s in zip(params["conv"], CONV_STRIDES):
        x = jax.lax.conv_general_dilated(
            x, w.astype(jnp.float32), window_strides=(s, s),
            padding=((1, 1), (1, 1)),
            dimension_numbers=("NCHW", "HWIO", "NCHW"),
            precision=jax.lax.Precision.HIGHEST)
        x = _gelu_exact(x + b[None, :, None, None])
    x = x.reshape(x.shape[0], -1)  # NCHW flatten: (c, h, w) order
    (w0, b0), (w1, b1), (w2, b2) = params["lin"]
    hi = jax.lax.Precision.HIGHEST
    x = _gelu_exact(jnp.dot(x, w0, precision=hi) + b0)
    x = _gelu_exact(jnp.dot(x, w1, precision=hi) + b1)
    return jnp.dot(x, w2, precision=hi) + b2


if __name__ == "__main__":
    # The architecture's Flatten->Linear(2*16*c_hid, ...) implies 32x32 inputs
    # (spatial 32 -> 16 -> 16 -> 8 -> 8 -> 4).
    B, C_IN, H, W = 2, 3, 32, 32
    C_HID = 4
    LATENT_DIM = 16  # present in the PyTorch __init__ but unused by the net.

    key = jax.random.PRNGKey(0)
    kx, kp = jax.random.split(key)
    x = jax.random.normal(kx, (B, C_IN, H, W), jnp.float32)

    params = init_encoder_params(kp, C_IN, C_HID)

    # One-time parameter prep (tap matrices, flatten permutation, padding).
    packed, cfg = prepare_encoder(params, batch=B, height=H, width=W)
    forward = make_encoder_forward(cfg)

    out = jax.block_until_ready(forward(packed, x))
    assert out.shape == (B, 2), out.shape
    assert bool(jnp.all(jnp.isfinite(out)))

    # bf16 MXU inputs -> small deviation from the f32 reference is expected.
    ref = jax.jit(encoder_reference)(params, x)
    np.testing.assert_allclose(np.asarray(out), np.asarray(ref),
                               rtol=5e-2, atol=5e-2)

    print("KERNEL_OK")
</pallas_src>

<mosaic_0001>
module attributes {stable_mosaic.version = 11 : i64} {
  func.func @_encoder_kernel(%arg0: i32, %arg1: memref<64x128xbf16, #tpu.memory_space<vmem>>, %arg2: memref<19x64x64xbf16, #tpu.memory_space<vmem>>, %arg3: memref<21x128x128xbf16, #tpu.memory_space<vmem>>, %arg4: memref<8x1x128xf32, #tpu.memory_space<vmem>>, %arg5: memref<8x128xf32, #tpu.memory_space<vmem>>) attributes {dimension_semantics = [#tpu.dimension_semantics<arbitrary>], iteration_bounds = array<i64: 1>, scalar_prefetch = 0 : i64, scratch_operands = 0 : i64, tpu.core_type = #tpu.core_type<tc>, window_params = [{pipeline_mode = #tpu.pipeline_mode<synchronous>, transform_indices = @transform_0, window_bounds = array<i64: 64, 128>}, {pipeline_mode = #tpu.pipeline_mode<synchronous>, transform_indices = @transform_1, window_bounds = array<i64: 19, 64, 64>}, {pipeline_mode = #tpu.pipeline_mode<synchronous>, transform_indices = @transform_2, window_bounds = array<i64: 21, 128, 128>}, {pipeline_mode = #tpu.pipeline_mode<synchronous>, transform_indices = @transform_3, window_bounds = array<i64: 8, 1, 128>}, {pipeline_mode = #tpu.pipeline_mode<synchronous>, transform_indices = @transform_4, window_bounds = array<i64: 8, 128>}]} {
    %c0 = arith.constant 0 : index
    %c0_0 = arith.constant 0 : index
    %0 = vector.load %arg1[%c0, %c0_0] : memref<64x128xbf16, #tpu.memory_space<vmem>>, vector<64x128xbf16>
    %cst = arith.constant 0.000000e+00 : f32
    %1 = vector.broadcast %cst : f32 to vector<64x128xf32>
    %c0_1 = arith.constant 0 : index
    %c0_2 = arith.constant 0 : index
    %c0_3 = arith.constant 0 : index
    %2 = vector.load %arg2[%c0_1, %c0_2, %c0_3] : memref<19x64x64xbf16, #tpu.memory_space<vmem>>, vector<1x64x64xbf16>
    %3 = vector.shape_cast %2 : vector<1x64x64xbf16> to vector<64x64xbf16>
    %cst_4 = arith.constant dense<0.000000e+00> : vector<64x128xf32>
    %4 = tpu.matmul %3, %0, %cst_4 {dimension_numbers = #tpu.dot_dimension_numbers<[1], [0], [0], [1], [0, 0, 1, 1], [], []>} : vector<64x64xbf16>, vector<64x128xbf16>, vector<64x128xf32> -> vector<64x128xf32>
    %5 = arith.truncf %4 : vector<64x128xf32> to vector<64x128xbf16>
    %c0_5 = arith.constant 0 : index
    %c0_6 = arith.constant 0 : index
    %c0_7 = arith.constant 0 : index
    %6 = vector.load %arg3[%c0_5, %c0_6, %c0_7] : memref<21x128x128xbf16, #tpu.memory_space<vmem>>, vector<1x128x128xbf16>
    %7 = vector.shape_cast %6 : vector<1x128x128xbf16> to vector<128x128xbf16>
    %cst_8 = arith.constant dense<0.000000e+00> : vector<64x128xf32>
    %8 = tpu.matmul %5, %7, %cst_8 {dimension_numbers = #tpu.dot_dimension_numbers<[1], [0], [0], [1], [0, 0, 1, 1], [], []>} : vector<64x128xbf16>, vector<128x128xbf16>, vector<64x128xf32> -> vector<64x128xf32>
    %9 = arith.addf %1, %8 : vector<64x128xf32>
    %c1 = arith.constant 1 : index
    %c0_9 = arith.constant 0 : index
    %c0_10 = arith.constant 0 : index
    %10 = vector.load %arg2[%c1, %c0_9, %c0_10] : memref<19x64x64xbf16, #tpu.memory_space<vmem>>, vector<1x64x64xbf16>
    %11 = vector.shape_cast %10 : vector<1x64x64xbf16> to vector<64x64xbf16>
    %cst_11 = arith.constant dense<0.000000e+00> : vector<64x128xf32>
    %12 = tpu.matmul %11, %0, %cst_11 {dimension_numbers = #tpu.dot_dimension_numbers<[1], [0], [0], [1], [0, 0, 1, 1], [], []>} : vector<64x64xbf16>, vector<64x128xbf16>, vector<64x128xf32> -> vector<64x128xf32>
    %13 = arith.truncf %12 : vector<64x128xf32> to vector<64x128xbf16>
    %c1_12 = arith.constant 1 : index
    %c0_13 = arith.constant 0 : index
    %c0_14 = arith.constant 0 : index
    %14 = vector.load %arg3[%c1_12, %c0_13, %c0_14] : memref<21x128x128xbf16, #tpu.memory_space<vmem>>, vector<1x128x128xbf16>
    %15 = vector.shape_cast %14 : vector<1x128x128xbf16> to vector<128x128xbf16>
    %cst_15 = arith.constant dense<0.000000e+00> : vector<64x128xf32>
    %16 = tpu.matmul %13, %15, %cst_15 {dimension_numbers = #tpu.dot_dimension_numbers<[1], [0], [0], [1], [0, 0, 1, 1], [], []>} : vector<64x128xbf16>, vector<128x128xbf16>, vector<64x128xf32> -> vector<64x128xf32>
    %17 = arith.addf %9, %16 : vector<64x128xf32>
    %c2 = arith.constant 2 : index
    %c0_16 = arith.constant 0 : index
    %c0_17 = arith.constant 0 : index
    %18 = vector.load %arg2[%c2, %c0_16, %c0_17] : memref<19x64x64xbf16, #tpu.memory_space<vmem>>, vector<1x64x64xbf16>
    %19 = vector.shape_cast %18 : vector<1x64x64xbf16> to vector<64x64xbf16>
    %cst_18 = arith.constant dense<0.000000e+00> : vector<64x128xf32>
    %20 = tpu.matmul %19, %0, %cst_18 {dimension_numbers = #tpu.dot_dimension_numbers<[1], [0], [0], [1], [0, 0, 1, 1], [], []>} : vector<64x64xbf16>, vector<64x128xbf16>, vector<64x128xf32> -> vector<64x128xf32>
    %21 = arith.truncf %20 : vector<64x128xf32> to vector<64x128xbf16>
    %c2_19 = arith.constant 2 : index
    %c0_20 = arith.constant 0 : index
    %c0_21 = arith.constant 0 : index
    %22 = vector.load %arg3[%c2_19, %c0_20, %c0_21] : memref<21x128x128xbf16, #tpu.memory_space<vmem>>, vector<1x128x128xbf16>
    %23 = vector.shape_cast %22 : vector<1x128x128xbf16> to vector<128x128xbf16>
    %cst_22 = arith.constant dense<0.000000e+00> : vector<64x128xf32>
    %24 = tpu.matmul %21, %23, %cst_22 {dimension_numbers = #tpu.dot_dimension_numbers<[1], [0], [0], [1], [0, 0, 1, 1], [], []>} : vector<64x128xbf16>, vector<128x128xbf16>, vector<64x128xf32> -> vector<64x128xf32>
    %25 = arith.addf %17, %24 : vector<64x128xf32>
    %c0_23 = arith.constant 0 : index
    %c0_24 = arith.constant 0 : index
    %c0_25 = arith.constant 0 : index
    %26 = vector.load %arg4[%c0_23, %c0_24, %c0_25] : memref<8x1x128xf32, #tpu.memory_space<vmem>>, vector<1x1x128xf32>
    %27 = vector.shape_cast %26 : vector<1x1x128xf32> to vector<1x128xf32>
    %28 = vector.broadcast %27 : vector<1x128xf32> to vector<64x128xf32>
    %29 = arith.addf %25, %28 : vector<64x128xf32>
    %cst_26 = arith.constant 5.000000e-01 : f32
    %30 = vector.broadcast %cst_26 : f32 to vector<64x128xf32>
    %31 = arith.mulf %30, %29 : vector<64x128xf32>
    %cst_27 = arith.constant 0.707106769 : f32
    %32 = vector.broadcast %cst_27 : f32 to vector<64x128xf32>
    %33 = arith.mulf %29, %32 : vector<64x128xf32>
    %34 = math.erf %33 : vector<64x128xf32>
    %cst_28 = arith.constant 1.000000e+00 : f32
    %35 = vector.broadcast %cst_28 : f32 to vector<64x128xf32>
    %36 = arith.addf %35, %34 : vector<64x128xf32>
    %37 = arith.mulf %31, %36 : vector<64x128xf32>
    %38 = arith.truncf %37 : vector<64x128xf32> to vector<64x128xbf16>
    %cst_29 = arith.constant 0.000000e+00 : f32
    %39 = vector.broadcast %cst_29 : f32 to vector<64x128xf32>
    %c3 = arith.constant 3 : index
    %c0_30 = arith.constant 0 : index
    %c0_31 = arith.constant 0 : index
    %40 = vector.load %arg2[%c3, %c0_30, %c0_31] : memref<19x64x64xbf16, #tpu.memory_space<vmem>>, vector<1x64x64xbf16>
    %41 = vector.shape_cast %40 : vector<1x64x64xbf16> to vector<64x64xbf16>
    %cst_32 = arith.constant dense<0.000000e+00> : vector<64x128xf32>
    %42 = tpu.matmul %41, %38, %cst_32 {dimension_numbers = #tpu.dot_dimension_numbers<[1], [0], [0], [1], [0, 0, 1, 1], [], []>} : vector<64x64xbf16>, vector<64x128xbf16>, vector<64x128xf32> -> vector<64x128xf32>
    %43 = arith.truncf %42 : vector<64x128xf32> to vector<64x128xbf16>
    %c3_33 = arith.constant 3 : index
    %c0_34 = arith.constant 0 : index
    %c0_35 = arith.constant 0 : index
    %44 = vector.load %arg3[%c3_33, %c0_34, %c0_35] : memref<21x128x128xbf16, #tpu.memory_space<vmem>>, vector<1x128x128xbf16>
    %45 = vector.shape_cast %44 : vector<1x128x128xbf16> to vector<128x128xbf16>
    %cst_36 = arith.constant dense<0.000000e+00> : vector<64x128xf32>
    %46 = tpu.matmul %43, %45, %cst_36 {dimension_numbers = #tpu.dot_dimension_numbers<[1], [0], [0], [1], [0, 0, 1, 1], [], []>} : vector<64x128xbf16>, vector<128x128xbf16>, vector<64x128xf32> -> vector<64x128xf32>
    %47 = arith.addf %39, %46 : vector<64x128xf32>
    %c4 = arith.constant 4 : index
    %c0_37 = arith.constant 0 : index
    %c0_38 = arith.constant 0 : index
    %48 = vector.load %arg2[%c4, %c0_37, %c0_38] : memref<19x64x64xbf16, #tpu.memory_space<vmem>>, vector<1x64x64xbf16>
    %49 = vector.shape_cast %48 : vector<1x64x64xbf16> to vector<64x64xbf16>
    %cst_39 = arith.constant dense<0.000000e+00> : vector<64x128xf32>
    %50 = tpu.matmul %49, %38, %cst_39 {dimension_numbers = #tpu.dot_dimension_numbers<[1], [0], [0], [1], [0, 0, 1, 1], [], []>} : vector<64x64xbf16>, vector<64x128xbf16>, vector<64x128xf32> -> vector<64x128xf32>
    %51 = arith.truncf %50 : vector<64x128xf32> to vector<64x128xbf16>
    %c4_40 = arith.constant 4 : index
    %c0_41 = arith.constant 0 : index
    %c0_42 = arith.constant 0 : index
    %52 = vector.load %arg3[%c4_40, %c0_41, %c0_42] : memref<21x128x128xbf16, #tpu.memory_space<vmem>>, vector<1x128x128xbf16>
    %53 = vector.shape_cast %52 : vector<1x128x128xbf16> to vector<128x128xbf16>
    %cst_43 = arith.constant dense<0.000000e+00> : vector<64x128xf32>
    %54 = tpu.matmul %51, %53, %cst_43 {dimension_numbers = #tpu.dot_dimension_numbers<[1], [0], [0], [1], [0, 0, 1, 1], [], []>} : vector<64x128xbf16>, vector<128x128xbf16>, vector<64x128xf32> -> vector<64x128xf32>
    %55 = arith.addf %47, %54 : vector<64x128xf32>
    %c5 = arith.constant 5 : index
    %c0_44 = arith.constant 0 : index
    %c0_45 = arith.constant 0 : index
    %56 = vector.load %arg2[%c5, %c0_44, %c0_45] : memref<19x64x64xbf16, #tpu.memory_space<vmem>>, vector<1x64x64xbf16>
    %57 = vector.shape_cast %56 : vector<1x64x64xbf16> to vector<64x64xbf16>
    %cst_46 = arith.constant dense<0.000000e+00> : vector<64x128xf32>
    %58 = tpu.matmul %57, %38, %cst_46 {dimension_numbers = #tpu.dot_dimension_numbers<[1], [0], [0], [1], [0, 0, 1, 1], [], []>} : vector<64x64xbf16>, vector<64x128xbf16>, vector<64x128xf32> -> vector<64x128xf32>
    %59 = arith.truncf %58 : vector<64x128xf32> to vector<64x128xbf16>
    %c5_47 = arith.constant 5 : index
    %c0_48 = arith.constant 0 : index
    %c0_49 = arith.constant 0 : index
    %60 = vector.load %arg3[%c5_47, %c0_48, %c0_49] : memref<21x128x128xbf16, #tpu.memory_space<vmem>>, vector<1x128x128xbf16>
    %61 = vector.shape_cast %60 : vector<1x128x128xbf16> to vector<128x128xbf16>
    %cst_50 = arith.constant dense<0.000000e+00> : vector<64x128xf32>
    %62 = tpu.matmul %59, %61, %cst_50 {dimension_numbers = #tpu.dot_dimension_numbers<[1], [0], [0], [1], [0, 0, 1, 1], [], []>} : vector<64x128xbf16>, vector<128x128xbf16>, vector<64x128xf32> -> vector<64x128xf32>
    %63 = arith.addf %55, %62 : vector<64x128xf32>
    %c1_51 = arith.constant 1 : index
    %c0_52 = arith.constant 0 : index
    %c0_53 = arith.constant 0 : index
    %64 = vector.load %arg4[%c1_51, %c0_52, %c0_53] : memref<8x1x128xf32, #tpu.memory_space<vmem>>, vector<1x1x128xf32>
    %65 = vector.shape_cast %64 : vector<1x1x128xf32> to vector<1x128xf32>
    %66 = vector.broadcast %65 : vector<1x128xf32> to vector<64x128xf32>
    %67 = arith.addf %63, %66 : vector<64x128xf32>
    %cst_54 = arith.constant 5.000000e-01 : f32
    %68 = vector.broadcast %cst_54 : f32 to vector<64x128xf32>
    %69 = arith.mulf %68, %67 : vector<64x128xf32>
    %cst_55 = arith.constant 0.707106769 : f32
    %70 = vector.broadcast %cst_55 : f32 to vector<64x128xf32>
    %71 = arith.mulf %67, %70 : vector<64x128xf32>
    %72 = math.erf %71 : vector<64x128xf32>
    %cst_56 = arith.constant 1.000000e+00 : f32
    %73 = vector.broadcast %cst_56 : f32 to vector<64x128xf32>
    %74 = arith.addf %73, %72 : vector<64x128xf32>
    %75 = arith.mulf %69, %74 : vector<64x128xf32>
    %76 = arith.truncf %75 : vector<64x128xf32> to vector<64x128xbf16>
    %cst_57 = arith.constant 0.000000e+00 : f32
    %77 = vector.broadcast %cst_57 : f32 to vector<64x128xf32>
    %c6 = arith.constant 6 : index
    %c0_58 = arith.constant 0 : index
    %c0_59 = arith.constant 0 : index
    %78 = vector.load %arg2[%c6, %c0_58, %c0_59] : memref<19x64x64xbf16, #tpu.memory_space<vmem>>, vector<1x64x64xbf16>
    %79 = vector.shape_cast %78 : vector<1x64x64xbf16> to vector<64x64xbf16>
    %cst_60 = arith.constant dense<0.000000e+00> : vector<64x128xf32>
    %80 = tpu.matmul %79, %76, %cst_60 {dimension_numbers = #tpu.dot_dimension_numbers<[1], [0], [0], [1], [0, 0, 1, 1], [], []>} : vector<64x64xbf16>, vector<64x128xbf16>, vector<64x128xf32> -> vector<64x128xf32>
    %81 = arith.truncf %80 : vector<64x128xf32> to vector<64x128xbf16>
    %c6_61 = arith.constant 6 : index
    %c0_62 = arith.constant 0 : index
    %c0_63 = arith.constant 0 : index
    %82 = vector.load %arg3[%c6_61, %c0_62, %c0_63] : memref<21x128x128xbf16, #tpu.memory_space<vmem>>, vector<1x128x128xbf16>
    %83 = vector.shape_cast %82 : vector<1x128x128xbf16> to vector<128x128xbf16>
    %cst_64 = arith.constant dense<0.000000e+00> : vector<64x128xf32>
    %84 = tpu.matmul %81, %83, %cst_64 {dimension_numbers = #tpu.dot_dimension_numbers<[1], [0], [0], [1], [0, 0, 1, 1], [], []>} : vector<64x128xbf16>, vector<128x128xbf16>, vector<64x128xf32> -> vector<64x128xf32>
    %85 = arith.addf %77, %84 : vector<64x128xf32>
    %c7 = arith.constant 7 : index
    %c0_65 = arith.constant 0 : index
    %c0_66 = arith.constant 0 : index
    %86 = vector.load %arg2[%c7, %c0_65, %c0_66] : memref<19x64x64xbf16, #tpu.memory_space<vmem>>, vector<1x64x64xbf16>
    %87 = vector.shape_cast %86 : vector<1x64x64xbf16> to vector<64x64xbf16>
    %cst_67 = arith.constant dense<0.000000e+00> : vector<64x128xf32>
    %88 = tpu.matmul %87, %76, %cst_67 {dimension_numbers = #tpu.dot_dimension_numbers<[1], [0], [0], [1], [0, 0, 1, 1], [], []>} : vector<64x64xbf16>, vector<64x128xbf16>, vector<64x128xf32> -> vector<64x128xf32>
    %89 = arith.truncf %88 : vector<64x128xf32> to vector<64x128xbf16>
    %c7_68 = arith.constant 7 : index
    %c0_69 = arith.constant 0 : index
    %c0_70 = arith.constant 0 : index
    %90 = vector.load %arg3[%c7_68, %c0_69, %c0_70] : memref<21x128x128xbf16, #tpu.memory_space<vmem>>, vector<1x128x128xbf16>
    %91 = vector.shape_cast %90 : vector<1x128x128xbf16> to vector<128x128xbf16>
    %cst_71 = arith.constant dense<0.000000e+00> : vector<64x128xf32>
    %92 = tpu.matmul %89, %91, %cst_71 {dimension_numbers = #tpu.dot_dimension_numbers<[1], [0], [0], [1], [0, 0, 1, 1], [], []>} : vector<64x128xbf16>, vector<128x128xbf16>, vector<64x128xf32> -> vector<64x128xf32>
    %93 = arith.addf %85, %92 : vector<64x128xf32>
    %c8 = arith.constant 8 : index
    %c0_72 = arith.constant 0 : index
    %c0_73 = arith.constant 0 : index
    %94 = vector.load %arg2[%c8, %c0_72, %c0_73] : memref<19x64x64xbf16, #tpu.memory_space<vmem>>, vector<1x64x64xbf16>
    %95 = vector.shape_cast %94 : vector<1x64x64xbf16> to vector<64x64xbf16>
    %cst_74 = arith.constant dense<0.000000e+00> : vector<64x128xf32>
    %96 = tpu.matmul %95, %76, %cst_74 {dimension_numbers = #tpu.dot_dimension_numbers<[1], [0], [0], [1], [0, 0, 1, 1], [], []>} : vector<64x64xbf16>, vector<64x128xbf16>, vector<64x128xf32> -> vector<64x128xf32>
    %97 = arith.truncf %96 : vector<64x128xf32> to vector<64x128xbf16>
    %c8_75 = arith.constant 8 : index
    %c0_76 = arith.constant 0 : index
    %c0_77 = arith.constant 0 : index
    %98 = vector.load %arg3[%c8_75, %c0_76, %c0_77] : memref<21x128x128xbf16, #tpu.memory_space<vmem>>, vector<1x128x128xbf16>
    %99 = vector.shape_cast %98 : vector<1x128x128xbf16> to vector<128x128xbf16>
    %cst_78 = arith.constant dense<0.000000e+00> : vector<64x128xf32>
    %100 = tpu.matmul %97, %99, %cst_78 {dimension_numbers = #tpu.dot_dimension_numbers<[1], [0], [0], [1], [0, 0, 1, 1], [], []>} : vector<64x128xbf16>, vector<128x128xbf16>, vector<64x128xf32> -> vector<64x128xf32>
    %101 = arith.addf %93, %100 : vector<64x128xf32>
    %c2_79 = arith.constant 2 : index
    %c0_80 = arith.constant 0 : index
    %c0_81 = arith.constant 0 : index
    %102 = vector.load %arg4[%c2_79, %c0_80, %c0_81] : memref<8x1x128xf32, #tpu.memory_space<vmem>>, vector<1x1x128xf32>
    %103 = vector.shape_cast %102 : vector<1x1x128xf32> to vector<1x128xf32>
    %104 = vector.broadcast %103 : vector<1x128xf32> to vector<64x128xf32>
    %105 = arith.addf %101, %104 : vector<64x128xf32>
    %cst_82 = arith.constant 5.000000e-01 : f32
    %106 = vector.broadcast %cst_82 : f32 to vector<64x128xf32>
    %107 = arith.mulf %106, %105 : vector<64x128xf32>
    %cst_83 = arith.constant 0.707106769 : f32
    %108 = vector.broadcast %cst_83 : f32 to vector<64x128xf32>
    %109 = arith.mulf %105, %108 : vector<64x128xf32>
    %110 = math.erf %109 : vector<64x128xf32>
    %cst_84 = arith.constant 1.000000e+00 : f32
    %111 = vector.broadcast %cst_84 : f32 to vector<64x128xf32>
    %112 = arith.addf %111, %110 : vector<64x128xf32>
    %113 = arith.mulf %107, %112 : vector<64x128xf32>
    %114 = arith.truncf %113 : vector<64x128xf32> to vector<64x128xbf16>
    %cst_85 = arith.constant 0.000000e+00 : f32
    %115 = vector.broadcast %cst_85 : f32 to vector<64x128xf32>
    %c9 = arith.constant 9 : index
    %c0_86 = arith.constant 0 : index
    %c0_87 = arith.constant 0 : index
    %116 = vector.load %arg2[%c9, %c0_86, %c0_87] : memref<19x64x64xbf16, #tpu.memory_space<vmem>>, vector<1x64x64xbf16>
    %117 = vector.shape_cast %116 : vector<1x64x64xbf16> to vector<64x64xbf16>
    %cst_88 = arith.constant dense<0.000000e+00> : vector<64x128xf32>
    %118 = tpu.matmul %117, %114, %cst_88 {dimension_numbers = #tpu.dot_dimension_numbers<[1], [0], [0], [1], [0, 0, 1, 1], [], []>} : vector<64x64xbf16>, vector<64x128xbf16>, vector<64x128xf32> -> vector<64x128xf32>
    %119 = arith.truncf %118 : vector<64x128xf32> to vector<64x128xbf16>
    %c9_89 = arith.constant 9 : index
    %c0_90 = arith.constant 0 : index
    %c0_91 = arith.constant 0 : index
    %120 = vector.load %arg3[%c9_89, %c0_90, %c0_91] : memref<21x128x128xbf16, #tpu.memory_space<vmem>>, vector<1x128x128xbf16>
    %121 = vector.shape_cast %120 : vector<1x128x128xbf16> to vector<128x128xbf16>
    %cst_92 = arith.constant dense<0.000000e+00> : vector<64x128xf32>
    %122 = tpu.matmul %119, %121, %cst_92 {dimension_numbers = #tpu.dot_dimension_numbers<[1], [0], [0], [1], [0, 0, 1, 1], [], []>} : vector<64x128xbf16>, vector<128x128xbf16>, vector<64x128xf32> -> vector<64x128xf32>
    %123 = arith.addf %115, %122 : vector<64x128xf32>
    %c10 = arith.constant 10 : index
    %c0_93 = arith.constant 0 : index
    %c0_94 = arith.constant 0 : index
    %124 = vector.load %arg2[%c10, %c0_93, %c0_94] : memref<19x64x64xbf16, #tpu.memory_space<vmem>>, vector<1x64x64xbf16>
    %125 = vector.shape_cast %124 : vector<1x64x64xbf16> to vector<64x64xbf16>
    %cst_95 = arith.constant dense<0.000000e+00> : vector<64x128xf32>
    %126 = tpu.matmul %125, %114, %cst_95 {dimension_numbers = #tpu.dot_dimension_numbers<[1], [0], [0], [1], [0, 0, 1, 1], [], []>} : vector<64x64xbf16>, vector<64x128xbf16>, vector<64x128xf32> -> vector<64x128xf32>
    %127 = arith.truncf %126 : vector<64x128xf32> to vector<64x128xbf16>
    %c10_96 = arith.constant 10 : index
    %c0_97 = arith.constant 0 : index
    %c0_98 = arith.constant 0 : index
    %128 = vector.load %arg3[%c10_96, %c0_97, %c0_98] : memref<21x128x128xbf16, #tpu.memory_space<vmem>>, vector<1x128x128xbf16>
    %129 = vector.shape_cast %128 : vector<1x128x128xbf16> to vector<128x128xbf16>
    %cst_99 = arith.constant dense<0.000000e+00> : vector<64x128xf32>
    %130 = tpu.matmul %127, %129, %cst_99 {dimension_numbers = #tpu.dot_dimension_numbers<[1], [0], [0], [1], [0, 0, 1, 1], [], []>} : vector<64x128xbf16>, vector<128x128xbf16>, vector<64x128xf32> -> vector<64x128xf32>
    %131 = arith.addf %123, %130 : vector<64x128xf32>
    %c11 = arith.constant 11 : index
    %c0_100 = arith.constant 0 : index
    %c0_101 = arith.constant 0 : index
    %132 = vector.load %arg2[%c11, %c0_100, %c0_101] : memref<19x64x64xbf16, #tpu.memory_space<vmem>>, vector<1x64x64xbf16>
    %133 = vector.shape_cast %132 : vector<1x64x64xbf16> to vector<64x64xbf16>
    %cst_102 = arith.constant dense<0.000000e+00> : vector<64x128xf32>
    %134 = tpu.matmul %133, %114, %cst_102 {dimension_numbers = #tpu.dot_dimension_numbers<[1], [0], [0], [1], [0, 0, 1, 1], [], []>} : vector<64x64xbf16>, vector<64x128xbf16>, vector<64x128xf32> -> vector<64x128xf32>
    %135 = arith.truncf %134 : vector<64x128xf32> to vector<64x128xbf16>
    %c11_103 = arith.constant 11 : index
    %c0_104 = arith.constant 0 : index
    %c0_105 = arith.constant 0 : index
    %136 = vector.load %arg3[%c11_103, %c0_104, %c0_105] : memref<21x128x128xbf16, #tpu.memory_space<vmem>>, vector<1x128x128xbf16>
    %137 = vector.shape_cast %136 : vector<1x128x128xbf16> to vector<128x128xbf16>
    %cst_106 = arith.constant dense<0.000000e+00> : vector<64x128xf32>
    %138 = tpu.matmul %135, %137, %cst_106 {dimension_numbers = #tpu.dot_dimension_numbers<[1], [0], [0], [1], [0, 0, 1, 1], [], []>} : vector<64x128xbf16>, vector<128x128xbf16>, vector<64x128xf32> -> vector<64x128xf32>
    %139 = arith.addf %131, %138 : vector<64x128xf32>
    %c3_107 = arith.constant 3 : index
    %c0_108 = arith.constant 0 : index
    %c0_109 = arith.constant 0 : index
    %140 = vector.load %arg4[%c3_107, %c0_108, %c0_109] : memref<8x1x128xf32, #tpu.memory_space<vmem>>, vector<1x1x128xf32>
    %141 = vector.shape_cast %140 : vector<1x1x128xf32> to vector<1x128xf32>
    %142 = vector.broadcast %141 : vector<1x128xf32> to vector<64x128xf32>
    %143 = arith.addf %139, %142 : vector<64x128xf32>
    %cst_110 = arith.constant 5.000000e-01 : f32
    %144 = vector.broadcast %cst_110 : f32 to vector<64x128xf32>
    %145 = arith.mulf %144, %143 : vector<64x128xf32>
    %cst_111 = arith.constant 0.707106769 : f32
    %146 = vector.broadcast %cst_111 : f32 to vector<64x128xf32>
    %147 = arith.mulf %143, %146 : vector<64x128xf32>
    %148 = math.erf %147 : vector<64x128xf32>
    %cst_112 = arith.constant 1.000000e+00 : f32
    %149 = vector.broadcast %cst_112 : f32 to vector<64x128xf32>
    %150 = arith.addf %149, %148 : vector<64x128xf32>
    %151 = arith.mulf %145, %150 : vector<64x128xf32>
    %152 = arith.truncf %151 : vector<64x128xf32> to vector<64x128xbf16>
    %cst_113 = arith.constant 0.000000e+00 : f32
    %153 = vector.broadcast %cst_113 : f32 to vector<64x128xf32>
    %c12 = arith.constant 12 : index
    %c0_114 = arith.constant 0 : index
    %c0_115 = arith.constant 0 : index
    %154 = vector.load %arg2[%c12, %c0_114, %c0_115] : memref<19x64x64xbf16, #tpu.memory_space<vmem>>, vector<1x64x64xbf16>
    %155 = vector.shape_cast %154 : vector<1x64x64xbf16> to vector<64x64xbf16>
    %cst_116 = arith.constant dense<0.000000e+00> : vector<64x128xf32>
    %156 = tpu.matmul %155, %152, %cst_116 {dimension_numbers = #tpu.dot_dimension_numbers<[1], [0], [0], [1], [0, 0, 1, 1], [], []>} : vector<64x64xbf16>, vector<64x128xbf16>, vector<64x128xf32> -> vector<64x128xf32>
    %157 = arith.truncf %156 : vector<64x128xf32> to vector<64x128xbf16>
    %c12_117 = arith.constant 12 : index
    %c0_118 = arith.constant 0 : index
    %c0_119 = arith.constant 0 : index
    %158 = vector.load %arg3[%c12_117, %c0_118, %c0_119] : memref<21x128x128xbf16, #tpu.memory_space<vmem>>, vector<1x128x128xbf16>
    %159 = vector.shape_cast %158 : vector<1x128x128xbf16> to vector<128x128xbf16>
    %cst_120 = arith.constant dense<0.000000e+00> : vector<64x128xf32>
    %160 = tpu.matmul %157, %159, %cst_120 {dimension_numbers = #tpu.dot_dimension_numbers<[1], [0], [0], [1], [0, 0, 1, 1], [], []>} : vector<64x128xbf16>, vector<128x128xbf16>, vector<64x128xf32> -> vector<64x128xf32>
    %161 = arith.addf %153, %160 : vector<64x128xf32>
    %c13 = arith.constant 13 : index
    %c0_121 = arith.constant 0 : index
    %c0_122 = arith.constant 0 : index
    %162 = vector.load %arg2[%c13, %c0_121, %c0_122] : memref<19x64x64xbf16, #tpu.memory_space<vmem>>, vector<1x64x64xbf16>
    %163 = vector.shape_cast %162 : vector<1x64x64xbf16> to vector<64x64xbf16>
    %cst_123 = arith.constant dense<0.000000e+00> : vector<64x128xf32>
    %164 = tpu.matmul %163, %152, %cst_123 {dimension_numbers = #tpu.dot_dimension_numbers<[1], [0], [0], [1], [0, 0, 1, 1], [], []>} : vector<64x64xbf16>, vector<64x128xbf16>, vector<64x128xf32> -> vector<64x128xf32>
    %165 = arith.truncf %164 : vector<64x128xf32> to vector<64x128xbf16>
    %c13_124 = arith.constant 13 : index
    %c0_125 = arith.constant 0 : index
    %c0_126 = arith.constant 0 : index
    %166 = vector.load %arg3[%c13_124, %c0_125, %c0_126] : memref<21x128x128xbf16, #tpu.memory_space<vmem>>, vector<1x128x128xbf16>
    %167 = vector.shape_cast %166 : vector<1x128x128xbf16> to vector<128x128xbf16>
    %cst_127 = arith.constant dense<0.000000e+00> : vector<64x128xf32>
    %168 = tpu.matmul %165, %167, %cst_127 {dimension_numbers = #tpu.dot_dimension_numbers<[1], [0], [0], [1], [0, 0, 1, 1], [], []>} : vector<64x128xbf16>, vector<128x128xbf16>, vector<64x128xf32> -> vector<64x128xf32>
    %169 = arith.addf %161, %168 : vector<64x128xf32>
    %c14 = arith.constant 14 : index
    %c0_128 = arith.constant 0 : index
    %c0_129 = arith.constant 0 : index
    %170 = vector.load %arg2[%c14, %c0_128, %c0_129] : memref<19x64x64xbf16, #tpu.memory_space<vmem>>, vector<1x64x64xbf16>
    %171 = vector.shape_cast %170 : vector<1x64x64xbf16> to vector<64x64xbf16>
    %cst_130 = arith.constant dense<0.000000e+00> : vector<64x128xf32>
    %172 = tpu.matmul %171, %152, %cst_130 {dimension_numbers = #tpu.dot_dimension_numbers<[1], [0], [0], [1], [0, 0, 1, 1], [], []>} : vector<64x64xbf16>, vector<64x128xbf16>, vector<64x128xf32> -> vector<64x128xf32>
    %173 = arith.truncf %172 : vector<64x128xf32> to vector<64x128xbf16>
    %c14_131 = arith.constant 14 : index
    %c0_132 = arith.constant 0 : index
    %c0_133 = arith.constant 0 : index
    %174 = vector.load %arg3[%c14_131, %c0_132, %c0_133] : memref<21x128x128xbf16, #tpu.memory_space<vmem>>, vector<1x128x128xbf16>
    %175 = vector.shape_cast %174 : vector<1x128x128xbf16> to vector<128x128xbf16>
    %cst_134 = arith.constant dense<0.000000e+00> : vector<64x128xf32>
    %176 = tpu.matmul %173, %175, %cst_134 {dimension_numbers = #tpu.dot_dimension_numbers<[1], [0], [0], [1], [0, 0, 1, 1], [], []>} : vector<64x128xbf16>, vector<128x128xbf16>, vector<64x128xf32> -> vector<64x128xf32>
    %177 = arith.addf %169, %176 : vector<64x128xf32>
    %c4_135 = arith.constant 4 : index
    %c0_136 = arith.constant 0 : index
    %c0_137 = arith.constant 0 : index
    %178 = vector.load %arg4[%c4_135, %c0_136, %c0_137] : memref<8x1x128xf32, #tpu.memory_space<vmem>>, vector<1x1x128xf32>
    %179 = vector.shape_cast %178 : vector<1x1x128xf32> to vector<1x128xf32>
    %180 = vector.broadcast %179 : vector<1x128xf32> to vector<64x128xf32>
    %181 = arith.addf %177, %180 : vector<64x128xf32>
    %cst_138 = arith.constant 5.000000e-01 : f32
    %182 = vector.broadcast %cst_138 : f32 to vector<64x128xf32>
    %183 = arith.mulf %182, %181 : vector<64x128xf32>
    %cst_139 = arith.constant 0.707106769 : f32
    %184 = vector.broadcast %cst_139 : f32 to vector<64x128xf32>
    %185 = arith.mulf %181, %184 : vector<64x128xf32>
    %186 = math.erf %185 : vector<64x128xf32>
    %cst_140 = arith.constant 1.000000e+00 : f32
    %187 = vector.broadcast %cst_140 : f32 to vector<64x128xf32>
    %188 = arith.addf %187, %186 : vector<64x128xf32>
    %189 = arith.mulf %183, %188 : vector<64x128xf32>
    %190 = arith.truncf %189 : vector<64x128xf32> to vector<64x128xbf16>
    %cst_141 = arith.constant 0.000000e+00 : f32
    %191 = vector.broadcast %cst_141 : f32 to vector<64x128xf32>
    %c15 = arith.constant 15 : index
    %c0_142 = arith.constant 0 : index
    %c0_143 = arith.constant 0 : index
    %192 = vector.load %arg2[%c15, %c0_142, %c0_143] : memref<19x64x64xbf16, #tpu.memory_space<vmem>>, vector<1x64x64xbf16>
    %193 = vector.shape_cast %192 : vector<1x64x64xbf16> to vector<64x64xbf16>
    %cst_144 = arith.constant dense<0.000000e+00> : vector<64x128xf32>
    %194 = tpu.matmul %193, %190, %cst_144 {dimension_numbers = #tpu.dot_dimension_numbers<[1], [0], [0], [1], [0, 0, 1, 1], [], []>} : vector<64x64xbf16>, vector<64x128xbf16>, vector<64x128xf32> -> vector<64x128xf32>
    %195 = arith.truncf %194 : vector<64x128xf32> to vector<64x128xbf16>
    %c15_145 = arith.constant 15 : index
    %c0_146 = arith.constant 0 : index
    %c0_147 = arith.constant 0 : index
    %196 = vector.load %arg3[%c15_145, %c0_146, %c0_147] : memref<21x128x128xbf16, #tpu.memory_space<vmem>>, vector<1x128x128xbf16>
    %197 = vector.shape_cast %196 : vector<1x128x128xbf16> to vector<128x128xbf16>
    %cst_148 = arith.constant dense<0.000000e+00> : vector<64x128xf32>
    %198 = tpu.matmul %195, %197, %cst_148 {dimension_numbers = #tpu.dot_dimension_numbers<[1], [0], [0], [1], [0, 0, 1, 1], [], []>} : vector<64x128xbf16>, vector<128x128xbf16>, vector<64x128xf32> -> vector<64x128xf32>
    %199 = arith.addf %191, %198 : vector<64x128xf32>
    %c16 = arith.constant 16 : index
    %c0_149 = arith.constant 0 : index
    %c0_150 = arith.constant 0 : index
    %200 = vector.load %arg2[%c16, %c0_149, %c0_150] : memref<19x64x64xbf16, #tpu.memory_space<vmem>>, vector<1x64x64xbf16>
    %201 = vector.shape_cast %200 : vector<1x64x64xbf16> to vector<64x64xbf16>
    %cst_151 = arith.constant dense<0.000000e+00> : vector<64x128xf32>
    %202 = tpu.matmul %201, %190, %cst_151 {dimension_numbers = #tpu.dot_dimension_numbers<[1], [0], [0], [1], [0, 0, 1, 1], [], []>} : vector<64x64xbf16>, vector<64x128xbf16>, vector<64x128xf32> -> vector<64x128xf32>
    %203 = arith.truncf %202 : vector<64x128xf32> to vector<64x128xbf16>
    %c16_152 = arith.constant 16 : index
    %c0_153 = arith.constant 0 : index
    %c0_154 = arith.constant 0 : index
    %204 = vector.load %arg3[%c16_152, %c0_153, %c0_154] : memref<21x128x128xbf16, #tpu.memory_space<vmem>>, vector<1x128x128xbf16>
    %205 = vector.shape_cast %204 : vector<1x128x128xbf16> to vector<128x128xbf16>
    %cst_155 = arith.constant dense<0.000000e+00> : vector<64x128xf32>
    %206 = tpu.matmul %203, %205, %cst_155 {dimension_numbers = #tpu.dot_dimension_numbers<[1], [0], [0], [1], [0, 0, 1, 1], [], []>} : vector<64x128xbf16>, vector<128x128xbf16>, vector<64x128xf32> -> vector<64x128xf32>
    %207 = arith.addf %199, %206 : vector<64x128xf32>
    %c17 = arith.constant 17 : index
    %c0_156 = arith.constant 0 : index
    %c0_157 = arith.constant 0 : index
    %208 = vector.load %arg2[%c17, %c0_156, %c0_157] : memref<19x64x64xbf16, #tpu.memory_space<vmem>>, vector<1x64x64xbf16>
    %209 = vector.shape_cast %208 : vector<1x64x64xbf16> to vector<64x64xbf16>
    %cst_158 = arith.constant dense<0.000000e+00> : vector<64x128xf32>
    %210 = tpu.matmul %209, %190, %cst_158 {dimension_numbers = #tpu.dot_dimension_numbers<[1], [0], [0], [1], [0, 0, 1, 1], [], []>} : vector<64x64xbf16>, vector<64x128xbf16>, vector<64x128xf32> -> vector<64x128xf32>
    %211 = arith.truncf %210 : vector<64x128xf32> to vector<64x128xbf16>
    %c17_159 = arith.constant 17 : index
    %c0_160 = arith.constant 0 : index
    %c0_161 = arith.constant 0 : index
    %212 = vector.load %arg3[%c17_159, %c0_160, %c0_161] : memref<21x128x128xbf16, #tpu.memory_space<vmem>>, vector<1x128x128xbf16>
    %213 = vector.shape_cast %212 : vector<1x128x128xbf16> to vector<128x128xbf16>
    %cst_162 = arith.constant dense<0.000000e+00> : vector<64x128xf32>
    %214 = tpu.matmul %211, %213, %cst_162 {dimension_numbers = #tpu.dot_dimension_numbers<[1], [0], [0], [1], [0, 0, 1, 1], [], []>} : vector<64x128xbf16>, vector<128x128xbf16>, vector<64x128xf32> -> vector<64x128xf32>
    %215 = arith.addf %207, %214 : vector<64x128xf32>
    %c18 = arith.constant 18 : index
    %c0_163 = arith.constant 0 : index
    %c0_164 = arith.constant 0 : index
    %216 = vector.load %arg2[%c18, %c0_163, %c0_164] : memref<19x64x64xbf16, #tpu.memory_space<vmem>>, vector<1x64x64xbf16>
    %217 = vector.shape_cast %216 : vector<1x64x64xbf16> to vector<64x64xbf16>
    %cst_165 = arith.constant dense<0.000000e+00> : vector<64x128xf32>
    %218 = tpu.matmul %217, %190, %cst_165 {dimension_numbers = #tpu.dot_dimension_numbers<[1], [0], [0], [1], [0, 0, 1, 1], [], []>} : vector<64x64xbf16>, vector<64x128xbf16>, vector<64x128xf32> -> vector<64x128xf32>
    %219 = arith.truncf %218 : vector<64x128xf32> to vector<64x128xbf16>
    %c18_166 = arith.constant 18 : index
    %c0_167 = arith.constant 0 : index
    %c0_168 = arith.constant 0 : index
    %220 = vector.load %arg3[%c18_166, %c0_167, %c0_168] : memref<21x128x128xbf16, #tpu.memory_space<vmem>>, vector<1x128x128xbf16>
    %221 = vector.shape_cast %220 : vector<1x128x128xbf16> to vector<128x128xbf16>
    %cst_169 = arith.constant dense<0.000000e+00> : vector<64x128xf32>
    %222 = tpu.matmul %219, %221, %cst_169 {dimension_numbers = #tpu.dot_dimension_numbers<[1], [0], [0], [1], [0, 0, 1, 1], [], []>} : vector<64x128xbf16>, vector<128x128xbf16>, vector<64x128xf32> -> vector<64x128xf32>
    %223 = arith.addf %215, %222 : vector<64x128xf32>
    %c5_170 = arith.constant 5 : index
    %c0_171 = arith.constant 0 : index
    %c0_172 = arith.constant 0 : index
    %224 = vector.load %arg4[%c5_170, %c0_171, %c0_172] : memref<8x1x128xf32, #tpu.memory_space<vmem>>, vector<1x1x128xf32>
    %225 = vector.shape_cast %224 : vector<1x1x128xf32> to vector<1x128xf32>
    %226 = vector.broadcast %225 : vector<1x128xf32> to vector<64x128xf32>
    %227 = arith.addf %223, %226 : vector<64x128xf32>
    %cst_173 = arith.constant 5.000000e-01 : f32
    %228 = vector.broadcast %cst_173 : f32 to vector<64x128xf32>
    %229 = arith.mulf %228, %227 : vector<64x128xf32>
    %cst_174 = arith.constant 0.707106769 : f32
    %230 = vector.broadcast %cst_174 : f32 to vector<64x128xf32>
    %231 = arith.mulf %227, %230 : vector<64x128xf32>
    %232 = math.erf %231 : vector<64x128xf32>
    %cst_175 = arith.constant 1.000000e+00 : f32
    %233 = vector.broadcast %cst_175 : f32 to vector<64x128xf32>
    %234 = arith.addf %233, %232 : vector<64x128xf32>
    %235 = arith.mulf %229, %234 : vector<64x128xf32>
    %236 = arith.truncf %235 : vector<64x128xf32> to vector<64x128xbf16>
    %cst_176 = arith.constant 0.000000e+00 : f32
    %237 = vector.broadcast %cst_176 : f32 to vector<64x128xf32>
    %c19 = arith.constant 19 : index
    %c0_177 = arith.constant 0 : index
    %c0_178 = arith.constant 0 : index
    %238 = vector.load %arg3[%c19, %c0_177, %c0_178] : memref<21x128x128xbf16, #tpu.memory_space<vmem>>, vector<1x128x128xbf16>
    %239 = vector.shape_cast %238 : vector<1x128x128xbf16> to vector<128x128xbf16>
    %cst_179 = arith.constant dense<0.000000e+00> : vector<64x128xf32>
    %240 = tpu.matmul %236, %239, %cst_179 {dimension_numbers = #tpu.dot_dimension_numbers<[1], [0], [0], [1], [0, 0, 1, 1], [], []>} : vector<64x128xbf16>, vector<128x128xbf16>, vector<64x128xf32> -> vector<64x128xf32>
    %241 = arith.addf %237, %240 : vector<64x128xf32>
    %c6_180 = arith.constant 6 : index
    %c0_181 = arith.constant 0 : index
    %c0_182 = arith.constant 0 : index
    %242 = vector.load %arg4[%c6_180, %c0_181, %c0_182] : memref<8x1x128xf32, #tpu.memory_space<vmem>>, vector<1x1x128xf32>
    %243 = vector.shape_cast %242 : vector<1x1x128xf32> to vector<1x128xf32>
    %244 = vector.broadcast %243 : vector<1x128xf32> to vector<64x128xf32>
    %245 = arith.addf %241, %244 : vector<64x128xf32>
    %cst_183 = arith.constant 5.000000e-01 : f32
    %246 = vector.broadcast %cst_183 : f32 to vector<64x128xf32>
    %247 = arith.mulf %246, %245 : vector<64x128xf32>
    %cst_184 = arith.constant 0.707106769 : f32
    %248 = vector.broadcast %cst_184 : f32 to vector<64x128xf32>
    %249 = arith.mulf %245, %248 : vector<64x128xf32>
    %250 = math.erf %249 : vector<64x128xf32>
    %cst_185 = arith.constant 1.000000e+00 : f32
    %251 = vector.broadcast %cst_185 : f32 to vector<64x128xf32>
    %252 = arith.addf %251, %250 : vector<64x128xf32>
    %253 = arith.mulf %247, %252 : vector<64x128xf32>
    %254 = arith.truncf %253 : vector<64x128xf32> to vector<64x128xbf16>
    %cst_186 = arith.constant 0.000000e+00 : f32
    %255 = vector.broadcast %cst_186 : f32 to vector<64x128xf32>
    %c20 = arith.constant 20 : index
    %c0_187 = arith.constant 0 : index
    %c0_188 = arith.constant 0 : index
    %256 = vector.load %arg3[%c20, %c0_187, %c0_188] : memref<21x128x128xbf16, #tpu.memory_space<vmem>>, vector<1x128x128xbf16>
    %257 = vector.shape_cast %256 : vector<1x128x128xbf16> to vector<128x128xbf16>
    %cst_189 = arith.constant dense<0.000000e+00> : vector<64x128xf32>
    %258 = tpu.matmul %254, %257, %cst_189 {dimension_numbers = #tpu.dot_dimension_numbers<[1], [0], [0], [1], [0, 0, 1, 1], [], []>} : vector<64x128xbf16>, vector<128x128xbf16>, vector<64x128xf32> -> vector<64x128xf32>
    %259 = arith.addf %255, %258 : vector<64x128xf32>
    %c7_190 = arith.constant 7 : index
    %c0_191 = arith.constant 0 : index
    %c0_192 = arith.constant 0 : index
    %260 = vector.load %arg4[%c7_190, %c0_191, %c0_192] : memref<8x1x128xf32, #tpu.memory_space<vmem>>, vector<1x1x128xf32>
    %261 = vector.shape_cast %260 : vector<1x1x128xf32> to vector<1x128xf32>
    %262 = vector.broadcast %261 : vector<1x128xf32> to vector<64x128xf32>
    %263 = arith.addf %259, %262 : vector<64x128xf32>
    %264 = vector.extract_strided_slice %263 {offsets = [0, 0], sizes = [8, 128], strides = [1, 1]} : vector<64x128xf32> to vector<8x128xf32>
    %c0_193 = arith.constant 0 : index
    %c0_194 = arith.constant 0 : index
    %265 = vector.load %arg5[%c0_193, %c0_194] : memref<8x128xf32, #tpu.memory_space<vmem>>, vector<8x128xf32>
    tpu.vector_store %arg5[%c0_193, %c0_194], %264 {strides = array<i32>} : memref<8x128xf32, #tpu.memory_space<vmem>>, vector<8x128xf32>,
    return
  }
  func.func @transform_0(%arg0: i32) -> (i32, i32) {
    %c0_i32 = arith.constant 0 : i32
    %c0_i32_0 = arith.constant 0 : i32
    %c0_i32_1 = arith.constant 0 : i32
    return %c0_i32, %c0_i32_0 : i32, i32
  }
  func.func @transform_1(%arg0: i32) -> (i32, i32, i32) {
    %c0_i32 = arith.constant 0 : i32
    %c0_i32_0 = arith.constant 0 : i32
    %c0_i32_1 = arith.constant 0 : i32
    %c0_i32_2 = arith.constant 0 : i32
    return %c0_i32, %c0_i32_0, %c0_i32_1 : i32, i32, i32
  }
  func.func @transform_2(%arg0: i32) -> (i32, i32, i32) {
    %c0_i32 = arith.constant 0 : i32
    %c0_i32_0 = arith.constant 0 : i32
    %c0_i32_1 = arith.constant 0 : i32
    %c0_i32_2 = arith.constant 0 : i32
    return %c0_i32, %c0_i32_0, %c0_i32_1 : i32, i32, i32
  }
  func.func @transform_3(%arg0: i32) -> (i32, i32, i32) {
    %c0_i32 = arith.constant 0 : i32
    %c0_i32_0 = arith.constant 0 : i32
    %c0_i32_1 = arith.constant 0 : i32
    %c0_i32_2 = arith.constant 0 : i32
    return %c0_i32, %c0_i32_0, %c0_i32_1 : i32, i32, i32
  }
  func.func @transform_4(%arg0: i32) -> (i32, i32) {
    %c0_i32 = arith.constant 0 : i32
    %c0_i32_0 = arith.constant 0 : i32
    %c0_i32_1 = arith.constant 0 : i32
    return %c0_i32, %c0_i32_0 : i32, i32
  }
}

</mosaic_0001>

<bundles_post_ra>
// kernel: forward.1
= control target key start
LH: loop header
LB: loop body
LE: loop exit
PB: predicated region body
PF: predicated region fallthrough
CT: control target
= control target key end

     0   :  { %9 = vsyncpa [#allocation3], 0  ;;  %s7441_s15 = smov [#allocation2]   ;;  %s8107_s0 = inlined_call_operand.vmem [shape: bf16[64,128], index: 0, kind: input, shape index: {}]   ;;  %s8108_s1 = inlined_call_operand.vmem [shape: bf16[19,64,64], index: 1, kind: input, shape index: {}]   ;;  %s8109_s2 = inlined_call_operand.hbm [shape: bf16[21,128,128], index: 2, kind: input, shape index: {}]   ;;  %s8110_s3 = inlined_call_operand.vmem [shape: f32[8,1,128], index: 3, kind: input, shape index: {}]   ;;  %s8111_s4 = inlined_call_operand.vmem [shape: f32[8,128], index: 4, kind: output, shape index: {}]  }
   0x1   :  { %s19_s16 = sshll.u32 %s7441_s15, 4  ;;  %s20_s16 = int_to_ptr.vmem [resolvable:$true] %s19_s16 }
   0x2   :  { %s7427_s17 = scalar_lea.vmem %s20_s16, 21504  ;;  %p7432_p1 = scmp.lt.s32.totalorder %s20_s16, %s20_s16 }
   0x3   :  { %p7428_p0 = scmp.ne.s32.totalorder %s20_s16, %s7427_s17  ;;  %p7433_p2 = scmp.lt.s32.totalorder %s7427_s17, %s7427_s17 }
   0x5   :  { %p7434_p3 = por %p7433_p2, %p7432_p1 }
   0x7   :  { %p7435_p4 = pnand %p7434_p3, %p7428_p0 }
   0x9   :  { %7438 = shalt.err (!%p7435_p4)
}
   0xa   :  { %s7442_s18 = smov 64   ;;  %s7443_s19 = smov 4  }
   0xb   :  { %25 = dma.hbm_to_vmem [thread:$0]  %s8109_s2, 21504, %s20_s16, [#allocation3], %s7442_s18, %s7442_s18, %s7443_s19  }
   0xc   :  { %7439 = dma.done.wait [#allocation3], 21504  }
   0xd   :  { %7440 = vsyncadd [#allocation3], 4294945792  ;;  %v7475_v0 = vld [vmem:[%s8107_s0 + $0x18] sm:$0xff]   ;;  %v7056_v1 = vld [vmem:[%s8107_s0 + $0x10] sm:$0xff]   ;;  %vm92_vm0 = vcmask 523264  }
   0xe   :  { %6244 = vmatprep.subr.bf16.mxu0 %v7475_v0  ;;  %6260 = vmatprep.subr.bf16.mxu1 %v7475_v0  ;;  %v7057_v2 = vld [vmem:[%s8107_s0 + $0x8] sm:$0xff]   ;;  %v7059_v3 = vld [vmem:[%s8108_s1] sm:$0xff]   ;;  %v7067_v8 = vld [vmem:[#allocation2 + $0x78] sm:$0xff]  }
   0xf   :  { %6245 = vmatpush3.bf16.msra.mxu0 %v7475_v0  ;;  %6261 = vmatpush3.bf16.msra.mxu1 %v7475_v0  ;;  %v7060_v4 = vld [vmem:[%s8108_s1 + $0x20] sm:$0xff]   ;;  %v7061_v6 = vld [vmem:[%s8108_s1 + $0x8] sm:$0xff]   ;;  %v7068_v9 = vld [vmem:[#allocation2 + $0x38] sm:$0xff]  }
  0x10   :  { %6246 = vmatprep.subr.bf16.mxu0 %v7056_v1  ;;  %6262 = vmatprep.subr.bf16.mxu1 %v7056_v1  ;;  %v7058_v5 = vld [vmem:[%s8107_s0] sm:$0xff]   ;;  %v7062_v7 = vld [vmem:[%s8108_s1 + $0x28] sm:$0xff]   ;;  %v7063_v10 = vld [vmem:[%s8108_s1 + $0x10] sm:$0xff]  }
  0x11   :  { %6252 = vmatprep.mubr.msk.bf16.mxu0 %vm92_vm0, %v7059_v3  ;;  %6268 = vmatprep.mubr.msk.bf16.mxu1 %vm92_vm0, %v7060_v4  ;;  %v7064_v11 = vld [vmem:[%s8108_s1 + $0x30] sm:$0xff]   ;;  %v7065_v14 = vld [vmem:[%s8108_s1 + $0x18] sm:$0xff]   ;;  %v7071_v15 = vld [vmem:[#allocation2 + $0x68] sm:$0xff]  }
  0x12   :  { %v7069_v12 = vld [vmem:[#allocation2 + $0x70] sm:$0xff]   ;;  %v7072_v16 = vld [vmem:[#allocation2 + $0x28] sm:$0xff]   ;;  %v7066_v17 = vld [vmem:[%s8108_s1 + $0x38] sm:$0xff]  }
  0x13   :  { %6247 = vmatpush3.bf16.msra.mxu0 %v7056_v1  ;;  %6263 = vmatpush3.bf16.msra.mxu1 %v7056_v1  ;;  %v7070_v13 = vld [vmem:[#allocation2 + $0x30] sm:$0xff]   ;;  %v7073_v18 = vld [vmem:[#allocation2 + $0x60] sm:$0xff]   ;;  %v7075_v20 = vld [vmem:[#allocation2 + $0x58] sm:$0xff]  }
  0x14   :  { %6248 = vmatprep.subr.bf16.mxu0 %v7057_v2  ;;  %6264 = vmatprep.subr.bf16.mxu1 %v7057_v2  ;;  %v7074_v19 = vld [vmem:[#allocation2 + $0x20] sm:$0xff]   ;;  %v7076_v21 = vld [vmem:[#allocation2 + $0x18] sm:$0xff]   ;;  %v7077_v22 = vld [vmem:[#allocation2 + $0x50] sm:$0xff]  }
  0x15   :  { %v7078_v23 = vld [vmem:[#allocation2 + $0x10] sm:$0xff]   ;;  %v7079_v24 = vld [vmem:[#allocation2 + $0x48] sm:$0xff]   ;;  %v7081_v26 = vld [vmem:[#allocation2 + $0x40] sm:$0xff]  }
  0x16   :  { %v7080_v25 = vld [vmem:[#allocation2 + $0x8] sm:$0xff]   ;;  %v7082_v27 = vld [vmem:[#allocation2] sm:$0xff]   ;;  %v7087_v28 = vld [vmem:[#allocation2 + $0xb8] sm:$0xff]  }
  0x17   :  { %6249 = vmatpush3.bf16.msra.mxu0 %v7057_v2  ;;  %6265 = vmatpush3.bf16.msra.mxu1 %v7057_v2  ;;  %v7088_v43 = vld [vmem:[#allocation2 + $0xb0] sm:$0xff]   ;;  %v7415_v46 = vld [vmem:[%s8107_s0 + $0x18] sm:$0xff]   ;;  %v7083_v55 = vld [vmem:[%s8108_s1 + $0x40] sm:$0xff]  }
  0x18   :  { %6250 = vmatprep.subr.bf16.mxu0 %v7058_v5  ;;  %6266 = vmatprep.subr.bf16.mxu1 %v7058_v5  ;;  %v7416_v49 = vld [vmem:[%s8107_s0 + $0x10] sm:$0xff]   ;;  %v7417_v57 = vld [vmem:[%s8107_s0 + $0x8] sm:$0xff]   ;;  %v7418_v58 = vld [vmem:[%s8107_s0] sm:$0xff]  }
  0x19   :  { %v7084_v59 = vld [vmem:[%s8108_s1 + $0x48] sm:$0xff]   ;;  %v7085_v60 = vld [vmem:[%s8108_s1 + $0x50] sm:$0xff]   ;;  %v7086_v61 = vld [vmem:[%s8108_s1 + $0x58] sm:$0xff]  }
  0x1a   :  { %v7089_v62 = vld [vmem:[#allocation2 + $0xa8] sm:$0xff]   ;;  %v7090_v63 = vld [vmem:[#allocation2 + $0xa0] sm:$0xff]   ;;  %v7092_v1 = vld [vmem:[#allocation2 + $0x90] sm:$0xff]  }
  0x1b   :  { %6251 = vmatpush3.bf16.msra.mxu0 %v7058_v5  ;;  %6267 = vmatpush3.bf16.msra.mxu1 %v7058_v5  ;;  %v7093_v2 = vld [vmem:[#allocation2 + $0x88] sm:$0xff]   ;;  %v7094_v3 = vld [vmem:[#allocation2 + $0x80] sm:$0xff]  }
  0x1c   :  { %6276 = vmatprep.subr.bf16.mxu0 %v7067_v8  ;;  %6300 = vmatprep.subr.bf16.mxu1 %v7068_v9 }
  0x1e   :  { %6253 = vmatmul.mubr.msk.bf16.vlgmr.msra.gmra.mxu0 %vm92_vm0, %v7061_v6  ;;  %6269 = vmatmul.mubr.msk.bf16.vlgmr.msra.gmra.mxu1 %vm92_vm0, %v7062_v7 }
  0x1f   :  { %6256 = vmatprep.mubr.msk.bf16.mxu0 %vm92_vm0, %v7063_v10  ;;  %6272 = vmatprep.mubr.msk.bf16.mxu1 %vm92_vm0, %v7064_v11 }
  0x20   :  { %6277 = vmatpush3.bf16.msra.mxu0 %v7067_v8  ;;  %6301 = vmatpush3.bf16.msra.mxu1 %v7068_v9 }
  0x21   :  { %6278 = vmatprep.subr.bf16.mxu0 %v7069_v12  ;;  %6302 = vmatprep.subr.bf16.mxu1 %v7070_v13 }
  0x24   :  { %6279 = vmatpush3.bf16.msra.mxu0 %v7069_v12  ;;  %6303 = vmatpush3.bf16.msra.mxu1 %v7070_v13 }
  0x25   :  { %6280 = vmatprep.subr.bf16.mxu0 %v7071_v15  ;;  %6304 = vmatprep.subr.bf16.mxu1 %v7072_v16 }
  0x26   :  { %6257 = vmatmul.mubr.msk.bf16.gmra.mxu0 %vm92_vm0, %v7065_v14  ;;  %6273 = vmatmul.mubr.msk.bf16.gmra.mxu1 %vm92_vm0, %v7066_v17 }
  0x28   :  { %6281 = vmatpush3.bf16.msra.mxu0 %v7071_v15  ;;  %6305 = vmatpush3.bf16.msra.mxu1 %v7072_v16 }
  0x29   :  { %6282 = vmatprep.subr.bf16.mxu0 %v7073_v18  ;;  %6306 = vmatprep.subr.bf16.mxu1 %v7074_v19 }
  0x2c   :  { %6283 = vmatpush3.bf16.msra.mxu0 %v7073_v18  ;;  %6307 = vmatpush3.bf16.msra.mxu1 %v7074_v19 }
  0x2d   :  { %6284 = vmatprep.subr.bf16.mxu0 %v7075_v20  ;;  %6308 = vmatprep.subr.bf16.mxu1 %v7076_v21 }
  0x30   :  { %6285 = vmatpush3.bf16.msra.mxu0 %v7075_v20  ;;  %6309 = vmatpush3.bf16.msra.mxu1 %v7076_v21 }
  0x31   :  { %6286 = vmatprep.subr.bf16.mxu0 %v7077_v22  ;;  %6310 = vmatprep.subr.bf16.mxu1 %v7078_v23 }
  0x34   :  { %6287 = vmatpush3.bf16.msra.mxu0 %v7077_v22  ;;  %6311 = vmatpush3.bf16.msra.mxu1 %v7078_v23 }
  0x35   :  { %6288 = vmatprep.subr.bf16.mxu0 %v7079_v24  ;;  %6312 = vmatprep.subr.bf16.mxu1 %v7080_v25 }
  0x38   :  { %6289 = vmatpush3.bf16.msra.mxu0 %v7079_v24  ;;  %6313 = vmatpush3.bf16.msra.mxu1 %v7080_v25  ;;  %v7095_v24 = vld [vmem:[#allocation2 + $0x138] sm:$0xff]   ;;  %v7096_v25 = vld [vmem:[#allocation2 + $0x130] sm:$0xff]  }
  0x39   :  { %6290 = vmatprep.subr.bf16.mxu0 %v7081_v26  ;;  %6314 = vmatprep.subr.bf16.mxu1 %v7082_v27 }
  0x3c   :  { %6291 = vmatpush3.bf16.msra.mxu0 %v7081_v26  ;;  %6315 = vmatpush3.bf16.msra.mxu1 %v7082_v27  ;;  %v7097_v26 = vld [vmem:[#allocation2 + $0x128] sm:$0xff]   ;;  %v7098_v27 = vld [vmem:[#allocation2 + $0x120] sm:$0xff]  }
  0x3d   :  { %6324 = vmatprep.subr.bf16.mxu0 %v7475_v0  ;;  %6340 = vmatprep.subr.bf16.mxu1 %v7087_v28  ;;  %v7091_v0 = vld [vmem:[#allocation2 + $0x98] sm:$0xff]  }
  0xde   :  { %v6254_v29 = vpop.f32.mrf.mxu0  ;;  %v6270_v30 = vpop.f32.mrf.mxu1 }
  0xe0   :  { %v139_v31 = vpop.f32.mrf.mxu0  ;;  %v265_v32 = vpop.f32.mrf.mxu1 }
  0xe2   :  { %v6255_v33 = vpop.f32.mrf.mxu0  ;;  %v6271_v34 = vpop.f32.mrf.mxu1 }
  0xe3   :  { %v171_v35 = vpack.c.bf16 %v6255_v33, %v6254_v29  ;;  %v297_v40 = vpack.c.bf16 %v6271_v34, %v6270_v30  ;;  %v7100_v29 = vld [vmem:[#allocation2 + $0x110] sm:$0xff]   ;;  %v7101_v30 = vld [vmem:[#allocation2 + $0x108] sm:$0xff]  }
  0xe4   :  { %v142_v36 = vpop.f32.mrf.mxu0  ;;  %v268_v37 = vpop.f32.mrf.mxu1 }
  0xe5   :  { %v170_v38 = vpack.c.bf16 %v142_v36, %v139_v31  ;;  %v296_v39 = vpack.c.bf16 %v268_v37, %v265_v32  ;;  %v7102_v31 = vld [vmem:[#allocation2 + $0x100] sm:$0xff]  }
  0xe6   :  { %v6258_v41 = vpop.f32.mrf.mxu0  ;;  %v6274_v42 = vpop.f32.mrf.mxu1  ;;  %v7103_v32 = vld [vmem:[%s8108_s1 + $0x60] sm:$0xff]  }
  0xe7   :  { %6292 = vmatprep.mubr.bf16.mxu0 %v296_v39  ;;  %6316 = vmatprep.mubr.bf16.mxu1 %v170_v38 }
  0xe8   :  { %v155_v44 = vpop.f32.mrf.mxu0  ;;  %v281_v45 = vpop.f32.mrf.mxu1  ;;  %6293 = vmatmul.mubr.bf16.vlgmr.msra.gmra.mxu0 %v297_v40  ;;  %6317 = vmatmul.mubr.bf16.vlgmr.msra.gmra.mxu1 %v171_v35 }
  0xe9   :  { %6325 = vmatpush3.bf16.msra.mxu0 %v7415_v46  ;;  %6341 = vmatpush3.bf16.msra.mxu1 %v7087_v28  ;;  %v7099_v28 = vld [vmem:[#allocation2 + $0x118] sm:$0xff]  }
  0xea   :  { %v6259_v47 = vpop.f32.mrf.mxu0  ;;  %v6275_v48 = vpop.f32.mrf.mxu1  ;;  %6326 = vmatprep.subr.bf16.mxu0 %v7416_v49  ;;  %6342 = vmatprep.subr.bf16.mxu1 %v7088_v43 }
  0xeb   :  { %v173_v50 = vpack.c.bf16 %v6259_v47, %v6258_v41  ;;  %v299_v56 = vpack.c.bf16 %v6275_v48, %v6274_v42 }
  0xec   :  { %v158_v51 = vpop.f32.mrf.mxu0  ;;  %v284_v52 = vpop.f32.mrf.mxu1 }
  0xed   :  { %v172_v53 = vpack.c.bf16 %v158_v51, %v155_v44  ;;  %v298_v54 = vpack.c.bf16 %v284_v52, %v281_v45  ;;  %6327 = vmatpush3.bf16.msra.mxu0 %v7416_v49  ;;  %6343 = vmatpush3.bf16.msra.mxu1 %v7088_v43  ;;  %v5425_v43 = vld [vmem:[%s8110_s3] ss:$0 sm:$0xff] }
  0xee   :  { %6328 = vmatprep.subr.bf16.mxu0 %v7417_v57  ;;  %6344 = vmatprep.subr.bf16.mxu1 %v7089_v62 }
  0xef   :  { %6296 = vmatprep.mubr.bf16.mxu0 %v298_v54  ;;  %6320 = vmatprep.mubr.bf16.mxu1 %v172_v53 }
  0xf0   :  { %6297 = vmatmul.mubr.bf16.gmra.mxu0 %v299_v56  ;;  %6321 = vmatmul.mubr.bf16.gmra.mxu1 %v173_v50 }
  0xf1   :  { %6329 = vmatpush3.bf16.msra.mxu0 %v7417_v57  ;;  %6332 = vmatprep.mubr.msk.bf16.mxu0 %vm92_vm0, %v7083_v55 }
  0xf2   :  { %6330 = vmatprep.subr.bf16.mxu0 %v7418_v58  ;;  %6345 = vmatpush3.bf16.msra.mxu1 %v7089_v62 }
  0xf3   :  { %6346 = vmatprep.subr.bf16.mxu1 %v7090_v63 }
  0xf5   :  { %6331 = vmatpush3.bf16.msra.mxu0 %v7418_v58 }
  0xf6   :  { %6347 = vmatpush3.bf16.msra.mxu1 %v7090_v63 }
  0xf7   :  { %6348 = vmatprep.subr.bf16.mxu1 %v7091_v0 }
  0xf8   :  { %6333 = vmatmul.mubr.msk.bf16.vlgmr.msra.gmra.mxu0 %vm92_vm0, %v7084_v59 }
  0xf9   :  { %6336 = vmatprep.mubr.msk.bf16.mxu0 %vm92_vm0, %v7085_v60 }
  0xfa   :  { %6349 = vmatpush3.bf16.msra.mxu1 %v7091_v0 }
  0xfb   :  { %6350 = vmatprep.subr.bf16.mxu1 %v7092_v1 }
  0xfe   :  { %6351 = vmatpush3.bf16.msra.mxu1 %v7092_v1 }
  0xff   :  { %6352 = vmatprep.subr.bf16.mxu1 %v7093_v2 }
 0x100   :  { %6337 = vmatmul.mubr.msk.bf16.gmra.mxu0 %vm92_vm0, %v7086_v61 }
 0x101   :  { %6372 = vmatprep.mubr.msk.bf16.mxu0 %vm92_vm0, %v7103_v32 }
 0x102   :  { %6353 = vmatpush3.bf16.msra.mxu1 %v7093_v2 }
 0x103   :  { %6354 = vmatprep.subr.bf16.mxu1 %v7094_v3 }
 0x106   :  { %6355 = vmatpush3.bf16.msra.mxu1 %v7094_v3 }
 0x107   :  { %6396 = vmatprep.subr.bf16.mxu1 %v7095_v24 }
 0x1a8   :  { %v6294_v4 = vpop.f32.mrf.mxu0  ;;  %v6318_v33 = vpop.f32.mrf.mxu1 }
 0x1a9   :  { %v521_v41 = vadd.f32 %v6318_v33, %v6294_v4 }
 0x1aa   :  { %v7551_v5 = vpop.f32.mrf.mxu0  ;;  %v512_v34 = vpop.f32.mrf.mxu1 }
 0x1ab   :  { %v513_v59 = vadd.f32 %v512_v34, %v7551_v5 }
 0x1ac   :  { %v6295_v6 = vpop.f32.mrf.mxu0  ;;  %v6319_v35 = vpop.f32.mrf.mxu1 }
 0x1ad   :  { %v524_v46 = vadd.f32 %v6319_v35, %v6295_v6 }
 0x1ae   :  { %v7553_v7 = vpop.f32.mrf.mxu0  ;;  %v515_v36 = vpop.f32.mrf.mxu1 }
 0x1af   :  { %v516_v55 = vadd.f32 %v515_v36, %v7553_v7 }
 0x1b0   :  { %v7555_v8 = vpop.f32.mrf.mxu0  ;;  %v6322_v37 = vpop.f32.mrf.mxu1 }
 0x1b1   :  { %v537_v52 = vadd.f32 %v6322_v37, %v7555_v8 }
 0x1b2   :  { %v7557_v9 = vpop.f32.mrf.mxu0  ;;  %v528_v38 = vpop.f32.mrf.mxu1 }
 0x1b3   :  { %v529_v56 = vadd.f32 %v528_v38, %v7557_v9 }
 0x1b4   :  { %v7559_v10 = vpop.f32.mrf.mxu0  ;;  %v6323_v39 = vpop.f32.mrf.mxu1 }
 0x1b5   :  { %v540_v60 = vadd.f32 %v6323_v39, %v7559_v10 }
 0x1b6   :  { %v7561_v11 = vpop.f32.mrf.mxu0  ;;  %v531_v40 = vpop.f32.mrf.mxu1 }
 0x1b7   :  { %v532_v7 = vadd.f32 %v531_v40, %v7561_v11 }
 0x1b8   :  { %v6334_v12 = vpop.f32.mrf.mxu0 }
 0x1ba   :  { %v618_v13 = vpop.f32.mrf.mxu0 }
 0x1bc   :  { %v6335_v14 = vpop.f32.mrf.mxu0 }
 0x1bd   :  { %v650_v17 = vpack.c.bf16 %v6335_v14, %v6334_v12 }
 0x1be   :  { %v621_v15 = vpop.f32.mrf.mxu0 }
 0x1bf   :  { %v649_v16 = vpack.c.bf16 %v621_v15, %v618_v13 }
 0x1c0   :  { %v6338_v18 = vpop.f32.mrf.mxu0 }
 0x1c1   :  { %6356 = vmatprep.mubr.bf16.mxu1 %v649_v16 }
 0x1c2   :  { %v634_v19 = vpop.f32.mrf.mxu0  ;;  %6357 = vmatmul.mubr.bf16.vlgmr.msra.gmra.mxu1 %v650_v17 }
 0x1c3   :  { %6397 = vmatpush3.bf16.msra.mxu1 %v7095_v24 }
 0x1c4   :  { %v6339_v20 = vpop.f32.mrf.mxu0  ;;  %6398 = vmatprep.subr.bf16.mxu1 %v7096_v25 }
 0x1c5   :  { %v652_v23 = vpack.c.bf16 %v6339_v20, %v6338_v18 }
 0x1c6   :  { %v637_v21 = vpop.f32.mrf.mxu0 }
 0x1c7   :  { %v651_v22 = vpack.c.bf16 %v637_v21, %v634_v19  ;;  %6399 = vmatpush3.bf16.msra.mxu1 %v7096_v25 }
 0x1c8   :  { %6400 = vmatprep.subr.bf16.mxu1 %v7097_v26 }
 0x1c9   :  { %6360 = vmatprep.mubr.bf16.mxu1 %v651_v22 }
 0x1ca   :  { %6361 = vmatmul.mubr.bf16.gmra.mxu1 %v652_v23 }
 0x1cb   :  { %6401 = vmatpush3.bf16.msra.mxu1 %v7097_v26 }
 0x1cc   :  { %6402 = vmatprep.subr.bf16.mxu1 %v7098_v27 }
 0x1cf   :  { %6403 = vmatpush3.bf16.msra.mxu1 %v7098_v27 }
 0x1d0   :  { %6404 = vmatprep.subr.bf16.mxu1 %v7099_v28 }
 0x1d3   :  { %6405 = vmatpush3.bf16.msra.mxu1 %v7099_v28 }
 0x1d4   :  { %6406 = vmatprep.subr.bf16.mxu1 %v7100_v29 }
 0x1d7   :  { %6407 = vmatpush3.bf16.msra.mxu1 %v7100_v29 }
 0x1d8   :  { %6408 = vmatprep.subr.bf16.mxu1 %v7101_v30 }
 0x1db   :  { %6409 = vmatpush3.bf16.msra.mxu1 %v7101_v30 }
 0x1dc   :  { %6410 = vmatprep.subr.bf16.mxu1 %v7102_v31 }
 0x1df   :  { %6411 = vmatpush3.bf16.msra.mxu1 %v7102_v31 }
 0x282   :  { %v6358_v42 = vpop.f32.mrf.mxu1 }
 0x283   :  { %v785_v44 = vadd.f32 %v6358_v42, %v521_v41 }
 0x284   :  { %v752_v45 = vpop.f32.mrf.mxu1 }
 0x285   :  { %v800_v47 = vadd.f32 %v5425_v43, %v785_v44  ;;  %v783_v2 = vadd.f32 %v752_v45, %v513_v59  ;;  %v7108_v59 = vld [vmem:[%s8108_s1 + $0x88] sm:$0xff]  }
 0x286   :  { %v6359_v48 = vpop.f32.mrf.mxu1 }
 0x287   :  { %v816_v49 = vmul.f32 0.70710677, %v800_v47  ;;  %v786_v50 = vadd.f32 %v6359_v48, %v524_v46  ;;  %v798_v14 = vadd.f32 %v5425_v43, %v783_v2  ;;  %v808_v11 = vmul.f32 0.5, %v800_v47  ;;  %v7116_v2 = vld [vmem:[#allocation2 + $0xd0] sm:$0xff]  }
 0x288   :  { %v755_v51 = vpop.f32.mrf.mxu1 }
 0x289   :  { %7303 = verf.f32 %v816_v49  ;;  %v801_v53 = vadd.f32 %v5425_v43, %v786_v50  ;;  %v784_v62 = vadd.f32 %v755_v51, %v516_v55  ;;  %v814_v19 = vmul.f32 0.70710677, %v798_v14  ;;  %v7105_v55 = vld [vmem:[%s8108_s1 + $0x70] sm:$0xff]  }
 0x28a   :  { %v6362_v54 = vpop.f32.mrf.mxu1  ;;  %v806_v50 = vmul.f32 0.5, %v798_v14 }
 0x28b   :  { %v817_v57 = vmul.f32 0.70710677, %v801_v53  ;;  %v789_v58 = vadd.f32 %v6362_v54, %v537_v52  ;;  %v799_v9 = vadd.f32 %v5425_v43, %v784_v62  ;;  %v809_v22 = vmul.f32 0.5, %v801_v53  ;;  %v7104_v54 = vld [vmem:[%s8108_s1 + $0x68] sm:$0xff]  }
 0x28c   :  { %v768_v61 = vpop.f32.mrf.mxu1  ;;  %v7113_v62 = vld [vmem:[#allocation2 + $0xe8] sm:$0xff]  }
 0x28d   :  { %7305 = verf.f32 %v817_v57  ;;  %v804_v63 = vadd.f32 %v5425_v43, %v789_v58  ;;  %v787_v0 = vadd.f32 %v768_v61, %v529_v56  ;;  %v815_v16 = vmul.f32 0.70710677, %v799_v9  ;;  %v7106_v56 = vld [vmem:[%s8108_s1 + $0x78] sm:$0xff]   ;;  %v7107_v57 = vld [vmem:[%s8108_s1 + $0x80] sm:$0xff]   ;;  %v7112_v61 = vld [vmem:[#allocation2 + $0xf0] sm:$0xff]  }
 0x28e   :  { %v6363_v1 = vpop.f32.mrf.mxu1  ;;  %v807_v49 = vmul.f32 0.5, %v799_v9  ;;  %v7111_v58 = vld [vmem:[#allocation2 + $0xf8] sm:$0xff]  }
 0x28f   :  { %v820_v3 = vmul.f32 0.70710677, %v804_v63  ;;  %v802_v4 = vadd.f32 %v5425_v43, %v787_v0  ;;  %v790_v6 = vadd.f32 %v6363_v1, %v540_v60  ;;  %v812_v31 = vmul.f32 0.5, %v804_v63  ;;  %v7109_v60 = vld [vmem:[%s8108_s1 + $0x90] sm:$0xff]   ;;  %v7110_v63 = vld [vmem:[%s8108_s1 + $0x98] sm:$0xff]   ;;  %v7114_v0 = vld [vmem:[#allocation2 + $0xe0] sm:$0xff]  }
 0x290   :  { %v771_v8 = vpop.f32.mrf.mxu1  ;;  %v7115_v1 = vld [vmem:[#allocation2 + $0xd8] sm:$0xff]  }
 0x291   :  { %7307 = verf.f32 %v820_v3  ;;  %v818_v12 = vmul.f32 0.70710677, %v802_v4  ;;  %v805_v13 = vadd.f32 %v5425_v43, %v790_v6  ;;  %v788_v5 = vadd.f32 %v771_v8, %v532_v7  ;;  %v7117_v3 = vld [vmem:[#allocation2 + $0xc8] sm:$0xff]  }
 0x292   :  { %v810_v39 = vmul.f32 0.5, %v802_v4  ;;  %v7118_v4 = vld [vmem:[#allocation2 + $0xc0] sm:$0xff]  }
 0x293   :  { %v821_v10 = vmul.f32 0.70710677, %v805_v13  ;;  %7309 = verf.f32 %v818_v12  ;;  %v803_v15 = vadd.f32 %v5425_v43, %v788_v5  ;;  %v813_v32 = vmul.f32 0.5, %v805_v13 }
 0x295   :  { %7311 = verf.f32 %v821_v10  ;;  %v819_v18 = vmul.f32 0.70710677, %v803_v15  ;;  %v811_v40 = vmul.f32 0.5, %v803_v15 }
 0x296   :  { %v7304_v17 = vpop.eup %7303 }
 0x297   :  { %7313 = verf.f32 %v819_v18  ;;  %v832_v20 = vadd.f32 1.0, %v7304_v17 }
 0x298   :  { %7315 = verf.f32 %v815_v16 }
 0x299   :  { %7317 = verf.f32 %v814_v19  ;;  %v840_v24 = vmul.f32 %v832_v20, %v808_v11 }
 0x29a   :  { %v7306_v21 = vpop.eup %7305 }
 0x29b   :  { %v833_v23 = vadd.f32 1.0, %v7306_v21 }
 0x29d   :  { %v841_v25 = vmul.f32 %v833_v23, %v809_v22 }
 0x29e   :  { %v7308_v26 = vpop.eup %7307 }
 0x29f   :  { %v7576_v27 = vpack.c.bf16 %v841_v25, %v840_v24  ;;  %v836_v29 = vadd.f32 1.0, %v7308_v26 }
 0x2a0   :  { %v7310_v28 = vpop.eup %7309 }
 0x2a1   :  { %v834_v34 = vadd.f32 1.0, %v7310_v28  ;;  %v844_v36 = vmul.f32 %v836_v29, %v812_v31  ;;  %v7119_v29 = vld [vmem:[%s8108_s1 + $0xa0] sm:$0xff]   ;;  %v7120_v31 = vld [vmem:[%s8108_s1 + $0xa8] sm:$0xff]  }
 0x2a2   :  { %v7312_v30 = vpop.eup %7311 }
 0x2a3   :  { %v837_v33 = vadd.f32 1.0, %v7312_v30  ;;  %v842_v44 = vmul.f32 %v834_v34, %v810_v39  ;;  %v7124_v34 = vld [vmem:[#allocation2 + $0x170] sm:$0xff]   ;;  %v7129_v39 = vld [vmem:[#allocation2 + $0x148] sm:$0xff]  }
 0x2a4   :  { %v7314_v35 = vpop.eup %7313 }
 0x2a5   :  { %v845_v37 = vmul.f32 %v837_v33, %v813_v32  ;;  %v7316_v38 = vpop.eup %7315  ;;  %v835_v41 = vadd.f32 1.0, %v7314_v35  ;;  %v7121_v32 = vld [vmem:[%s8108_s1 + $0xb0] sm:$0xff]   ;;  %v7123_v33 = vld [vmem:[#allocation2 + $0x178] sm:$0xff]   ;;  %v7125_v35 = vld [vmem:[#allocation2 + $0x168] sm:$0xff]  }
 0x2a6   :  { %v7318_v43 = vpop.eup %7317  ;;  %v831_v46 = vadd.f32 1.0, %v7316_v38  ;;  %v7128_v38 = vld [vmem:[#allocation2 + $0x150] sm:$0xff]  }
 0x2a7   :  { %v7578_v42 = vpack.c.bf16 %v845_v37, %v844_v36  ;;  %v843_v45 = vmul.f32 %v835_v41, %v811_v40  ;;  %v830_v48 = vadd.f32 1.0, %v7318_v43  ;;  %v7126_v36 = vld [vmem:[#allocation2 + $0x160] sm:$0xff]   ;;  %v7127_v37 = vld [vmem:[#allocation2 + $0x158] sm:$0xff]  }
 0x2a8   :  { %v839_v51 = vmul.f32 %v831_v46, %v807_v49  ;;  %v7130_v40 = vld [vmem:[#allocation2 + $0x140] sm:$0xff]  }
 0x2a9   :  { %6364 = vmatprep.subr.bf16.mxu0 %v7578_v42  ;;  %6444 = vmatprep.subr.bf16.mxu1 %v7578_v42  ;;  %v7582_v47 = vpack.c.bf16 %v843_v45, %v842_v44  ;;  %v838_v52 = vmul.f32 %v830_v48, %v806_v50 }
 0x2aa   :  { %6365 = vmatpush3.bf16.msra.mxu0 %v7578_v42 }
 0x2ab   :  { %6366 = vmatprep.subr.bf16.mxu0 %v7582_v47  ;;  %v7588_v53 = vpack.c.bf16 %v839_v51, %v838_v52 }
 0x2ae   :  { %6367 = vmatpush3.bf16.msra.mxu0 %v7582_v47 }
 0x2af   :  { %6368 = vmatprep.subr.bf16.mxu0 %v7576_v27 }
 0x2b2   :  { %6369 = vmatpush3.bf16.msra.mxu0 %v7576_v27 }
 0x2b3   :  { %6370 = vmatprep.subr.bf16.mxu0 %v7588_v53 }
 0x2b6   :  { %6371 = vmatpush3.bf16.msra.mxu0 %v7588_v53 }
 0x2b7   :  { %6380 = vmatprep.subr.bf16.mxu0 %v7578_v42 }
 0x2b9   :  { %6373 = vmatmul.mubr.msk.bf16.vlgmr.msra.gmra.mxu0 %vm92_vm0, %v7104_v54 }
 0x2ba   :  { %6381 = vmatpush3.bf16.msra.mxu0 %v7578_v42  ;;  %6376 = vmatprep.mubr.msk.bf16.mxu0 %vm92_vm0, %v7105_v55 }
 0x2bb   :  { %6382 = vmatprep.subr.bf16.mxu0 %v7582_v47 }
 0x2be   :  { %6383 = vmatpush3.bf16.msra.mxu0 %v7582_v47 }
 0x2bf   :  { %6384 = vmatprep.subr.bf16.mxu0 %v7576_v27 }
 0x2c1   :  { %6377 = vmatmul.mubr.msk.bf16.gmra.mxu0 %vm92_vm0, %v7106_v56 }
 0x2c2   :  { %6385 = vmatpush3.bf16.msra.mxu0 %v7576_v27  ;;  %6388 = vmatprep.mubr.msk.bf16.mxu0 %vm92_vm0, %v7107_v57 }
 0x2c3   :  { %6386 = vmatprep.subr.bf16.mxu0 %v7588_v53 }
 0x2c6   :  { %6387 = vmatpush3.bf16.msra.mxu0 %v7588_v53 }
 0x2c7   :  { %6420 = vmatprep.subr.bf16.mxu0 %v7111_v58 }
 0x2c9   :  { %6389 = vmatmul.mubr.msk.bf16.vlgmr.msra.gmra.mxu0 %vm92_vm0, %v7108_v59 }
 0x2ca   :  { %6392 = vmatprep.mubr.msk.bf16.mxu0 %vm92_vm0, %v7109_v60  ;;  %6421 = vmatpush3.bf16.msra.mxu0 %v7111_v58 }
 0x2cb   :  { %6422 = vmatprep.subr.bf16.mxu0 %v7112_v61 }
 0x2ce   :  { %6423 = vmatpush3.bf16.msra.mxu0 %v7112_v61  ;;  %v7131_v61 = vld [vmem:[#allocation2 + $0x1f8] sm:$0xff]  }
 0x2cf   :  { %6424 = vmatprep.subr.bf16.mxu0 %v7113_v62 }
 0x2d1   :  { %6393 = vmatmul.mubr.msk.bf16.gmra.mxu0 %vm92_vm0, %v7110_v63  ;;  %v7133_v63 = vld [vmem:[#allocation2 + $0x1e8] sm:$0xff]  }
 0x2d2   :  { %6425 = vmatpush3.bf16.msra.mxu0 %v7113_v62  ;;  %v7132_v62 = vld [vmem:[#allocation2 + $0x1f0] sm:$0xff]  }
 0x2d3   :  { %6426 = vmatprep.subr.bf16.mxu0 %v7114_v0 }
 0x2d6   :  { %6427 = vmatpush3.bf16.msra.mxu0 %v7114_v0  ;;  %v7134_v0 = vld [vmem:[#allocation2 + $0x1e0] sm:$0xff]  }
 0x2d7   :  { %6428 = vmatprep.subr.bf16.mxu0 %v7115_v1 }
 0x2da   :  { %6429 = vmatpush3.bf16.msra.mxu0 %v7115_v1  ;;  %v7135_v1 = vld [vmem:[#allocation2 + $0x1d8] sm:$0xff]  }
 0x2db   :  { %6430 = vmatprep.subr.bf16.mxu0 %v7116_v2 }
 0x2de   :  { %6431 = vmatpush3.bf16.msra.mxu0 %v7116_v2  ;;  %v7136_v2 = vld [vmem:[#allocation2 + $0x1d0] sm:$0xff]  }
 0x2df   :  { %6432 = vmatprep.subr.bf16.mxu0 %v7117_v3 }
 0x2e2   :  { %6433 = vmatpush3.bf16.msra.mxu0 %v7117_v3  ;;  %v7137_v3 = vld [vmem:[#allocation2 + $0x1c8] sm:$0xff]  }
 0x2e3   :  { %6434 = vmatprep.subr.bf16.mxu0 %v7118_v4 }
 0x2e6   :  { %6435 = vmatpush3.bf16.msra.mxu0 %v7118_v4  ;;  %v7138_v4 = vld [vmem:[#allocation2 + $0x1c0] sm:$0xff]  }
 0x2e7   :  { %6460 = vmatprep.subr.bf16.mxu0 %v7123_v33 }
 0x379   :  { %v6374_v6 = vpop.f32.mrf.mxu0 }
 0x37b   :  { %v925_v7 = vpop.f32.mrf.mxu0 }
 0x37d   :  { %v6375_v8 = vpop.f32.mrf.mxu0 }
 0x37e   :  { %v957_v13 = vpack.c.bf16 %v6375_v8, %v6374_v6  ;;  %v7139_v6 = vld [vmem:[%s8108_s1 + $0xc0] sm:$0xff]  }
 0x37f   :  { %v928_v9 = vpop.f32.mrf.mxu0 }
 0x380   :  { %v956_v12 = vpack.c.bf16 %v928_v9, %v925_v7 }
 0x381   :  { %v6378_v5 = vpop.f32.mrf.mxu0 }
 0x382   :  { %6436 = vmatprep.mubr.bf16.mxu0 %v956_v12 }
 0x383   :  { %v941_v14 = vpop.f32.mrf.mxu0  ;;  %6437 = vmatmul.mubr.bf16.vlgmr.msra.gmra.mxu0 %v957_v13 }
 0x384   :  { %6461 = vmatpush3.bf16.msra.mxu0 %v7123_v33 }
 0x385   :  { %v6379_v10 = vpop.f32.mrf.mxu0  ;;  %6462 = vmatprep.subr.bf16.mxu0 %v7124_v34 }
 0x386   :  { %v959_v17 = vpack.c.bf16 %v6379_v10, %v6378_v5 }
 0x387   :  { %v944_v15 = vpop.f32.mrf.mxu0 }
 0x388   :  { %v958_v16 = vpack.c.bf16 %v944_v15, %v941_v14  ;;  %6463 = vmatpush3.bf16.msra.mxu0 %v7124_v34 }
 0x389   :  { %v6390_v18 = vpop.f32.mrf.mxu0  ;;  %6464 = vmatprep.subr.bf16.mxu0 %v7125_v35 }
 0x38a   :  { %6440 = vmatprep.mubr.bf16.mxu0 %v958_v16 }
 0x38b   :  { %v1052_v19 = vpop.f32.mrf.mxu0  ;;  %6441 = vmatmul.mubr.bf16.gmra.mxu0 %v959_v17  ;;  %v5499_v17 = vld [vmem:[%s8110_s3 + $0x1] ss:$0 sm:$0xff] }
 0x38c   :  { %6465 = vmatpush3.bf16.msra.mxu0 %v7125_v35 }
 0x38d   :  { %v6391_v20 = vpop.f32.mrf.mxu0  ;;  %6466 = vmatprep.subr.bf16.mxu0 %v7126_v36 }
 0x38e   :  { %v1084_v22 = vpack.c.bf16 %v6391_v20, %v6390_v18 }
 0x38f   :  { %v1055_v21 = vpop.f32.mrf.mxu0 }
 0x390   :  { %v1083_v11 = vpack.c.bf16 %v1055_v21, %v1052_v19  ;;  %6467 = vmatpush3.bf16.msra.mxu0 %v7126_v36 }
 0x391   :  { %v6394_v23 = vpop.f32.mrf.mxu0  ;;  %6468 = vmatprep.subr.bf16.mxu0 %v7127_v37 }
 0x392   :  { %6412 = vmatprep.mubr.bf16.mxu1 %v1083_v11 }
 0x393   :  { %v1068_v24 = vpop.f32.mrf.mxu0  ;;  %6413 = vmatmul.mubr.bf16.vlgmr.msra.gmra.mxu1 %v1084_v22 }
 0x394   :  { %6445 = vmatpush3.bf16.msra.mxu1 %v7578_v42  ;;  %6469 = vmatpush3.bf16.msra.mxu0 %v7127_v37 }
 0x395   :  { %6446 = vmatprep.subr.bf16.mxu1 %v7582_v47  ;;  %v6395_v25 = vpop.f32.mrf.mxu0  ;;  %6470 = vmatprep.subr.bf16.mxu0 %v7128_v38 }
 0x396   :  { %v1086_v30 = vpack.c.bf16 %v6395_v25, %v6394_v23 }
 0x397   :  { %v1071_v26 = vpop.f32.mrf.mxu0 }
 0x398   :  { %v1085_v28 = vpack.c.bf16 %v1071_v26, %v1068_v24  ;;  %6447 = vmatpush3.bf16.msra.mxu1 %v7582_v47  ;;  %6471 = vmatpush3.bf16.msra.mxu0 %v7128_v38 }
 0x399   :  { %6448 = vmatprep.subr.bf16.mxu1 %v7576_v27  ;;  %6472 = vmatprep.subr.bf16.mxu0 %v7129_v39 }
 0x39a   :  { %6416 = vmatprep.mubr.bf16.mxu1 %v1085_v28 }
 0x39b   :  { %6417 = vmatmul.mubr.bf16.gmra.mxu1 %v1086_v30 }
 0x39c   :  { %6449 = vmatpush3.bf16.msra.mxu1 %v7576_v27  ;;  %6452 = vmatprep.mubr.msk.bf16.mxu1 %vm92_vm0, %v7119_v29  ;;  %v7122_v27 = vld [vmem:[%s8108_s1 + $0xb8] sm:$0xff]  }
 0x39d   :  { %6450 = vmatprep.subr.bf16.mxu1 %v7588_v53  ;;  %6473 = vmatpush3.bf16.msra.mxu0 %v7129_v39 }
 0x39e   :  { %6474 = vmatprep.subr.bf16.mxu0 %v7130_v40 }
 0x3a0   :  { %6451 = vmatpush3.bf16.msra.mxu1 %v7588_v53 }
 0x3a1   :  { %6475 = vmatpush3.bf16.msra.mxu0 %v7130_v40 }
 0x3a2   :  { %6516 = vmatprep.subr.bf16.mxu0 %v7131_v61 }
 0x3a3   :  { %6453 = vmatmul.mubr.msk.bf16.vlgmr.msra.gmra.mxu1 %vm92_vm0, %v7120_v31 }
 0x3a4   :  { %6456 = vmatprep.mubr.msk.bf16.mxu1 %vm92_vm0, %v7121_v32 }
 0x3ab   :  { %6457 = vmatmul.mubr.msk.bf16.gmra.mxu1 %vm92_vm0, %v7122_v27 }
 0x3ac   :  { %6492 = vmatprep.mubr.msk.bf16.mxu1 %vm92_vm0, %v7139_v6 }
 0x443   :  { %v6438_v7 = vpop.f32.mrf.mxu0 }
 0x445   :  { %v1299_v8 = vpop.f32.mrf.mxu0 }
 0x447   :  { %v6439_v9 = vpop.f32.mrf.mxu0 }
 0x449   :  { %v1302_v12 = vpop.f32.mrf.mxu0 }
 0x44b   :  { %v6442_v13 = vpop.f32.mrf.mxu0 }
 0x44d   :  { %v1315_v5 = vpop.f32.mrf.mxu0 }
 0x44f   :  { %v6443_v14 = vpop.f32.mrf.mxu0 }
 0x451   :  { %v1318_v10 = vpop.f32.mrf.mxu0 }
 0x453   :  { %v6414_v41 = vpop.f32.mrf.mxu1 }
 0x454   :  { %v1308_v15 = vadd.f32 %v6438_v7, %v6414_v41 }
 0x455   :  { %v7652_v42 = vpop.f32.mrf.mxu1 }
 0x456   :  { %v1300_v27 = vadd.f32 %v1299_v8, %v7652_v42 }
 0x457   :  { %v6415_v43 = vpop.f32.mrf.mxu1 }
 0x458   :  { %v1311_v20 = vadd.f32 %v6439_v9, %v6415_v43 }
 0x459   :  { %v7654_v44 = vpop.f32.mrf.mxu1 }
 0x45a   :  { %v1303_v29 = vadd.f32 %v1302_v12, %v7654_v44 }
 0x45b   :  { %v7656_v45 = vpop.f32.mrf.mxu1 }
 0x45c   :  { %v1324_v25 = vadd.f32 %v6442_v13, %v7656_v45 }
 0x45d   :  { %v7658_v46 = vpop.f32.mrf.mxu1 }
 0x45e   :  { %v1316_v30 = vadd.f32 %v1315_v5, %v7658_v46 }
 0x45f   :  { %v7660_v47 = vpop.f32.mrf.mxu1 }
 0x460   :  { %v1327_v33 = vadd.f32 %v6443_v14, %v7660_v47 }
 0x461   :  { %v7662_v48 = vpop.f32.mrf.mxu1 }
 0x462   :  { %v1319_v44 = vadd.f32 %v1318_v10, %v7662_v48 }
 0x463   :  { %v6454_v49 = vpop.f32.mrf.mxu1 }
 0x465   :  { %v1405_v50 = vpop.f32.mrf.mxu1 }
 0x467   :  { %v6455_v51 = vpop.f32.mrf.mxu1 }
 0x468   :  { %v1437_v54 = vpack.c.bf16 %v6455_v51, %v6454_v49 }
 0x469   :  { %v1408_v52 = vpop.f32.mrf.mxu1 }
 0x46a   :  { %v1436_v53 = vpack.c.bf16 %v1408_v52, %v1405_v50 }
 0x46b   :  { %v6458_v55 = vpop.f32.mrf.mxu1 }
 0x46c   :  { %6476 = vmatprep.mubr.bf16.mxu0 %v1436_v53 }
 0x46d   :  { %v1421_v56 = vpop.f32.mrf.mxu1  ;;  %6477 = vmatmul.mubr.bf16.vlgmr.msra.gmra.mxu0 %v1437_v54 }
 0x46e   :  { %6517 = vmatpush3.bf16.msra.mxu0 %v7131_v61 }
 0x46f   :  { %v6459_v57 = vpop.f32.mrf.mxu1  ;;  %6518 = vmatprep.subr.bf16.mxu0 %v7132_v62 }
 0x470   :  { %v1439_v60 = vpack.c.bf16 %v6459_v57, %v6458_v55 }
 0x471   :  { %v1424_v58 = vpop.f32.mrf.mxu1 }
 0x472   :  { %v1438_v59 = vpack.c.bf16 %v1424_v58, %v1421_v56  ;;  %6519 = vmatpush3.bf16.msra.mxu0 %v7132_v62 }
 0x473   :  { %6520 = vmatprep.subr.bf16.mxu0 %v7133_v63 }
 0x474   :  { %6480 = vmatprep.mubr.bf16.mxu0 %v1438_v59 }
 0x475   :  { %6481 = vmatmul.mubr.bf16.gmra.mxu0 %v1439_v60 }
 0x476   :  { %6521 = vmatpush3.bf16.msra.mxu0 %v7133_v63 }
 0x477   :  { %6522 = vmatprep.subr.bf16.mxu0 %v7134_v0 }
 0x47a   :  { %6523 = vmatpush3.bf16.msra.mxu0 %v7134_v0 }
 0x47b   :  { %6524 = vmatprep.subr.bf16.mxu0 %v7135_v1 }
 0x47e   :  { %6525 = vmatpush3.bf16.msra.mxu0 %v7135_v1 }
 0x47f   :  { %6526 = vmatprep.subr.bf16.mxu0 %v7136_v2 }
 0x482   :  { %6527 = vmatpush3.bf16.msra.mxu0 %v7136_v2 }
 0x483   :  { %6528 = vmatprep.subr.bf16.mxu0 %v7137_v3 }
 0x486   :  { %6529 = vmatpush3.bf16.msra.mxu0 %v7137_v3 }
 0x487   :  { %6530 = vmatprep.subr.bf16.mxu0 %v7138_v4 }
 0x48a   :  { %6531 = vmatpush3.bf16.msra.mxu0 %v7138_v4 }
 0x52d   :  { %v6478_v16 = vpop.f32.mrf.mxu0 }
 0x52e   :  { %v1572_v18 = vadd.f32 %v6478_v16, %v1308_v15 }
 0x52f   :  { %v1539_v19 = vpop.f32.mrf.mxu0 }
 0x530   :  { %v1588_v21 = vadd.f32 %v5499_v17, %v1572_v18  ;;  %v1570_v39 = vadd.f32 %v1539_v19, %v1300_v27  ;;  %v7144_v27 = vld [vmem:[%s8108_s1 + $0xe8] sm:$0xff]  }
 0x531   :  { %v6479_v11 = vpop.f32.mrf.mxu0 }
 0x532   :  { %v1604_v22 = vmul.f32 0.70710677, %v1588_v21  ;;  %v1573_v23 = vadd.f32 %v6479_v11, %v1311_v20  ;;  %v1586_v51 = vadd.f32 %v5499_v17, %v1570_v39  ;;  %v1596_v48 = vmul.f32 0.5, %v1588_v21  ;;  %v7152_v39 = vld [vmem:[#allocation2 + $0x190] sm:$0xff]  }
 0x533   :  { %v1542_v24 = vpop.f32.mrf.mxu0 }
 0x534   :  { %7319 = verf.f32 %v1604_v22  ;;  %v1589_v26 = vadd.f32 %v5499_v17, %v1573_v23  ;;  %v1571_v35 = vadd.f32 %v1542_v24, %v1303_v29  ;;  %v1602_v56 = vmul.f32 0.70710677, %v1586_v51  ;;  %v7141_v29 = vld [vmem:[%s8108_s1 + $0xd0] sm:$0xff]  }
 0x535   :  { %v6482_v28 = vpop.f32.mrf.mxu0  ;;  %v1594_v23 = vmul.f32 0.5, %v1586_v51 }
 0x536   :  { %v1605_v31 = vmul.f32 0.70710677, %v1589_v26  ;;  %v1576_v32 = vadd.f32 %v6482_v28, %v1324_v25  ;;  %v1587_v46 = vadd.f32 %v5499_v17, %v1571_v35  ;;  %v1597_v59 = vmul.f32 0.5, %v1589_v26  ;;  %v7140_v28 = vld [vmem:[%s8108_s1 + $0xc8] sm:$0xff]  }
 0x537   :  { %v1555_v34 = vpop.f32.mrf.mxu0  ;;  %v7149_v35 = vld [vmem:[#allocation2 + $0x1a8] sm:$0xff]  }
 0x538   :  { %7321 = verf.f32 %v1605_v31  ;;  %v1592_v36 = vadd.f32 %v5499_v17, %v1576_v32  ;;  %v1574_v37 = vadd.f32 %v1555_v34, %v1316_v30  ;;  %v1603_v53 = vmul.f32 0.70710677, %v1587_v46  ;;  %v7142_v30 = vld [vmem:[%s8108_s1 + $0xd8] sm:$0xff]   ;;  %v7143_v31 = vld [vmem:[%s8108_s1 + $0xe0] sm:$0xff]   ;;  %v7148_v34 = vld [vmem:[#allocation2 + $0x1b0] sm:$0xff]  }
 0x539   :  { %v6483_v38 = vpop.f32.mrf.mxu0  ;;  %v1595_v22 = vmul.f32 0.5, %v1587_v46  ;;  %v7147_v32 = vld [vmem:[#allocation2 + $0x1b8] sm:$0xff]  }
 0x53a   :  { %v1608_v40 = vmul.f32 0.70710677, %v1592_v36  ;;  %v1590_v41 = vadd.f32 %v5499_v17, %v1574_v37  ;;  %v1577_v43 = vadd.f32 %v6483_v38, %v1327_v33  ;;  %v1600_v4 = vmul.f32 0.5, %v1592_v36  ;;  %v7145_v33 = vld [vmem:[%s8108_s1 + $0xf0] sm:$0xff]   ;;  %v7146_v36 = vld [vmem:[%s8108_s1 + $0xf8] sm:$0xff]   ;;  %v7150_v37 = vld [vmem:[#allocation2 + $0x1a0] sm:$0xff]  }
 0x53b   :  { %v1558_v45 = vpop.f32.mrf.mxu0  ;;  %v7151_v38 = vld [vmem:[#allocation2 + $0x198] sm:$0xff]  }
 0x53c   :  { %7323 = verf.f32 %v1608_v40  ;;  %v1606_v49 = vmul.f32 0.70710677, %v1590_v41  ;;  %v1593_v50 = vadd.f32 %v5499_v17, %v1577_v43  ;;  %v1575_v42 = vadd.f32 %v1558_v45, %v1319_v44  ;;  %v7153_v40 = vld [vmem:[#allocation2 + $0x188] sm:$0xff]  }
 0x53d   :  { %v1598_v14 = vmul.f32 0.5, %v1590_v41  ;;  %v7154_v41 = vld [vmem:[#allocation2 + $0x180] sm:$0xff]  }
 0x53e   :  { %v1609_v47 = vmul.f32 0.70710677, %v1593_v50  ;;  %7325 = verf.f32 %v1606_v49  ;;  %v1591_v52 = vadd.f32 %v5499_v17, %v1575_v42  ;;  %v1601_v6 = vmul.f32 0.5, %v1593_v50 }
 0x540   :  { %7327 = verf.f32 %v1609_v47  ;;  %v1607_v55 = vmul.f32 0.70710677, %v1591_v52  ;;  %v1599_v10 = vmul.f32 0.5, %v1591_v52 }
 0x541   :  { %v7320_v54 = vpop.eup %7319 }
 0x542   :  { %7329 = verf.f32 %v1607_v55  ;;  %v1620_v57 = vadd.f32 1.0, %v7320_v54 }
 0x543   :  { %7331 = verf.f32 %v1603_v53 }
 0x544   :  { %7333 = verf.f32 %v1602_v56  ;;  %v1628_v61 = vmul.f32 %v1620_v57, %v1596_v48 }
 0x545   :  { %v7322_v58 = vpop.eup %7321 }
 0x546   :  { %v1621_v60 = vadd.f32 1.0, %v7322_v58 }
 0x548   :  { %v1629_v62 = vmul.f32 %v1621_v60, %v1597_v59 }
 0x549   :  { %v7324_v63 = vpop.eup %7323 }
 0x54a   :  { %v7677_v0 = vpack.c.bf16 %v1629_v62, %v1628_v61  ;;  %v1624_v2 = vadd.f32 1.0, %v7324_v63 }
 0x54b   :  { %v7326_v1 = vpop.eup %7325 }
 0x54c   :  { %v1622_v8 = vadd.f32 1.0, %v7326_v1  ;;  %v1632_v12 = vmul.f32 %v1624_v2, %v1600_v4  ;;  %v7155_v2 = vld [vmem:[%s8108_s1 + $0x100] sm:$0xff]   ;;  %v7156_v4 = vld [vmem:[%s8108_s1 + $0x108] sm:$0xff]  }
 0x54d   :  { %v7328_v3 = vpop.eup %7327 }
 0x54e   :  { %v1625_v7 = vadd.f32 1.0, %v7328_v3  ;;  %v1630_v18 = vmul.f32 %v1622_v8, %v1598_v14  ;;  %v7160_v8 = vld [vmem:[#allocation2 + $0x230] sm:$0xff]   ;;  %v7165_v14 = vld [vmem:[#allocation2 + $0x208] sm:$0xff]  }
 0x54f   :  { %v7330_v9 = vpop.eup %7329 }
 0x550   :  { %v1633_v13 = vmul.f32 %v1625_v7, %v1601_v6  ;;  %v7332_v5 = vpop.eup %7331  ;;  %v1623_v15 = vadd.f32 1.0, %v7330_v9  ;;  %v7157_v6 = vld [vmem:[%s8108_s1 + $0x110] sm:$0xff]   ;;  %v7159_v7 = vld [vmem:[#allocation2 + $0x238] sm:$0xff]   ;;  %v7161_v9 = vld [vmem:[#allocation2 + $0x228] sm:$0xff]  }
 0x551   :  { %v7334_v17 = vpop.eup %7333  ;;  %v1619_v20 = vadd.f32 1.0, %v7332_v5  ;;  %v7164_v5 = vld [vmem:[#allocation2 + $0x210] sm:$0xff]  }
 0x552   :  { %v7679_v16 = vpack.c.bf16 %v1633_v13, %v1632_v12  ;;  %v1631_v19 = vmul.f32 %v1623_v15, %v1599_v10  ;;  %v1618_v11 = vadd.f32 1.0, %v7334_v17  ;;  %v7162_v12 = vld [vmem:[#allocation2 + $0x220] sm:$0xff]   ;;  %v7163_v13 = vld [vmem:[#allocation2 + $0x218] sm:$0xff]  }
 0x553   :  { %v1627_v24 = vmul.f32 %v1619_v20, %v1595_v22  ;;  %v7166_v10 = vld [vmem:[#allocation2 + $0x200] sm:$0xff]  }
 0x554   :  { %6484 = vmatprep.subr.bf16.mxu1 %v7679_v16  ;;  %6564 = vmatprep.subr.bf16.mxu0 %v7679_v16  ;;  %v7683_v21 = vpack.c.bf16 %v1631_v19, %v1630_v18  ;;  %v1626_v25 = vmul.f32 %v1618_v11, %v1594_v23 }
 0x555   :  { %6485 = vmatpush3.bf16.msra.mxu1 %v7679_v16 }
 0x556   :  { %6486 = vmatprep.subr.bf16.mxu1 %v7683_v21  ;;  %v7689_v26 = vpack.c.bf16 %v1627_v24, %v1626_v25 }
 0x559   :  { %6487 = vmatpush3.bf16.msra.mxu1 %v7683_v21 }
 0x55a   :  { %6488 = vmatprep.subr.bf16.mxu1 %v7677_v0 }
 0x55d   :  { %6489 = vmatpush3.bf16.msra.mxu1 %v7677_v0 }
 0x55e   :  { %6490 = vmatprep.subr.bf16.mxu1 %v7689_v26 }
 0x561   :  { %6491 = vmatpush3.bf16.msra.mxu1 %v7689_v26 }
 0x562   :  { %6500 = vmatprep.subr.bf16.mxu1 %v7679_v16 }
 0x564   :  { %6493 = vmatmul.mubr.msk.bf16.vlgmr.msra.gmra.mxu1 %vm92_vm0, %v7140_v28 }
 0x565   :  { %6501 = vmatpush3.bf16.msra.mxu1 %v7679_v16  ;;  %6496 = vmatprep.mubr.msk.bf16.mxu1 %vm92_vm0, %v7141_v29 }
 0x566   :  { %6502 = vmatprep.subr.bf16.mxu1 %v7683_v21 }
 0x569   :  { %6503 = vmatpush3.bf16.msra.mxu1 %v7683_v21 }
 0x56a   :  { %6504 = vmatprep.subr.bf16.mxu1 %v7677_v0 }
 0x56c   :  { %6497 = vmatmul.mubr.msk.bf16.gmra.mxu1 %vm92_vm0, %v7142_v30 }
 0x56d   :  { %6505 = vmatpush3.bf16.msra.mxu1 %v7677_v0  ;;  %6508 = vmatprep.mubr.msk.bf16.mxu1 %vm92_vm0, %v7143_v31 }
 0x56e   :  { %6506 = vmatprep.subr.bf16.mxu1 %v7689_v26 }
 0x571   :  { %6507 = vmatpush3.bf16.msra.mxu1 %v7689_v26 }
 0x572   :  { %6540 = vmatprep.subr.bf16.mxu1 %v7147_v32 }
 0x574   :  { %6509 = vmatmul.mubr.msk.bf16.vlgmr.msra.gmra.mxu1 %vm92_vm0, %v7144_v27 }
 0x575   :  { %6512 = vmatprep.mubr.msk.bf16.mxu1 %vm92_vm0, %v7145_v33  ;;  %6541 = vmatpush3.bf16.msra.mxu1 %v7147_v32 }
 0x576   :  { %6542 = vmatprep.subr.bf16.mxu1 %v7148_v34 }
 0x579   :  { %6543 = vmatpush3.bf16.msra.mxu1 %v7148_v34  ;;  %v7167_v34 = vld [vmem:[#allocation2 + $0x2b8] sm:$0xff]  }
 0x57a   :  { %6544 = vmatprep.subr.bf16.mxu1 %v7149_v35 }
 0x57c   :  { %6513 = vmatmul.mubr.msk.bf16.gmra.mxu1 %vm92_vm0, %v7146_v36  ;;  %v7169_v36 = vld [vmem:[#allocation2 + $0x2a8] sm:$0xff]  }
 0x57d   :  { %6545 = vmatpush3.bf16.msra.mxu1 %v7149_v35  ;;  %v7168_v35 = vld [vmem:[#allocation2 + $0x2b0] sm:$0xff]  }
 0x57e   :  { %6546 = vmatprep.subr.bf16.mxu1 %v7150_v37 }
 0x581   :  { %6547 = vmatpush3.bf16.msra.mxu1 %v7150_v37  ;;  %v7170_v37 = vld [vmem:[#allocation2 + $0x2a0] sm:$0xff]  }
 0x582   :  { %6548 = vmatprep.subr.bf16.mxu1 %v7151_v38 }
 0x585   :  { %6549 = vmatpush3.bf16.msra.mxu1 %v7151_v38  ;;  %v7171_v38 = vld [vmem:[#allocation2 + $0x298] sm:$0xff]  }
 0x586   :  { %6550 = vmatprep.subr.bf16.mxu1 %v7152_v39 }
 0x589   :  { %6551 = vmatpush3.bf16.msra.mxu1 %v7152_v39  ;;  %v7172_v39 = vld [vmem:[#allocation2 + $0x290] sm:$0xff]  }
 0x58a   :  { %6552 = vmatprep.subr.bf16.mxu1 %v7153_v40 }
 0x58d   :  { %6553 = vmatpush3.bf16.msra.mxu1 %v7153_v40  ;;  %v7173_v40 = vld [vmem:[#allocation2 + $0x288] sm:$0xff]  }
 0x58e   :  { %6554 = vmatprep.subr.bf16.mxu1 %v7154_v41 }
 0x591   :  { %6555 = vmatpush3.bf16.msra.mxu1 %v7154_v41  ;;  %v7174_v41 = vld [vmem:[#allocation2 + $0x280] sm:$0xff]  }
 0x592   :  { %6580 = vmatprep.subr.bf16.mxu1 %v7159_v7 }
 0x624   :  { %v6494_v43 = vpop.f32.mrf.mxu1 }
 0x626   :  { %v1713_v44 = vpop.f32.mrf.mxu1 }
 0x628   :  { %v6495_v45 = vpop.f32.mrf.mxu1 }
 0x629   :  { %v1745_v50 = vpack.c.bf16 %v6495_v45, %v6494_v43  ;;  %v7175_v43 = vld [vmem:[%s8108_s1 + $0x120] sm:$0xff]  }
 0x62a   :  { %v1716_v46 = vpop.f32.mrf.mxu1 }
 0x62b   :  { %v1744_v49 = vpack.c.bf16 %v1716_v46, %v1713_v44 }
 0x62c   :  { %v6498_v42 = vpop.f32.mrf.mxu1 }
 0x62d   :  { %6556 = vmatprep.mubr.bf16.mxu1 %v1744_v49 }
 0x62e   :  { %v1729_v51 = vpop.f32.mrf.mxu1  ;;  %6557 = vmatmul.mubr.bf16.vlgmr.msra.gmra.mxu1 %v1745_v50 }
 0x62f   :  { %6581 = vmatpush3.bf16.msra.mxu1 %v7159_v7 }
 0x630   :  { %v6499_v47 = vpop.f32.mrf.mxu1  ;;  %6582 = vmatprep.subr.bf16.mxu1 %v7160_v8 }
 0x631   :  { %v1747_v54 = vpack.c.bf16 %v6499_v47, %v6498_v42 }
 0x632   :  { %v1732_v52 = vpop.f32.mrf.mxu1 }
 0x633   :  { %v1746_v53 = vpack.c.bf16 %v1732_v52, %v1729_v51  ;;  %6583 = vmatpush3.bf16.msra.mxu1 %v7160_v8 }
 0x634   :  { %v6510_v55 = vpop.f32.mrf.mxu1  ;;  %6584 = vmatprep.subr.bf16.mxu1 %v7161_v9 }
 0x635   :  { %6560 = vmatprep.mubr.bf16.mxu1 %v1746_v53 }
 0x636   :  { %v1840_v56 = vpop.f32.mrf.mxu1  ;;  %6561 = vmatmul.mubr.bf16.gmra.mxu1 %v1747_v54  ;;  %v5573_v54 = vld [vmem:[%s8110_s3 + $0x2] ss:$0 sm:$0xff] }
 0x637   :  { %6585 = vmatpush3.bf16.msra.mxu1 %v7161_v9 }
 0x638   :  { %v6511_v57 = vpop.f32.mrf.mxu1  ;;  %6586 = vmatprep.subr.bf16.mxu1 %v7162_v12 }
 0x639   :  { %v1872_v59 = vpack.c.bf16 %v6511_v57, %v6510_v55 }
 0x63a   :  { %v1843_v58 = vpop.f32.mrf.mxu1 }
 0x63b   :  { %v1871_v48 = vpack.c.bf16 %v1843_v58, %v1840_v56  ;;  %6587 = vmatpush3.bf16.msra.mxu1 %v7162_v12 }
 0x63c   :  { %v6514_v60 = vpop.f32.mrf.mxu1  ;;  %6588 = vmatprep.subr.bf16.mxu1 %v7163_v13 }
 0x63d   :  { %6532 = vmatprep.mubr.bf16.mxu0 %v1871_v48 }
 0x63e   :  { %v1856_v61 = vpop.f32.mrf.mxu1  ;;  %6533 = vmatmul.mubr.bf16.vlgmr.msra.gmra.mxu0 %v1872_v59 }
 0x63f   :  { %6565 = vmatpush3.bf16.msra.mxu0 %v7679_v16  ;;  %6589 = vmatpush3.bf16.msra.mxu1 %v7163_v13 }
 0x640   :  { %6566 = vmatprep.subr.bf16.mxu0 %v7683_v21  ;;  %v6515_v62 = vpop.f32.mrf.mxu1  ;;  %6590 = vmatprep.subr.bf16.mxu1 %v7164_v5 }
 0x641   :  { %v1874_v3 = vpack.c.bf16 %v6515_v62, %v6514_v60 }
 0x642   :  { %v1859_v63 = vpop.f32.mrf.mxu1 }
 0x643   :  { %v1873_v1 = vpack.c.bf16 %v1859_v63, %v1856_v61  ;;  %6567 = vmatpush3.bf16.msra.mxu0 %v7683_v21  ;;  %6591 = vmatpush3.bf16.msra.mxu1 %v7164_v5 }
 0x644   :  { %6568 = vmatprep.subr.bf16.mxu0 %v7677_v0  ;;  %6592 = vmatprep.subr.bf16.mxu1 %v7165_v14 }
 0x645   :  { %6536 = vmatprep.mubr.bf16.mxu0 %v1873_v1 }
 0x646   :  { %6537 = vmatmul.mubr.bf16.gmra.mxu0 %v1874_v3 }
 0x647   :  { %6569 = vmatpush3.bf16.msra.mxu0 %v7677_v0  ;;  %6572 = vmatprep.mubr.msk.bf16.mxu0 %vm92_vm0, %v7155_v2  ;;  %v7158_v0 = vld [vmem:[%s8108_s1 + $0x118] sm:$0xff]  }
 0x648   :  { %6570 = vmatprep.subr.bf16.mxu0 %v7689_v26  ;;  %6593 = vmatpush3.bf16.msra.mxu1 %v7165_v14 }
 0x649   :  { %6594 = vmatprep.subr.bf16.mxu1 %v7166_v10 }
 0x64b   :  { %6571 = vmatpush3.bf16.msra.mxu0 %v7689_v26 }
 0x64c   :  { %6595 = vmatpush3.bf16.msra.mxu1 %v7166_v10 }
 0x64d   :  { %6636 = vmatprep.subr.bf16.mxu1 %v7167_v34 }
 0x64e   :  { %6573 = vmatmul.mubr.msk.bf16.vlgmr.msra.gmra.mxu0 %vm92_vm0, %v7156_v4 }
 0x64f   :  { %6576 = vmatprep.mubr.msk.bf16.mxu0 %vm92_vm0, %v7157_v6 }
 0x656   :  { %6577 = vmatmul.mubr.msk.bf16.gmra.mxu0 %vm92_vm0, %v7158_v0 }
 0x657   :  { %6612 = vmatprep.mubr.msk.bf16.mxu0 %vm92_vm0, %v7175_v43 }
 0x6ee   :  { %v6558_v44 = vpop.f32.mrf.mxu1 }
 0x6f0   :  { %v2087_v45 = vpop.f32.mrf.mxu1 }
 0x6f2   :  { %v6559_v46 = vpop.f32.mrf.mxu1 }
 0x6f4   :  { %v2090_v49 = vpop.f32.mrf.mxu1 }
 0x6f6   :  { %v6562_v50 = vpop.f32.mrf.mxu1 }
 0x6f8   :  { %v2103_v42 = vpop.f32.mrf.mxu1 }
 0x6fa   :  { %v6563_v51 = vpop.f32.mrf.mxu1 }
 0x6fc   :  { %v2106_v47 = vpop.f32.mrf.mxu1 }
 0x6fe   :  { %v6534_v15 = vpop.f32.mrf.mxu0 }
 0x6ff   :  { %v2096_v52 = vadd.f32 %v6558_v44, %v6534_v15 }
 0x700   :  { %v1974_v16 = vpop.f32.mrf.mxu0 }
 0x701   :  { %v2088_v55 = vadd.f32 %v2087_v45, %v1974_v16 }
 0x702   :  { %v6535_v17 = vpop.f32.mrf.mxu0 }
 0x703   :  { %v2099_v58 = vadd.f32 %v6559_v46, %v6535_v17 }
 0x704   :  { %v7753_v18 = vpop.f32.mrf.mxu0 }
 0x705   :  { %v2091_v1 = vadd.f32 %v2090_v49, %v7753_v18 }
 0x706   :  { %v7755_v19 = vpop.f32.mrf.mxu0 }
 0x707   :  { %v2112_v3 = vadd.f32 %v6562_v50, %v7755_v19 }
 0x708   :  { %v7757_v20 = vpop.f32.mrf.mxu0 }
 0x709   :  { %v2104_v8 = vadd.f32 %v2103_v42, %v7757_v20 }
 0x70a   :  { %v7759_v21 = vpop.f32.mrf.mxu0 }
 0x70b   :  { %v2115_v14 = vadd.f32 %v6563_v51, %v7759_v21 }
 0x70c   :  { %v7761_v11 = vpop.f32.mrf.mxu0 }
 0x70e   :  { %v6574_v22 = vpop.f32.mrf.mxu0 }
 0x710   :  { %v2193_v23 = vpop.f32.mrf.mxu0 }
 0x712   :  { %v6575_v24 = vpop.f32.mrf.mxu0 }
 0x713   :  { %v2225_v28 = vpack.c.bf16 %v6575_v24, %v6574_v22 }
 0x714   :  { %v2196_v25 = vpop.f32.mrf.mxu0 }
 0x715   :  { %v2224_v26 = vpack.c.bf16 %v2196_v25, %v2193_v23  ;;  %v2107_v23 = vadd.f32 %v2106_v47, %v7761_v11 }
 0x716   :  { %v6578_v29 = vpop.f32.mrf.mxu0 }
 0x717   :  { %6596 = vmatprep.mubr.bf16.mxu1 %v2224_v26 }
 0x718   :  { %v2209_v30 = vpop.f32.mrf.mxu0  ;;  %6597 = vmatmul.mubr.bf16.vlgmr.msra.gmra.mxu1 %v2225_v28 }
 0x719   :  { %6637 = vmatpush3.bf16.msra.mxu1 %v7167_v34 }
 0x71a   :  { %v6579_v31 = vpop.f32.mrf.mxu0  ;;  %6638 = vmatprep.subr.bf16.mxu1 %v7168_v35 }
 0x71b   :  { %v2227_v33 = vpack.c.bf16 %v6579_v31, %v6578_v29 }
 0x71c   :  { %v2212_v32 = vpop.f32.mrf.mxu0 }
 0x71d   :  { %v2226_v27 = vpack.c.bf16 %v2212_v32, %v2209_v30  ;;  %6639 = vmatpush3.bf16.msra.mxu1 %v7168_v35 }
 0x71e   :  { %6640 = vmatprep.subr.bf16.mxu1 %v7169_v36 }
 0x71f   :  { %6600 = vmatprep.mubr.bf16.mxu1 %v2226_v27 }
 0x720   :  { %6601 = vmatmul.mubr.bf16.gmra.mxu1 %v2227_v33 }
 0x721   :  { %6641 = vmatpush3.bf16.msra.mxu1 %v7169_v36 }
 0x722   :  { %6642 = vmatprep.subr.bf16.mxu1 %v7170_v37 }
 0x725   :  { %6643 = vmatpush3.bf16.msra.mxu1 %v7170_v37 }
 0x726   :  { %6644 = vmatprep.subr.bf16.mxu1 %v7171_v38 }
 0x729   :  { %6645 = vmatpush3.bf16.msra.mxu1 %v7171_v38 }
 0x72a   :  { %6646 = vmatprep.subr.bf16.mxu1 %v7172_v39 }
 0x72d   :  { %6647 = vmatpush3.bf16.msra.mxu1 %v7172_v39 }
 0x72e   :  { %6648 = vmatprep.subr.bf16.mxu1 %v7173_v40 }
 0x731   :  { %6649 = vmatpush3.bf16.msra.mxu1 %v7173_v40 }
 0x732   :  { %6650 = vmatprep.subr.bf16.mxu1 %v7174_v41 }
 0x735   :  { %6651 = vmatpush3.bf16.msra.mxu1 %v7174_v41 }
 0x7d8   :  { %v6598_v53 = vpop.f32.mrf.mxu1 }
 0x7d9   :  { %v2360_v56 = vadd.f32 %v6598_v53, %v2096_v52 }
 0x7da   :  { %v2327_v57 = vpop.f32.mrf.mxu1 }
 0x7db   :  { %v2376_v48 = vadd.f32 %v5573_v54, %v2360_v56  ;;  %v2358_v59 = vadd.f32 %v2327_v57, %v2088_v55 }
 0x7dc   :  { %v6599_v60 = vpop.f32.mrf.mxu1 }
 0x7dd   :  { %v2392_v61 = vmul.f32 0.70710677, %v2376_v48  ;;  %v2374_v62 = vadd.f32 %v5573_v54, %v2358_v59  ;;  %v2361_v63 = vadd.f32 %v6599_v60, %v2099_v58  ;;  %v2384_v33 = vmul.f32 0.5, %v2376_v48 }
 0x7de   :  { %v2330_v2 = vpop.f32.mrf.mxu1 }
 0x7df   :  { %7335 = verf.f32 %v2392_v61  ;;  %v2390_v4 = vmul.f32 0.70710677, %v2374_v62  ;;  %v2377_v6 = vadd.f32 %v5573_v54, %v2361_v63  ;;  %v2359_v0 = vadd.f32 %v2330_v2, %v2091_v1  ;;  %v7176_v1 = vld [vmem:[%s8108_s1 + $0x128] sm:$0xff]   ;;  %v7177_v2 = vld [vmem:[%s8108_s1 + $0x130] sm:$0xff]  }
 0x7e0   :  { %v6602_v7 = vpop.f32.mrf.mxu1  ;;  %v2382_v40 = vmul.f32 0.5, %v2374_v62 }
 0x7e1   :  { %v2393_v9 = vmul.f32 0.70710677, %v2377_v6  ;;  %v2364_v12 = vadd.f32 %v6602_v7, %v2112_v3  ;;  %7337 = verf.f32 %v2390_v4  ;;  %v2375_v13 = vadd.f32 %v5573_v54, %v2359_v0  ;;  %v7178_v3 = vld [vmem:[%s8108_s1 + $0x138] sm:$0xff]   ;;  %v7179_v4 = vld [vmem:[%s8108_s1 + $0x140] sm:$0xff]   ;;  %v7180_v0 = vld [vmem:[%s8108_s1 + $0x148] sm:$0xff]  }
 0x7e2   :  { %v2343_v5 = vpop.f32.mrf.mxu1  ;;  %v2385_v34 = vmul.f32 0.5, %v2377_v6  ;;  %v7183_v6 = vld [vmem:[#allocation2 + $0x278] sm:$0xff]   ;;  %v7181_v7 = vld [vmem:[%s8108_s1 + $0x150] sm:$0xff]  }
 0x7e3   :  { %7339 = verf.f32 %v2393_v9  ;;  %v2380_v10 = vadd.f32 %v5573_v54, %v2364_v12  ;;  %v2362_v15 = vadd.f32 %v2343_v5, %v2104_v8  ;;  %v2391_v16 = vmul.f32 0.70710677, %v2375_v13  ;;  %v7184_v8 = vld [vmem:[#allocation2 + $0x270] sm:$0xff]   ;;  %v7185_v9 = vld [vmem:[#allocation2 + $0x268] sm:$0xff]   ;;  %v7182_v12 = vld [vmem:[%s8108_s1 + $0x158] sm:$0xff]  }
 0x7e4   :  { %v6603_v17 = vpop.f32.mrf.mxu1  ;;  %v2383_v41 = vmul.f32 0.5, %v2375_v13  ;;  %v7186_v13 = vld [vmem:[#allocation2 + $0x260] sm:$0xff]   ;;  %v7187_v5 = vld [vmem:[#allocation2 + $0x258] sm:$0xff]  }
 0x7e5   :  { %v2396_v18 = vmul.f32 0.70710677, %v2380_v10  ;;  %v2378_v19 = vadd.f32 %v5573_v54, %v2362_v15  ;;  %v2365_v22 = vadd.f32 %v6603_v17, %v2115_v14  ;;  %7341 = verf.f32 %v2391_v16  ;;  %v7188_v14 = vld [vmem:[#allocation2 + $0x250] sm:$0xff]   ;;  %v7190_v15 = vld [vmem:[#allocation2 + $0x240] sm:$0xff]  }
 0x7e6   :  { %v2346_v24 = vpop.f32.mrf.mxu1  ;;  %v2388_v47 = vmul.f32 0.5, %v2380_v10  ;;  %v7189_v10 = vld [vmem:[#allocation2 + $0x248] sm:$0xff]  }
 0x7e7   :  { %7343 = verf.f32 %v2396_v18  ;;  %v2394_v20 = vmul.f32 0.70710677, %v2378_v19  ;;  %v2381_v25 = vadd.f32 %v5573_v54, %v2365_v22  ;;  %v2363_v26 = vadd.f32 %v2346_v24, %v2107_v23 }
 0x7e8   :  { %v2386_v58 = vmul.f32 0.5, %v2378_v19 }
 0x7e9   :  { %v2397_v28 = vmul.f32 0.70710677, %v2381_v25  ;;  %7345 = verf.f32 %v2394_v20  ;;  %v2379_v29 = vadd.f32 %v5573_v54, %v2363_v26  ;;  %v2389_v52 = vmul.f32 0.5, %v2381_v25 }
 0x7eb   :  { %7347 = verf.f32 %v2397_v28  ;;  %v2395_v30 = vmul.f32 0.70710677, %v2379_v29  ;;  %v2387_v48 = vmul.f32 0.5, %v2379_v29 }
 0x7ec   :  { %v7336_v21 = vpop.eup %7335 }
 0x7ed   :  { %7349 = verf.f32 %v2395_v30  ;;  %v2408_v32 = vadd.f32 1.0, %v7336_v21 }
 0x7ee   :  { %v7338_v31 = vpop.eup %7337 }
 0x7ef   :  { %v2406_v11 = vadd.f32 1.0, %v7338_v31  ;;  %v2416_v37 = vmul.f32 %v2408_v32, %v2384_v33 }
 0x7f0   :  { %v7340_v27 = vpop.eup %7339 }
 0x7f1   :  { %v2409_v35 = vadd.f32 1.0, %v7340_v27  ;;  %v2414_v45 = vmul.f32 %v2406_v11, %v2382_v40  ;;  %v7192_v40 = vld [vmem:[%s8108_s1 + $0x168] sm:$0xff]  }
 0x7f2   :  { %v7342_v36 = vpop.eup %7341 }
 0x7f3   :  { %v2417_v38 = vmul.f32 %v2409_v35, %v2385_v34  ;;  %v2407_v43 = vadd.f32 1.0, %v7342_v36 }
 0x7f4   :  { %v7344_v39 = vpop.eup %7343 }
 0x7f5   :  { %v7775_v44 = vpack.c.bf16 %v2417_v38, %v2416_v37  ;;  %v2415_v46 = vmul.f32 %v2407_v43, %v2383_v41  ;;  %v2412_v50 = vadd.f32 1.0, %v7344_v39  ;;  %v7191_v38 = vld [vmem:[%s8108_s1 + $0x160] sm:$0xff]   ;;  %v7193_v41 = vld [vmem:[%s8108_s1 + $0x170] sm:$0xff]   ;;  %v7194_v43 = vld [vmem:[%s8108_s1 + $0x178] sm:$0xff]  }
 0x7f6   :  { %v7346_v49 = vpop.eup %7345 }
 0x7f7   :  { %v7777_v51 = vpack.c.bf16 %v2415_v46, %v2414_v45  ;;  %v2410_v54 = vadd.f32 1.0, %v7346_v49  ;;  %v2420_v56 = vmul.f32 %v2412_v50, %v2388_v47  ;;  %v7196_v45 = vld [vmem:[#allocation2 + $0x2f0] sm:$0xff]   ;;  %v7197_v46 = vld [vmem:[#allocation2 + $0x2e8] sm:$0xff]   ;;  %v7198_v49 = vld [vmem:[#allocation2 + $0x2e0] sm:$0xff]  }
 0x7f8   :  { %v7348_v42 = vpop.eup %7347  ;;  %v7199_v50 = vld [vmem:[#allocation2 + $0x2d8] sm:$0xff]   ;;  %v7202_v47 = vld [vmem:[#allocation2 + $0x2c0] sm:$0xff]  }
 0x7f9   :  { %v2413_v53 = vadd.f32 1.0, %v7348_v42  ;;  %v2418_v61 = vmul.f32 %v2410_v54, %v2386_v58  ;;  %v7200_v42 = vld [vmem:[#allocation2 + $0x2d0] sm:$0xff]  }
 0x7fa   :  { %v7350_v55 = vpop.eup %7349 }
 0x7fb   :  { %v2421_v57 = vmul.f32 %v2413_v53, %v2389_v52  ;;  %v2411_v59 = vadd.f32 1.0, %v7350_v55 }
 0x7fd   :  { %v7779_v60 = vpack.c.bf16 %v2421_v57, %v2420_v56  ;;  %v2419_v62 = vmul.f32 %v2411_v59, %v2387_v48 }
 0x7ff   :  { %6604 = vmatprep.subr.bf16.mxu0 %v7779_v60  ;;  %6684 = vmatprep.subr.bf16.mxu1 %v7779_v60  ;;  %v7783_v63 = vpack.c.bf16 %v2419_v62, %v2418_v61 }
 0x800   :  { %6605 = vmatpush3.bf16.msra.mxu0 %v7779_v60 }
 0x801   :  { %6606 = vmatprep.subr.bf16.mxu0 %v7783_v63 }
 0x804   :  { %6607 = vmatpush3.bf16.msra.mxu0 %v7783_v63 }
 0x805   :  { %6608 = vmatprep.subr.bf16.mxu0 %v7775_v44 }
 0x808   :  { %6609 = vmatpush3.bf16.msra.mxu0 %v7775_v44 }
 0x809   :  { %6610 = vmatprep.subr.bf16.mxu0 %v7777_v51 }
 0x80c   :  { %6611 = vmatpush3.bf16.msra.mxu0 %v7777_v51 }
 0x80d   :  { %6620 = vmatprep.subr.bf16.mxu0 %v7779_v60 }
 0x80f   :  { %6613 = vmatmul.mubr.msk.bf16.vlgmr.msra.gmra.mxu0 %vm92_vm0, %v7176_v1 }
 0x810   :  { %6621 = vmatpush3.bf16.msra.mxu0 %v7779_v60  ;;  %6616 = vmatprep.mubr.msk.bf16.mxu0 %vm92_vm0, %v7177_v2 }
 0x811   :  { %6622 = vmatprep.subr.bf16.mxu0 %v7783_v63 }
 0x814   :  { %6623 = vmatpush3.bf16.msra.mxu0 %v7783_v63 }
 0x815   :  { %6624 = vmatprep.subr.bf16.mxu0 %v7775_v44 }
 0x817   :  { %6617 = vmatmul.mubr.msk.bf16.gmra.mxu0 %vm92_vm0, %v7178_v3 }
 0x818   :  { %6625 = vmatpush3.bf16.msra.mxu0 %v7775_v44  ;;  %6628 = vmatprep.mubr.msk.bf16.mxu0 %vm92_vm0, %v7179_v4 }
 0x819   :  { %6626 = vmatprep.subr.bf16.mxu0 %v7777_v51 }
 0x81c   :  { %6627 = vmatpush3.bf16.msra.mxu0 %v7777_v51 }
 0x81d   :  { %6660 = vmatprep.subr.bf16.mxu0 %v7183_v6 }
 0x81f   :  { %6629 = vmatmul.mubr.msk.bf16.vlgmr.msra.gmra.mxu0 %vm92_vm0, %v7180_v0 }
 0x820   :  { %6632 = vmatprep.mubr.msk.bf16.mxu0 %vm92_vm0, %v7181_v7  ;;  %6661 = vmatpush3.bf16.msra.mxu0 %v7183_v6 }
 0x821   :  { %6662 = vmatprep.subr.bf16.mxu0 %v7184_v8 }
 0x824   :  { %6663 = vmatpush3.bf16.msra.mxu0 %v7184_v8  ;;  %v7203_v8 = vld [vmem:[#allocation2 + $0x378] sm:$0xff]  }
 0x825   :  { %6664 = vmatprep.subr.bf16.mxu0 %v7185_v9 }
 0x827   :  { %6633 = vmatmul.mubr.msk.bf16.gmra.mxu0 %vm92_vm0, %v7182_v12  ;;  %v7205_v12 = vld [vmem:[#allocation2 + $0x368] sm:$0xff]  }
 0x828   :  { %6665 = vmatpush3.bf16.msra.mxu0 %v7185_v9  ;;  %v7204_v9 = vld [vmem:[#allocation2 + $0x370] sm:$0xff]  }
 0x829   :  { %6666 = vmatprep.subr.bf16.mxu0 %v7186_v13 }
 0x82c   :  { %6667 = vmatpush3.bf16.msra.mxu0 %v7186_v13  ;;  %v7206_v13 = vld [vmem:[#allocation2 + $0x360] sm:$0xff]  }
 0x82d   :  { %6668 = vmatprep.subr.bf16.mxu0 %v7187_v5 }
 0x830   :  { %6669 = vmatpush3.bf16.msra.mxu0 %v7187_v5  ;;  %v7207_v5 = vld [vmem:[#allocation2 + $0x358] sm:$0xff]  }
 0x831   :  { %6670 = vmatprep.subr.bf16.mxu0 %v7188_v14 }
 0x834   :  { %6671 = vmatpush3.bf16.msra.mxu0 %v7188_v14  ;;  %v7208_v14 = vld [vmem:[#allocation2 + $0x350] sm:$0xff]  }
 0x835   :  { %6672 = vmatprep.subr.bf16.mxu0 %v7189_v10 }
 0x838   :  { %6673 = vmatpush3.bf16.msra.mxu0 %v7189_v10  ;;  %v7209_v10 = vld [vmem:[#allocation2 + $0x348] sm:$0xff]  }
 0x839   :  { %6674 = vmatprep.subr.bf16.mxu0 %v7190_v15 }
 0x83c   :  { %6675 = vmatpush3.bf16.msra.mxu0 %v7190_v15  ;;  %v7210_v15 = vld [vmem:[#allocation2 + $0x340] sm:$0xff]  }
 0x8cf   :  { %v6614_v16 = vpop.f32.mrf.mxu0 }
 0x8d1   :  { %v2501_v17 = vpop.f32.mrf.mxu0 }
 0x8d3   :  { %v6615_v18 = vpop.f32.mrf.mxu0 }
 0x8d4   :  { %v2533_v23 = vpack.c.bf16 %v6615_v18, %v6614_v16  ;;  %v7211_v16 = vld [vmem:[%s8108_s1 + $0x180] sm:$0xff]  }
 0x8d5   :  { %v2504_v19 = vpop.f32.mrf.mxu0 }
 0x8d6   :  { %v2532_v22 = vpack.c.bf16 %v2504_v19, %v2501_v17 }
 0x8d7   :  { %v6618_v24 = vpop.f32.mrf.mxu0 }
 0x8d8   :  { %6676 = vmatprep.mubr.bf16.mxu0 %v2532_v22 }
 0x8d9   :  { %v2517_v20 = vpop.f32.mrf.mxu0  ;;  %6677 = vmatmul.mubr.bf16.vlgmr.msra.gmra.mxu0 %v2533_v23 }
 0x8db   :  { %v6619_v25 = vpop.f32.mrf.mxu0 }
 0x8dc   :  { %v2535_v29 = vpack.c.bf16 %v6619_v25, %v6618_v24 }
 0x8dd   :  { %v2520_v26 = vpop.f32.mrf.mxu0 }
 0x8de   :  { %v2534_v28 = vpack.c.bf16 %v2520_v26, %v2517_v20 }
 0x8df   :  { %v6630_v21 = vpop.f32.mrf.mxu0 }
 0x8e0   :  { %6680 = vmatprep.mubr.bf16.mxu0 %v2534_v28 }
 0x8e1   :  { %v2628_v30 = vpop.f32.mrf.mxu0  ;;  %6681 = vmatmul.mubr.bf16.gmra.mxu0 %v2535_v29  ;;  %v5647_v29 = vld [vmem:[%s8110_s3 + $0x3] ss:$0 sm:$0xff] }
 0x8e3   :  { %v6631_v31 = vpop.f32.mrf.mxu0 }
 0x8e4   :  { %v2660_v33 = vpack.c.bf16 %v6631_v31, %v6630_v21 }
 0x8e5   :  { %v2631_v32 = vpop.f32.mrf.mxu0 }
 0x8e6   :  { %v2659_v27 = vpack.c.bf16 %v2631_v32, %v2628_v30 }
 0x8e7   :  { %v6634_v34 = vpop.f32.mrf.mxu0 }
 0x8e8   :  { %6652 = vmatprep.mubr.bf16.mxu1 %v2659_v27 }
 0x8e9   :  { %v2644_v35 = vpop.f32.mrf.mxu0  ;;  %6653 = vmatmul.mubr.bf16.vlgmr.msra.gmra.mxu1 %v2660_v33 }
 0x8ea   :  { %6685 = vmatpush3.bf16.msra.mxu1 %v7779_v60 }
 0x8eb   :  { %6686 = vmatprep.subr.bf16.mxu1 %v7783_v63  ;;  %v6635_v11 = vpop.f32.mrf.mxu0 }
 0x8ec   :  { %v2662_v39 = vpack.c.bf16 %v6635_v11, %v6634_v34 }
 0x8ed   :  { %v2647_v36 = vpop.f32.mrf.mxu0 }
 0x8ee   :  { %v2661_v37 = vpack.c.bf16 %v2647_v36, %v2644_v35  ;;  %6687 = vmatpush3.bf16.msra.mxu1 %v7783_v63 }
 0x8ef   :  { %6688 = vmatprep.subr.bf16.mxu1 %v7775_v44 }
 0x8f0   :  { %6656 = vmatprep.mubr.bf16.mxu1 %v2661_v37 }
 0x8f1   :  { %6657 = vmatmul.mubr.bf16.gmra.mxu1 %v2662_v39 }
 0x8f2   :  { %6689 = vmatpush3.bf16.msra.mxu1 %v7775_v44  ;;  %6692 = vmatprep.mubr.msk.bf16.mxu1 %vm92_vm0, %v7191_v38  ;;  %v7195_v44 = vld [vmem:[#allocation2 + $0x2f8] sm:$0xff]  }
 0x8f3   :  { %6690 = vmatprep.subr.bf16.mxu1 %v7777_v51  ;;  %6700 = vmatprep.subr.bf16.mxu0 %v7195_v44 }
 0x8f4   :  { %6701 = vmatpush3.bf16.msra.mxu0 %v7195_v44 }
 0x8f5   :  { %6702 = vmatprep.subr.bf16.mxu0 %v7196_v45 }
 0x8f6   :  { %6691 = vmatpush3.bf16.msra.mxu1 %v7777_v51  ;;  %v7201_v51 = vld [vmem:[#allocation2 + $0x2c8] sm:$0xff]  }
 0x8f8   :  { %6703 = vmatpush3.bf16.msra.mxu0 %v7196_v45 }
 0x8f9   :  { %6693 = vmatmul.mubr.msk.bf16.vlgmr.msra.gmra.mxu1 %vm92_vm0, %v7192_v40  ;;  %6704 = vmatprep.subr.bf16.mxu0 %v7197_v46 }
 0x8fa   :  { %6696 = vmatprep.mubr.msk.bf16.mxu1 %vm92_vm0, %v7193_v41 }
 0x8fc   :  { %6705 = vmatpush3.bf16.msra.mxu0 %v7197_v46 }
 0x8fd   :  { %6706 = vmatprep.subr.bf16.mxu0 %v7198_v49 }
 0x900   :  { %6707 = vmatpush3.bf16.msra.mxu0 %v7198_v49 }
 0x901   :  { %6697 = vmatmul.mubr.msk.bf16.gmra.mxu1 %vm92_vm0, %v7194_v43  ;;  %6708 = vmatprep.subr.bf16.mxu0 %v7199_v50 }
 0x902   :  { %6732 = vmatprep.mubr.msk.bf16.mxu1 %vm92_vm0, %v7211_v16 }
 0x904   :  { %6709 = vmatpush3.bf16.msra.mxu0 %v7199_v50 }
 0x905   :  { %6710 = vmatprep.subr.bf16.mxu0 %v7200_v42 }
 0x908   :  { %6711 = vmatpush3.bf16.msra.mxu0 %v7200_v42 }
 0x909   :  { %6712 = vmatprep.subr.bf16.mxu0 %v7201_v51 }
 0x90c   :  { %6713 = vmatpush3.bf16.msra.mxu0 %v7201_v51 }
 0x90d   :  { %6714 = vmatprep.subr.bf16.mxu0 %v7202_v47 }
 0x910   :  { %6715 = vmatpush3.bf16.msra.mxu0 %v7202_v47 }
 0x911   :  { %6756 = vmatprep.subr.bf16.mxu0 %v7203_v8 }
 0x999   :  { %v6678_v17 = vpop.f32.mrf.mxu0 }
 0x99b   :  { %v2875_v18 = vpop.f32.mrf.mxu0 }
 0x99d   :  { %v6679_v19 = vpop.f32.mrf.mxu0 }
 0x99f   :  { %v2878_v22 = vpop.f32.mrf.mxu0 }
 0x9a1   :  { %v6682_v23 = vpop.f32.mrf.mxu0 }
 0x9a3   :  { %v2891_v24 = vpop.f32.mrf.mxu0 }
 0x9a5   :  { %v6683_v20 = vpop.f32.mrf.mxu0 }
 0x9a7   :  { %v2894_v25 = vpop.f32.mrf.mxu0 }
 0x9a9   :  { %v6654_v52 = vpop.f32.mrf.mxu1 }
 0x9aa   :  { %v2884_v26 = vadd.f32 %v6678_v17, %v6654_v52 }
 0x9ab   :  { %v2762_v53 = vpop.f32.mrf.mxu1 }
 0x9ac   :  { %v2876_v21 = vadd.f32 %v2875_v18, %v2762_v53 }
 0x9ad   :  { %v6655_v54 = vpop.f32.mrf.mxu1 }
 0x9ae   :  { %v2887_v32 = vadd.f32 %v6679_v19, %v6655_v54 }
 0x9af   :  { %v7851_v55 = vpop.f32.mrf.mxu1 }
 0x9b0   :  { %v2879_v37 = vadd.f32 %v2878_v22, %v7851_v55 }
 0x9b1   :  { %v7853_v56 = vpop.f32.mrf.mxu1 }
 0x9b2   :  { %v2900_v39 = vadd.f32 %v6682_v23, %v7853_v56 }
 0x9b3   :  { %v7855_v57 = vpop.f32.mrf.mxu1 }
 0x9b4   :  { %v2892_v45 = vadd.f32 %v2891_v24, %v7855_v57 }
 0x9b5   :  { %v7857_v58 = vpop.f32.mrf.mxu1 }
 0x9b6   :  { %v2903_v51 = vadd.f32 %v6683_v20, %v7857_v58 }
 0x9b7   :  { %v7859_v48 = vpop.f32.mrf.mxu1 }
 0x9b9   :  { %v6694_v59 = vpop.f32.mrf.mxu1 }
 0x9bb   :  { %v2981_v60 = vpop.f32.mrf.mxu1 }
 0x9bd   :  { %v6695_v61 = vpop.f32.mrf.mxu1 }
 0x9be   :  { %v3013_v1 = vpack.c.bf16 %v6695_v61, %v6694_v59 }
 0x9bf   :  { %v2984_v62 = vpop.f32.mrf.mxu1 }
 0x9c0   :  { %v3012_v63 = vpack.c.bf16 %v2984_v62, %v2981_v60  ;;  %v2895_v60 = vadd.f32 %v2894_v25, %v7859_v48 }
 0x9c1   :  { %v6698_v2 = vpop.f32.mrf.mxu1 }
 0x9c2   :  { %6716 = vmatprep.mubr.bf16.mxu0 %v3012_v63 }
 0x9c3   :  { %v2997_v3 = vpop.f32.mrf.mxu1  ;;  %6717 = vmatmul.mubr.bf16.vlgmr.msra.gmra.mxu0 %v3013_v1 }
 0x9c4   :  { %6757 = vmatpush3.bf16.msra.mxu0 %v7203_v8 }
 0x9c5   :  { %v6699_v4 = vpop.f32.mrf.mxu1  ;;  %6758 = vmatprep.subr.bf16.mxu0 %v7204_v9 }
 0x9c6   :  { %v3015_v7 = vpack.c.bf16 %v6699_v4, %v6698_v2 }
 0x9c7   :  { %v3000_v6 = vpop.f32.mrf.mxu1 }
 0x9c8   :  { %v3014_v0 = vpack.c.bf16 %v3000_v6, %v2997_v3  ;;  %6759 = vmatpush3.bf16.msra.mxu0 %v7204_v9 }
 0x9c9   :  { %6760 = vmatprep.subr.bf16.mxu0 %v7205_v12 }
 0x9ca   :  { %6720 = vmatprep.mubr.bf16.mxu0 %v3014_v0 }
 0x9cb   :  { %6721 = vmatmul.mubr.bf16.gmra.mxu0 %v3015_v7 }
 0x9cc   :  { %6761 = vmatpush3.bf16.msra.mxu0 %v7205_v12 }
 0x9cd   :  { %6762 = vmatprep.subr.bf16.mxu0 %v7206_v13 }
 0x9d0   :  { %6763 = vmatpush3.bf16.msra.mxu0 %v7206_v13 }
 0x9d1   :  { %6764 = vmatprep.subr.bf16.mxu0 %v7207_v5 }
 0x9d4   :  { %6765 = vmatpush3.bf16.msra.mxu0 %v7207_v5 }
 0x9d5   :  { %6766 = vmatprep.subr.bf16.mxu0 %v7208_v14 }
 0x9d8   :  { %6767 = vmatpush3.bf16.msra.mxu0 %v7208_v14 }
 0x9d9   :  { %6768 = vmatprep.subr.bf16.mxu0 %v7209_v10 }
 0x9dc   :  { %6769 = vmatpush3.bf16.msra.mxu0 %v7209_v10 }
 0x9dd   :  { %6770 = vmatprep.subr.bf16.mxu0 %v7210_v15 }
 0x9e0   :  { %6771 = vmatpush3.bf16.msra.mxu0 %v7210_v15 }
 0xa83   :  { %v6718_v28 = vpop.f32.mrf.mxu0 }
 0xa84   :  { %v3148_v30 = vadd.f32 %v6718_v28, %v2884_v26 }
 0xa85   :  { %v3115_v31 = vpop.f32.mrf.mxu0 }
 0xa86   :  { %v3164_v27 = vadd.f32 %v5647_v29, %v3148_v30  ;;  %v3146_v33 = vadd.f32 %v3115_v31, %v2876_v21 }
 0xa87   :  { %v6719_v34 = vpop.f32.mrf.mxu0 }
 0xa88   :  { %v3180_v35 = vmul.f32 0.70710677, %v3164_v27  ;;  %v3162_v11 = vadd.f32 %v5647_v29, %v3146_v33  ;;  %v3149_v36 = vadd.f32 %v6719_v34, %v2887_v32  ;;  %v3172_v7 = vmul.f32 0.5, %v3164_v27 }
 0xa89   :  { %v3118_v38 = vpop.f32.mrf.mxu0 }
 0xa8a   :  { %7351 = verf.f32 %v3180_v35  ;;  %v3178_v40 = vmul.f32 0.70710677, %v3162_v11  ;;  %v3165_v41 = vadd.f32 %v5647_v29, %v3149_v36  ;;  %v3147_v43 = vadd.f32 %v3118_v38, %v2879_v37  ;;  %v7212_v37 = vld [vmem:[%s8108_s1 + $0x188] sm:$0xff]   ;;  %v7213_v38 = vld [vmem:[%s8108_s1 + $0x190] sm:$0xff]  }
 0xa8b   :  { %v6722_v44 = vpop.f32.mrf.mxu0  ;;  %v3170_v10 = vmul.f32 0.5, %v3162_v11 }
 0xa8c   :  { %v3181_v46 = vmul.f32 0.70710677, %v3165_v41  ;;  %v3152_v49 = vadd.f32 %v6722_v44, %v2900_v39  ;;  %7353 = verf.f32 %v3178_v40  ;;  %v3163_v50 = vadd.f32 %v5647_v29, %v3147_v43  ;;  %v7214_v39 = vld [vmem:[%s8108_s1 + $0x198] sm:$0xff]   ;;  %v7215_v40 = vld [vmem:[%s8108_s1 + $0x1a0] sm:$0xff]   ;;  %v7216_v43 = vld [vmem:[%s8108_s1 + $0x1a8] sm:$0xff]  }
 0xa8d   :  { %v3131_v42 = vpop.f32.mrf.mxu0  ;;  %v3173_v8 = vmul.f32 0.5, %v3165_v41  ;;  %v7219_v41 = vld [vmem:[#allocation2 + $0x338] sm:$0xff]   ;;  %v7217_v44 = vld [vmem:[%s8108_s1 + $0x1b0] sm:$0xff]  }
 0xa8e   :  { %7355 = verf.f32 %v3181_v46  ;;  %v3168_v47 = vadd.f32 %v5647_v29, %v3152_v49  ;;  %v3150_v52 = vadd.f32 %v3131_v42, %v2892_v45  ;;  %v3179_v53 = vmul.f32 0.70710677, %v3163_v50  ;;  %v7220_v45 = vld [vmem:[#allocation2 + $0x330] sm:$0xff]   ;;  %v7221_v46 = vld [vmem:[#allocation2 + $0x328] sm:$0xff]   ;;  %v7218_v49 = vld [vmem:[%s8108_s1 + $0x1b8] sm:$0xff]  }
 0xa8f   :  { %v6723_v54 = vpop.f32.mrf.mxu0  ;;  %v3171_v15 = vmul.f32 0.5, %v3163_v50  ;;  %v7222_v50 = vld [vmem:[#allocation2 + $0x320] sm:$0xff]   ;;  %v7223_v42 = vld [vmem:[#allocation2 + $0x318] sm:$0xff]  }
 0xa90   :  { %v3184_v55 = vmul.f32 0.70710677, %v3168_v47  ;;  %v3166_v56 = vadd.f32 %v5647_v29, %v3150_v52  ;;  %v3153_v59 = vadd.f32 %v6723_v54, %v2903_v51  ;;  %7357 = verf.f32 %v3179_v53  ;;  %v7224_v51 = vld [vmem:[#allocation2 + $0x310] sm:$0xff]   ;;  %v7226_v52 = vld [vmem:[#allocation2 + $0x300] sm:$0xff]  }
 0xa91   :  { %v3134_v61 = vpop.f32.mrf.mxu0  ;;  %v3176_v25 = vmul.f32 0.5, %v3168_v47  ;;  %v7225_v47 = vld [vmem:[#allocation2 + $0x308] sm:$0xff]  }
 0xa92   :  { %7359 = verf.f32 %v3184_v55  ;;  %v3182_v57 = vmul.f32 0.70710677, %v3166_v56  ;;  %v3169_v62 = vadd.f32 %v5647_v29, %v3153_v59  ;;  %v3151_v63 = vadd.f32 %v3134_v61, %v2895_v60 }
 0xa93   :  { %v3174_v32 = vmul.f32 0.5, %v3166_v56 }
 0xa94   :  { %v3185_v1 = vmul.f32 0.70710677, %v3169_v62  ;;  %7361 = verf.f32 %v3182_v57  ;;  %v3167_v2 = vadd.f32 %v5647_v29, %v3151_v63  ;;  %v3177_v26 = vmul.f32 0.5, %v3169_v62 }
 0xa96   :  { %7363 = verf.f32 %v3185_v1  ;;  %v3183_v3 = vmul.f32 0.70710677, %v3167_v2  ;;  %v3175_v27 = vmul.f32 0.5, %v3167_v2 }
 0xa97   :  { %v7352_v58 = vpop.eup %7351 }
 0xa98   :  { %7365 = verf.f32 %v3183_v3  ;;  %v3196_v6 = vadd.f32 1.0, %v7352_v58 }
 0xa99   :  { %v7354_v4 = vpop.eup %7353 }
 0xa9a   :  { %v3194_v48 = vadd.f32 1.0, %v7354_v4  ;;  %v3204_v13 = vmul.f32 %v3196_v6, %v3172_v7 }
 0xa9b   :  { %v7356_v0 = vpop.eup %7355 }
 0xa9c   :  { %v3197_v9 = vadd.f32 1.0, %v7356_v0  ;;  %v3202_v18 = vmul.f32 %v3194_v48, %v3170_v10  ;;  %v7228_v10 = vld [vmem:[%s8108_s1 + $0x1c8] sm:$0xff]  }
 0xa9d   :  { %v7358_v12 = vpop.eup %7357 }
 0xa9e   :  { %v3205_v5 = vmul.f32 %v3197_v9, %v3173_v8  ;;  %v3195_v16 = vadd.f32 1.0, %v7358_v12 }
 0xa9f   :  { %v7360_v14 = vpop.eup %7359 }
 0xaa0   :  { %v7873_v17 = vpack.c.bf16 %v3205_v5, %v3204_v13  ;;  %v3203_v19 = vmul.f32 %v3195_v16, %v3171_v15  ;;  %v3200_v23 = vadd.f32 1.0, %v7360_v14  ;;  %v7227_v5 = vld [vmem:[%s8108_s1 + $0x1c0] sm:$0xff]   ;;  %v7229_v15 = vld [vmem:[%s8108_s1 + $0x1d0] sm:$0xff]   ;;  %v7230_v16 = vld [vmem:[%s8108_s1 + $0x1d8] sm:$0xff]  }
 0xaa1   :  { %v7362_v22 = vpop.eup %7361 }
 0xaa2   :  { %v7875_v20 = vpack.c.bf16 %v3203_v19, %v3202_v18  ;;  %v3198_v29 = vadd.f32 1.0, %v7362_v22  ;;  %v3208_v30 = vmul.f32 %v3200_v23, %v3176_v25  ;;  %v7232_v18 = vld [vmem:[#allocation2 + $0x3b0] sm:$0xff]   ;;  %v7233_v19 = vld [vmem:[#allocation2 + $0x3a8] sm:$0xff]   ;;  %v7234_v22 = vld [vmem:[#allocation2 + $0x3a0] sm:$0xff]  }
 0xaa3   :  { %v7364_v24 = vpop.eup %7363  ;;  %v7235_v23 = vld [vmem:[#allocation2 + $0x398] sm:$0xff]   ;;  %v7238_v25 = vld [vmem:[#allocation2 + $0x380] sm:$0xff]  }
 0xaa4   :  { %v3201_v28 = vadd.f32 1.0, %v7364_v24  ;;  %v3206_v35 = vmul.f32 %v3198_v29, %v3174_v32  ;;  %v7236_v24 = vld [vmem:[#allocation2 + $0x390] sm:$0xff]  }
 0xaa5   :  { %v7366_v21 = vpop.eup %7365 }
 0xaa6   :  { %v3209_v31 = vmul.f32 %v3201_v28, %v3177_v26  ;;  %v3199_v33 = vadd.f32 1.0, %v7366_v21 }
 0xaa8   :  { %v7877_v34 = vpack.c.bf16 %v3209_v31, %v3208_v30  ;;  %v3207_v11 = vmul.f32 %v3199_v33, %v3175_v27 }
 0xaaa   :  { %6724 = vmatprep.subr.bf16.mxu1 %v7877_v34  ;;  %6804 = vmatprep.subr.bf16.mxu0 %v7877_v34  ;;  %v7881_v36 = vpack.c.bf16 %v3207_v11, %v3206_v35 }
 0xaab   :  { %6725 = vmatpush3.bf16.msra.mxu1 %v7877_v34 }
 0xaac   :  { %6726 = vmatprep.subr.bf16.mxu1 %v7881_v36 }
 0xaaf   :  { %6727 = vmatpush3.bf16.msra.mxu1 %v7881_v36 }
 0xab0   :  { %6728 = vmatprep.subr.bf16.mxu1 %v7873_v17 }
 0xab3   :  { %6729 = vmatpush3.bf16.msra.mxu1 %v7873_v17 }
 0xab4   :  { %6730 = vmatprep.subr.bf16.mxu1 %v7875_v20 }
 0xab7   :  { %6731 = vmatpush3.bf16.msra.mxu1 %v7875_v20 }
 0xab8   :  { %6740 = vmatprep.subr.bf16.mxu1 %v7877_v34 }
 0xaba   :  { %6733 = vmatmul.mubr.msk.bf16.vlgmr.msra.gmra.mxu1 %vm92_vm0, %v7212_v37 }
 0xabb   :  { %6741 = vmatpush3.bf16.msra.mxu1 %v7877_v34  ;;  %6736 = vmatprep.mubr.msk.bf16.mxu1 %vm92_vm0, %v7213_v38 }
 0xabc   :  { %6742 = vmatprep.subr.bf16.mxu1 %v7881_v36 }
 0xabf   :  { %6743 = vmatpush3.bf16.msra.mxu1 %v7881_v36 }
 0xac0   :  { %6744 = vmatprep.subr.bf16.mxu1 %v7873_v17 }
 0xac2   :  { %6737 = vmatmul.mubr.msk.bf16.gmra.mxu1 %vm92_vm0, %v7214_v39 }
 0xac3   :  { %6745 = vmatpush3.bf16.msra.mxu1 %v7873_v17  ;;  %6748 = vmatprep.mubr.msk.bf16.mxu1 %vm92_vm0, %v7215_v40 }
 0xac4   :  { %6746 = vmatprep.subr.bf16.mxu1 %v7875_v20 }
 0xac7   :  { %6747 = vmatpush3.bf16.msra.mxu1 %v7875_v20 }
 0xac8   :  { %6780 = vmatprep.subr.bf16.mxu1 %v7219_v41 }
 0xaca   :  { %6749 = vmatmul.mubr.msk.bf16.vlgmr.msra.gmra.mxu1 %vm92_vm0, %v7216_v43 }
 0xacb   :  { %6752 = vmatprep.mubr.msk.bf16.mxu1 %vm92_vm0, %v7217_v44  ;;  %6781 = vmatpush3.bf16.msra.mxu1 %v7219_v41 }
 0xacc   :  { %6782 = vmatprep.subr.bf16.mxu1 %v7220_v45 }
 0xacf   :  { %6783 = vmatpush3.bf16.msra.mxu1 %v7220_v45  ;;  %v7239_v45 = vld [vmem:[#allocation2 + $0x438] sm:$0xff]  }
 0xad0   :  { %6784 = vmatprep.subr.bf16.mxu1 %v7221_v46 }
 0xad2   :  { %6753 = vmatmul.mubr.msk.bf16.gmra.mxu1 %vm92_vm0, %v7218_v49  ;;  %v7241_v49 = vld [vmem:[#allocation2 + $0x428] sm:$0xff]  }
 0xad3   :  { %6785 = vmatpush3.bf16.msra.mxu1 %v7221_v46  ;;  %v7240_v46 = vld [vmem:[#allocation2 + $0x430] sm:$0xff]  }
 0xad4   :  { %6786 = vmatprep.subr.bf16.mxu1 %v7222_v50 }
 0xad7   :  { %6787 = vmatpush3.bf16.msra.mxu1 %v7222_v50  ;;  %v7242_v50 = vld [vmem:[#allocation2 + $0x420] sm:$0xff]  }
 0xad8   :  { %6788 = vmatprep.subr.bf16.mxu1 %v7223_v42 }
 0xadb   :  { %6789 = vmatpush3.bf16.msra.mxu1 %v7223_v42  ;;  %v7243_v42 = vld [vmem:[#allocation2 + $0x418] sm:$0xff]  }
 0xadc   :  { %6790 = vmatprep.subr.bf16.mxu1 %v7224_v51 }
 0xadf   :  { %6791 = vmatpush3.bf16.msra.mxu1 %v7224_v51  ;;  %v7244_v51 = vld [vmem:[#allocation2 + $0x410] sm:$0xff]  }
 0xae0   :  { %6792 = vmatprep.subr.bf16.mxu1 %v7225_v47 }
 0xae3   :  { %6793 = vmatpush3.bf16.msra.mxu1 %v7225_v47  ;;  %v7245_v47 = vld [vmem:[#allocation2 + $0x408] sm:$0xff]  }
 0xae4   :  { %6794 = vmatprep.subr.bf16.mxu1 %v7226_v52 }
 0xae7   :  { %6795 = vmatpush3.bf16.msra.mxu1 %v7226_v52  ;;  %v7246_v52 = vld [vmem:[#allocation2 + $0x400] sm:$0xff]  }
 0xb7a   :  { %v6734_v53 = vpop.f32.mrf.mxu1 }
 0xb7c   :  { %v3289_v54 = vpop.f32.mrf.mxu1 }
 0xb7e   :  { %v6735_v55 = vpop.f32.mrf.mxu1 }
 0xb7f   :  { %v3321_v60 = vpack.c.bf16 %v6735_v55, %v6734_v53  ;;  %v7247_v53 = vld [vmem:[%s8108_s1 + $0x1e0] sm:$0xff]  }
 0xb80   :  { %v3292_v56 = vpop.f32.mrf.mxu1 }
 0xb81   :  { %v3320_v59 = vpack.c.bf16 %v3292_v56, %v3289_v54 }
 0xb82   :  { %v6738_v61 = vpop.f32.mrf.mxu1 }
 0xb83   :  { %6796 = vmatprep.mubr.bf16.mxu1 %v3320_v59 }
 0xb84   :  { %v3305_v57 = vpop.f32.mrf.mxu1  ;;  %6797 = vmatmul.mubr.bf16.vlgmr.msra.gmra.mxu1 %v3321_v60 }
 0xb86   :  { %v6739_v62 = vpop.f32.mrf.mxu1 }
 0xb87   :  { %v3323_v2 = vpack.c.bf16 %v6739_v62, %v6738_v61 }
 0xb88   :  { %v3308_v63 = vpop.f32.mrf.mxu1 }
 0xb89   :  { %v3322_v1 = vpack.c.bf16 %v3308_v63, %v3305_v57 }
 0xb8a   :  { %v6750_v58 = vpop.f32.mrf.mxu1 }
 0xb8b   :  { %6800 = vmatprep.mubr.bf16.mxu1 %v3322_v1 }
 0xb8c   :  { %v3416_v3 = vpop.f32.mrf.mxu1  ;;  %6801 = vmatmul.mubr.bf16.gmra.mxu1 %v3323_v2  ;;  %v5721_v2 = vld [vmem:[%s8110_s3 + $0x4] ss:$0 sm:$0xff] }
 0xb8e   :  { %v6751_v4 = vpop.f32.mrf.mxu1 }
 0xb8f   :  { %v3448_v7 = vpack.c.bf16 %v6751_v4, %v6750_v58 }
 0xb90   :  { %v3419_v6 = vpop.f32.mrf.mxu1 }
 0xb91   :  { %v3447_v0 = vpack.c.bf16 %v3419_v6, %v3416_v3 }
 0xb92   :  { %v6754_v8 = vpop.f32.mrf.mxu1 }
 0xb93   :  { %6772 = vmatprep.mubr.bf16.mxu0 %v3447_v0 }
 0xb94   :  { %v3432_v9 = vpop.f32.mrf.mxu1  ;;  %6773 = vmatmul.mubr.bf16.vlgmr.msra.gmra.mxu0 %v3448_v7 }
 0xb95   :  { %6805 = vmatpush3.bf16.msra.mxu0 %v7877_v34 }
 0xb96   :  { %6806 = vmatprep.subr.bf16.mxu0 %v7881_v36  ;;  %v6755_v48 = vpop.f32.mrf.mxu1 }
 0xb97   :  { %v3450_v14 = vpack.c.bf16 %v6755_v48, %v6754_v8 }
 0xb98   :  { %v3435_v12 = vpop.f32.mrf.mxu1 }
 0xb99   :  { %v3449_v13 = vpack.c.bf16 %v3435_v12, %v3432_v9  ;;  %6807 = vmatpush3.bf16.msra.mxu0 %v7881_v36 }
 0xb9a   :  { %6808 = vmatprep.subr.bf16.mxu0 %v7873_v17 }
 0xb9b   :  { %6776 = vmatprep.mubr.bf16.mxu0 %v3449_v13 }
 0xb9c   :  { %6777 = vmatmul.mubr.bf16.gmra.mxu0 %v3450_v14 }
 0xb9d   :  { %6809 = vmatpush3.bf16.msra.mxu0 %v7873_v17  ;;  %6812 = vmatprep.mubr.msk.bf16.mxu0 %vm92_vm0, %v7227_v5  ;;  %v7231_v17 = vld [vmem:[#allocation2 + $0x3b8] sm:$0xff]  }
 0xb9e   :  { %6810 = vmatprep.subr.bf16.mxu0 %v7875_v20  ;;  %6820 = vmatprep.subr.bf16.mxu1 %v7231_v17 }
 0xb9f   :  { %6821 = vmatpush3.bf16.msra.mxu1 %v7231_v17 }
 0xba0   :  { %6822 = vmatprep.subr.bf16.mxu1 %v7232_v18 }
 0xba1   :  { %6811 = vmatpush3.bf16.msra.mxu0 %v7875_v20  ;;  %v7237_v20 = vld [vmem:[#allocation2 + $0x388] sm:$0xff]  }
 0xba3   :  { %6823 = vmatpush3.bf16.msra.mxu1 %v7232_v18 }
 0xba4   :  { %6813 = vmatmul.mubr.msk.bf16.vlgmr.msra.gmra.mxu0 %vm92_vm0, %v7228_v10  ;;  %6824 = vmatprep.subr.bf16.mxu1 %v7233_v19 }
 0xba5   :  { %6816 = vmatprep.mubr.msk.bf16.mxu0 %vm92_vm0, %v7229_v15 }
 0xba7   :  { %6825 = vmatpush3.bf16.msra.mxu1 %v7233_v19 }
 0xba8   :  { %6826 = vmatprep.subr.bf16.mxu1 %v7234_v22 }
 0xbab   :  { %6827 = vmatpush3.bf16.msra.mxu1 %v7234_v22 }
 0xbac   :  { %6817 = vmatmul.mubr.msk.bf16.gmra.mxu0 %vm92_vm0, %v7230_v16  ;;  %6828 = vmatprep.subr.bf16.mxu1 %v7235_v23 }
 0xbad   :  { %6852 = vmatprep.mubr.msk.bf16.mxu0 %vm92_vm0, %v7247_v53 }
 0xbaf   :  { %6829 = vmatpush3.bf16.msra.mxu1 %v7235_v23 }
 0xbb0   :  { %6830 = vmatprep.subr.bf16.mxu1 %v7236_v24 }
 0xbb3   :  { %6831 = vmatpush3.bf16.msra.mxu1 %v7236_v24 }
 0xbb4   :  { %6832 = vmatprep.subr.bf16.mxu1 %v7237_v20 }
 0xbb7   :  { %6833 = vmatpush3.bf16.msra.mxu1 %v7237_v20 }
 0xbb8   :  { %6834 = vmatprep.subr.bf16.mxu1 %v7238_v25 }
 0xbbb   :  { %6835 = vmatpush3.bf16.msra.mxu1 %v7238_v25 }
 0xbbc   :  { %6876 = vmatprep.subr.bf16.mxu1 %v7239_v45 }
 0xc44   :  { %v6798_v54 = vpop.f32.mrf.mxu1 }
 0xc46   :  { %v3663_v55 = vpop.f32.mrf.mxu1 }
 0xc48   :  { %v6799_v56 = vpop.f32.mrf.mxu1 }
 0xc4a   :  { %v3666_v59 = vpop.f32.mrf.mxu1 }
 0xc4c   :  { %v6802_v60 = vpop.f32.mrf.mxu1 }
 0xc4e   :  { %v3679_v61 = vpop.f32.mrf.mxu1 }
 0xc50   :  { %v6803_v57 = vpop.f32.mrf.mxu1 }
 0xc52   :  { %v3682_v62 = vpop.f32.mrf.mxu1 }
 0xc54   :  { %v6774_v26 = vpop.f32.mrf.mxu0 }
 0xc55   :  { %v3672_v63 = vadd.f32 %v6798_v54, %v6774_v26 }
 0xc56   :  { %v3550_v28 = vpop.f32.mrf.mxu0 }
 0xc57   :  { %v3664_v58 = vadd.f32 %v3663_v55, %v3550_v28 }
 0xc58   :  { %v6775_v29 = vpop.f32.mrf.mxu0 }
 0xc59   :  { %v3675_v6 = vadd.f32 %v6799_v56, %v6775_v29 }
 0xc5a   :  { %v7949_v21 = vpop.f32.mrf.mxu0 }
 0xc5b   :  { %v3667_v13 = vadd.f32 %v3666_v59, %v7949_v21 }
 0xc5c   :  { %v7951_v30 = vpop.f32.mrf.mxu0 }
 0xc5d   :  { %v3688_v14 = vadd.f32 %v6802_v60, %v7951_v30 }
 0xc5e   :  { %v7953_v31 = vpop.f32.mrf.mxu0 }
 0xc5f   :  { %v3680_v18 = vadd.f32 %v3679_v61, %v7953_v31 }
 0xc60   :  { %v7955_v32 = vpop.f32.mrf.mxu0 }
 0xc61   :  { %v3691_v20 = vadd.f32 %v6803_v57, %v7955_v32 }
 0xc62   :  { %v7957_v27 = vpop.f32.mrf.mxu0 }
 0xc64   :  { %v6814_v33 = vpop.f32.mrf.mxu0 }
 0xc66   :  { %v3769_v34 = vpop.f32.mrf.mxu0 }
 0xc68   :  { %v6815_v35 = vpop.f32.mrf.mxu0 }
 0xc69   :  { %v3801_v37 = vpack.c.bf16 %v6815_v35, %v6814_v33 }
 0xc6a   :  { %v3772_v11 = vpop.f32.mrf.mxu0 }
 0xc6b   :  { %v3800_v36 = vpack.c.bf16 %v3772_v11, %v3769_v34  ;;  %v3683_v34 = vadd.f32 %v3682_v62, %v7957_v27 }
 0xc6c   :  { %v6818_v38 = vpop.f32.mrf.mxu0 }
 0xc6d   :  { %6836 = vmatprep.mubr.bf16.mxu1 %v3800_v36 }
 0xc6e   :  { %v3785_v39 = vpop.f32.mrf.mxu0  ;;  %6837 = vmatmul.mubr.bf16.vlgmr.msra.gmra.mxu1 %v3801_v37 }
 0xc6f   :  { %6877 = vmatpush3.bf16.msra.mxu1 %v7239_v45 }
 0xc70   :  { %v6819_v40 = vpop.f32.mrf.mxu0  ;;  %6878 = vmatprep.subr.bf16.mxu1 %v7240_v46 }
 0xc71   :  { %v3803_v44 = vpack.c.bf16 %v6819_v40, %v6818_v38 }
 0xc72   :  { %v3788_v41 = vpop.f32.mrf.mxu0 }
 0xc73   :  { %v3802_v43 = vpack.c.bf16 %v3788_v41, %v3785_v39  ;;  %6879 = vmatpush3.bf16.msra.mxu1 %v7240_v46 }
 0xc74   :  { %6880 = vmatprep.subr.bf16.mxu1 %v7241_v49 }
 0xc75   :  { %6840 = vmatprep.mubr.bf16.mxu1 %v3802_v43 }
 0xc76   :  { %6841 = vmatmul.mubr.bf16.gmra.mxu1 %v3803_v44 }
 0xc77   :  { %6881 = vmatpush3.bf16.msra.mxu1 %v7241_v49 }
 0xc78   :  { %6882 = vmatprep.subr.bf16.mxu1 %v7242_v50 }
 0xc7b   :  { %6883 = vmatpush3.bf16.msra.mxu1 %v7242_v50 }
 0xc7c   :  { %6884 = vmatprep.subr.bf16.mxu1 %v7243_v42 }
 0xc7f   :  { %6885 = vmatpush3.bf16.msra.mxu1 %v7243_v42 }
 0xc80   :  { %6886 = vmatprep.subr.bf16.mxu1 %v7244_v51 }
 0xc83   :  { %6887 = vmatpush3.bf16.msra.mxu1 %v7244_v51 }
 0xc84   :  { %6888 = vmatprep.subr.bf16.mxu1 %v7245_v47 }
 0xc87   :  { %6889 = vmatpush3.bf16.msra.mxu1 %v7245_v47 }
 0xc88   :  { %6890 = vmatprep.subr.bf16.mxu1 %v7246_v52 }
 0xc8b   :  { %6891 = vmatpush3.bf16.msra.mxu1 %v7246_v52 }
 0xd2e   :  { %v6838_v1 = vpop.f32.mrf.mxu1 }
 0xd2f   :  { %v3936_v3 = vadd.f32 %v6838_v1, %v3672_v63 }
 0xd30   :  { %v3903_v4 = vpop.f32.mrf.mxu1 }
 0xd31   :  { %v3952_v0 = vadd.f32 %v5721_v2, %v3936_v3  ;;  %v3934_v7 = vadd.f32 %v3903_v4, %v3664_v58 }
 0xd32   :  { %v6839_v8 = vpop.f32.mrf.mxu1 }
 0xd33   :  { %v3968_v9 = vmul.f32 0.70710677, %v3952_v0  ;;  %v3950_v48 = vadd.f32 %v5721_v2, %v3934_v7  ;;  %v3937_v12 = vadd.f32 %v6839_v8, %v3675_v6  ;;  %v3960_v44 = vmul.f32 0.5, %v3952_v0 }
 0xd34   :  { %v3906_v5 = vpop.f32.mrf.mxu1 }
 0xd35   :  { %7367 = verf.f32 %v3968_v9  ;;  %v3966_v10 = vmul.f32 0.70710677, %v3950_v48  ;;  %v3953_v15 = vadd.f32 %v5721_v2, %v3937_v12  ;;  %v3935_v16 = vadd.f32 %v3906_v5, %v3667_v13  ;;  %v7248_v13 = vld [vmem:[%s8108_s1 + $0x1e8] sm:$0xff]   ;;  %v7249_v5 = vld [vmem:[%s8108_s1 + $0x1f0] sm:$0xff]  }
 0xd36   :  { %v6842_v17 = vpop.f32.mrf.mxu1  ;;  %v3958_v47 = vmul.f32 0.5, %v3950_v48 }
 0xd37   :  { %v3969_v19 = vmul.f32 0.70710677, %v3953_v15  ;;  %v3940_v22 = vadd.f32 %v6842_v17, %v3688_v14  ;;  %7369 = verf.f32 %v3966_v10  ;;  %v3951_v23 = vadd.f32 %v5721_v2, %v3935_v16  ;;  %v7250_v14 = vld [vmem:[%s8108_s1 + $0x1f8] sm:$0xff]   ;;  %v7251_v10 = vld [vmem:[%s8108_s1 + $0x200] sm:$0xff]   ;;  %v7252_v16 = vld [vmem:[%s8108_s1 + $0x208] sm:$0xff]  }
 0xd38   :  { %v3919_v24 = vpop.f32.mrf.mxu1  ;;  %v3961_v45 = vmul.f32 0.5, %v3953_v15  ;;  %v7255_v15 = vld [vmem:[#allocation2 + $0x3f8] sm:$0xff]   ;;  %v7253_v17 = vld [vmem:[%s8108_s1 + $0x210] sm:$0xff]  }
 0xd39   :  { %7371 = verf.f32 %v3969_v19  ;;  %v3956_v25 = vadd.f32 %v5721_v2, %v3940_v22  ;;  %v3938_v26 = vadd.f32 %v3919_v24, %v3680_v18  ;;  %v3967_v28 = vmul.f32 0.70710677, %v3951_v23  ;;  %v7256_v18 = vld [vmem:[#allocation2 + $0x3f0] sm:$0xff]   ;;  %v7257_v19 = vld [vmem:[#allocation2 + $0x3e8] sm:$0xff]   ;;  %v7254_v22 = vld [vmem:[%s8108_s1 + $0x218] sm:$0xff]  }
 0xd3a   :  { %v6843_v29 = vpop.f32.mrf.mxu1  ;;  %v3959_v52 = vmul.f32 0.5, %v3951_v23  ;;  %v7258_v23 = vld [vmem:[#allocation2 + $0x3e0] sm:$0xff]   ;;  %v7259_v24 = vld [vmem:[#allocation2 + $0x3d8] sm:$0xff]  }
 0xd3b   :  { %v3972_v21 = vmul.f32 0.70710677, %v3956_v25  ;;  %v3954_v30 = vadd.f32 %v5721_v2, %v3938_v26  ;;  %v3941_v33 = vadd.f32 %v6843_v29, %v3691_v20  ;;  %7373 = verf.f32 %v3967_v28  ;;  %v7260_v20 = vld [vmem:[#allocation2 + $0x3d0] sm:$0xff]   ;;  %v7262_v26 = vld [vmem:[#allocation2 + $0x3c0] sm:$0xff]  }
 0xd3c   :  { %v3922_v35 = vpop.f32.mrf.mxu1  ;;  %v3964_v62 = vmul.f32 0.5, %v3956_v25  ;;  %v7261_v25 = vld [vmem:[#allocation2 + $0x3c8] sm:$0xff]  }
 0xd3d   :  { %7375 = verf.f32 %v3972_v21  ;;  %v3970_v31 = vmul.f32 0.70710677, %v3954_v30  ;;  %v3957_v11 = vadd.f32 %v5721_v2, %v3941_v33  ;;  %v3939_v36 = vadd.f32 %v3922_v35, %v3683_v34 }
 0xd3e   :  { %v3962_v6 = vmul.f32 0.5, %v3954_v30 }
 0xd3f   :  { %v3973_v37 = vmul.f32 0.70710677, %v3957_v11  ;;  %7377 = verf.f32 %v3970_v31  ;;  %v3955_v38 = vadd.f32 %v5721_v2, %v3939_v36  ;;  %v3965_v63 = vmul.f32 0.5, %v3957_v11 }
 0xd41   :  { %7379 = verf.f32 %v3973_v37  ;;  %v3971_v39 = vmul.f32 0.70710677, %v3955_v38  ;;  %v3963_v0 = vmul.f32 0.5, %v3955_v38 }
 0xd42   :  { %v7368_v32 = vpop.eup %7367 }
 0xd43   :  { %7381 = verf.f32 %v3971_v39  ;;  %v3984_v41 = vadd.f32 1.0, %v7368_v32 }
 0xd44   :  { %v7370_v40 = vpop.eup %7369 }
 0xd45   :  { %v3982_v27 = vadd.f32 1.0, %v7370_v40  ;;  %v3992_v50 = vmul.f32 %v3984_v41, %v3960_v44 }
 0xd46   :  { %v7372_v43 = vpop.eup %7371 }
 0xd47   :  { %v3985_v46 = vadd.f32 1.0, %v7372_v43  ;;  %v3990_v55 = vmul.f32 %v3982_v27, %v3958_v47  ;;  %v7264_v47 = vld [vmem:[%s8108_s1 + $0x228] sm:$0xff]  }
 0xd48   :  { %v7374_v49 = vpop.eup %7373 }
 0xd49   :  { %v3993_v42 = vmul.f32 %v3985_v46, %v3961_v45  ;;  %v3983_v53 = vadd.f32 1.0, %v7374_v49 }
 0xd4a   :  { %v7376_v51 = vpop.eup %7375 }
 0xd4b   :  { %v7971_v54 = vpack.c.bf16 %v3993_v42, %v3992_v50  ;;  %v3991_v56 = vmul.f32 %v3983_v53, %v3959_v52  ;;  %v3988_v60 = vadd.f32 1.0, %v7376_v51  ;;  %v7263_v42 = vld [vmem:[%s8108_s1 + $0x220] sm:$0xff]   ;;  %v7265_v52 = vld [vmem:[%s8108_s1 + $0x230] sm:$0xff]   ;;  %v7266_v53 = vld [vmem:[%s8108_s1 + $0x238] sm:$0xff]  }
 0xd4c   :  { %v7378_v59 = vpop.eup %7377 }
 0xd4d   :  { %v7973_v57 = vpack.c.bf16 %v3991_v56, %v3990_v55  ;;  %v3986_v2 = vadd.f32 1.0, %v7378_v59  ;;  %v3996_v3 = vmul.f32 %v3988_v60, %v3964_v62  ;;  %v7267_v55 = vld [vmem:[%s8108_s1 + $0x240] sm:$0xff]   ;;  %v7268_v56 = vld [vmem:[%s8108_s1 + $0x248] sm:$0xff]   ;;  %v7269_v59 = vld [vmem:[%s8108_s1 + $0x250] sm:$0xff]  }
 0xd4e   :  { %v7380_v61 = vpop.eup %7379  ;;  %v7271_v60 = vld [vmem:[#allocation2 + $0x478] sm:$0xff]   ;;  %v7274_v62 = vld [vmem:[#allocation2 + $0x460] sm:$0xff]  }
 0xd4f   :  { %v3989_v1 = vadd.f32 1.0, %v7380_v61  ;;  %v3994_v9 = vmul.f32 %v3986_v2, %v3962_v6  ;;  %v7272_v61 = vld [vmem:[#allocation2 + $0x470] sm:$0xff]   ;;  %v7281_v6 = vld [vmem:[#allocation2 + $0x440] sm:$0xff]  }
 0xd50   :  { %v7382_v58 = vpop.eup %7381  ;;  %v7277_v2 = vld [vmem:[#allocation2 + $0x450] sm:$0xff]  }
 0xd51   :  { %v3997_v4 = vmul.f32 %v3989_v1, %v3965_v63  ;;  %v3987_v7 = vadd.f32 1.0, %v7382_v58  ;;  %v7275_v63 = vld [vmem:[#allocation2 + $0x458] sm:$0xff]   ;;  %v7278_v58 = vld [vmem:[#allocation2 + $0x4b0] sm:$0xff]  }
 0xd52   :  { %v7276_v1 = vld [vmem:[#allocation2 + $0x4b8] sm:$0xff]  }
 0xd53   :  { %v7975_v8 = vpack.c.bf16 %v3997_v4, %v3996_v3  ;;  %v3995_v48 = vmul.f32 %v3987_v7, %v3963_v0  ;;  %v7279_v3 = vld [vmem:[#allocation2 + $0x448] sm:$0xff]   ;;  %v7282_v0 = vld [vmem:[#allocation2 + $0x4a0] sm:$0xff]   ;;  %v7283_v7 = vld [vmem:[#allocation2 + $0x498] sm:$0xff]  }
 0xd54   :  { %v7280_v4 = vld [vmem:[#allocation2 + $0x4a8] sm:$0xff]  }
 0xd55   :  { %6844 = vmatprep.subr.bf16.mxu0 %v7975_v8  ;;  %6924 = vmatprep.subr.bf16.mxu1 %v7975_v8  ;;  %v7979_v12 = vpack.c.bf16 %v3995_v48, %v3994_v9  ;;  %v7285_v9 = vld [vmem:[#allocation2 + $0x488] sm:$0xff]   ;;  %v7286_v48 = vld [vmem:[#allocation2 + $0x480] sm:$0xff]  }
 0xd56   :  { %6845 = vmatpush3.bf16.msra.mxu0 %v7975_v8 }
 0xd57   :  { %6846 = vmatprep.subr.bf16.mxu0 %v7979_v12 }
 0xd5a   :  { %6847 = vmatpush3.bf16.msra.mxu0 %v7979_v12 }
 0xd5b   :  { %6848 = vmatprep.subr.bf16.mxu0 %v7971_v54 }
 0xd5e   :  { %6849 = vmatpush3.bf16.msra.mxu0 %v7971_v54 }
 0xd5f   :  { %6850 = vmatprep.subr.bf16.mxu0 %v7973_v57 }
 0xd62   :  { %6851 = vmatpush3.bf16.msra.mxu0 %v7973_v57 }
 0xd63   :  { %6860 = vmatprep.subr.bf16.mxu0 %v7975_v8 }
 0xd65   :  { %6853 = vmatmul.mubr.msk.bf16.vlgmr.msra.gmra.mxu0 %vm92_vm0, %v7248_v13 }
 0xd66   :  { %6861 = vmatpush3.bf16.msra.mxu0 %v7975_v8  ;;  %6856 = vmatprep.mubr.msk.bf16.mxu0 %vm92_vm0, %v7249_v5 }
 0xd67   :  { %6862 = vmatprep.subr.bf16.mxu0 %v7979_v12 }
 0xd6a   :  { %6863 = vmatpush3.bf16.msra.mxu0 %v7979_v12 }
 0xd6b   :  { %6864 = vmatprep.subr.bf16.mxu0 %v7971_v54 }
 0xd6d   :  { %6857 = vmatmul.mubr.msk.bf16.gmra.mxu0 %vm92_vm0, %v7250_v14 }
 0xd6e   :  { %6865 = vmatpush3.bf16.msra.mxu0 %v7971_v54  ;;  %6868 = vmatprep.mubr.msk.bf16.mxu0 %vm92_vm0, %v7251_v10 }
 0xd6f   :  { %6866 = vmatprep.subr.bf16.mxu0 %v7973_v57 }
 0xd72   :  { %6867 = vmatpush3.bf16.msra.mxu0 %v7973_v57 }
 0xd73   :  { %6900 = vmatprep.subr.bf16.mxu0 %v7255_v15 }
 0xd75   :  { %6869 = vmatmul.mubr.msk.bf16.vlgmr.msra.gmra.mxu0 %vm92_vm0, %v7252_v16 }
 0xd76   :  { %6872 = vmatprep.mubr.msk.bf16.mxu0 %vm92_vm0, %v7253_v17  ;;  %6901 = vmatpush3.bf16.msra.mxu0 %v7255_v15 }
 0xd77   :  { %6902 = vmatprep.subr.bf16.mxu0 %v7256_v18 }
 0xd7a   :  { %6903 = vmatpush3.bf16.msra.mxu0 %v7256_v18 }
 0xd7b   :  { %6904 = vmatprep.subr.bf16.mxu0 %v7257_v19 }
 0xd7d   :  { %6873 = vmatmul.mubr.msk.bf16.gmra.mxu0 %vm92_vm0, %v7254_v22 }
 0xd7e   :  { %6905 = vmatpush3.bf16.msra.mxu0 %v7257_v19 }
 0xd7f   :  { %6906 = vmatprep.subr.bf16.mxu0 %v7258_v23 }
 0xd82   :  { %6907 = vmatpush3.bf16.msra.mxu0 %v7258_v23 }
 0xd83   :  { %6908 = vmatprep.subr.bf16.mxu0 %v7259_v24 }
 0xd86   :  { %6909 = vmatpush3.bf16.msra.mxu0 %v7259_v24 }
 0xd87   :  { %6910 = vmatprep.subr.bf16.mxu0 %v7260_v20 }
 0xd8a   :  { %6911 = vmatpush3.bf16.msra.mxu0 %v7260_v20 }
 0xd8b   :  { %6912 = vmatprep.subr.bf16.mxu0 %v7261_v25 }
 0xd8e   :  { %6913 = vmatpush3.bf16.msra.mxu0 %v7261_v25 }
 0xd8f   :  { %6914 = vmatprep.subr.bf16.mxu0 %v7262_v26 }
 0xd92   :  { %6915 = vmatpush3.bf16.msra.mxu0 %v7262_v26 }
 0xd93   :  { %6940 = vmatprep.subr.bf16.mxu0 %v7271_v60 }
 0xe25   :  { %v6854_v28 = vpop.f32.mrf.mxu0 }
 0xe27   :  { %v4077_v29 = vpop.f32.mrf.mxu0 }
 0xe29   :  { %v6855_v21 = vpop.f32.mrf.mxu0 }
 0xe2a   :  { %v4109_v34 = vpack.c.bf16 %v6855_v21, %v6854_v28 }
 0xe2b   :  { %v4080_v30 = vpop.f32.mrf.mxu0 }
 0xe2c   :  { %v4108_v33 = vpack.c.bf16 %v4080_v30, %v4077_v29 }
 0xe2d   :  { %v6858_v35 = vpop.f32.mrf.mxu0 }
 0xe2e   :  { %6916 = vmatprep.mubr.bf16.mxu0 %v4108_v33 }
 0xe2f   :  { %v4093_v31 = vpop.f32.mrf.mxu0  ;;  %6917 = vmatmul.mubr.bf16.vlgmr.msra.gmra.mxu0 %v4109_v34 }
 0xe30   :  { %6941 = vmatpush3.bf16.msra.mxu0 %v7271_v60 }
 0xe31   :  { %v6859_v11 = vpop.f32.mrf.mxu0  ;;  %6942 = vmatprep.subr.bf16.mxu0 %v7272_v61 }
 0xe32   :  { %v4111_v38 = vpack.c.bf16 %v6859_v11, %v6858_v35 }
 0xe33   :  { %v4096_v36 = vpop.f32.mrf.mxu0 }
 0xe34   :  { %v4110_v37 = vpack.c.bf16 %v4096_v36, %v4093_v31  ;;  %6943 = vmatpush3.bf16.msra.mxu0 %v7272_v61 }
 0xe35   :  { %v6870_v32 = vpop.f32.mrf.mxu0 }
 0xe36   :  { %6920 = vmatprep.mubr.bf16.mxu0 %v4110_v37 }
 0xe37   :  { %v4204_v39 = vpop.f32.mrf.mxu0  ;;  %6921 = vmatmul.mubr.bf16.gmra.mxu0 %v4111_v38 }
 0xe39   :  { %v6871_v40 = vpop.f32.mrf.mxu0 }
 0xe3a   :  { %v4236_v44 = vpack.c.bf16 %v6871_v40, %v6870_v32 }
 0xe3b   :  { %v4207_v41 = vpop.f32.mrf.mxu0 }
 0xe3c   :  { %v4235_v43 = vpack.c.bf16 %v4207_v41, %v4204_v39 }
 0xe3d   :  { %v6874_v45 = vpop.f32.mrf.mxu0 }
 0xe3e   :  { %6892 = vmatprep.mubr.bf16.mxu1 %v4235_v43  ;;  %v7287_v43 = vld [vmem:[#allocation2 + $0x4f8] sm:$0xff]  }
 0xe3f   :  { %v4220_v46 = vpop.f32.mrf.mxu0  ;;  %6893 = vmatmul.mubr.bf16.vlgmr.msra.gmra.mxu1 %v4236_v44  ;;  %v7288_v44 = vld [vmem:[#allocation2 + $0x4f0] sm:$0xff]  }
 0xe40   :  { %6925 = vmatpush3.bf16.msra.mxu1 %v7975_v8 }
 0xe41   :  { %6926 = vmatprep.subr.bf16.mxu1 %v7979_v12  ;;  %v6875_v27 = vpop.f32.mrf.mxu0 }
 0xe42   :  { %v4238_v51 = vpack.c.bf16 %v6875_v27, %v6874_v45  ;;  %v7289_v45 = vld [vmem:[#allocation2 + $0x4e8] sm:$0xff]   ;;  %v7291_v27 = vld [vmem:[#allocation2 + $0x4d8] sm:$0xff]  }
 0xe43   :  { %v4223_v49 = vpop.f32.mrf.mxu0 }
 0xe44   :  { %v4237_v50 = vpack.c.bf16 %v4223_v49, %v4220_v46  ;;  %6927 = vmatpush3.bf16.msra.mxu1 %v7979_v12  ;;  %v7290_v46 = vld [vmem:[#allocation2 + $0x4e0] sm:$0xff]   ;;  %v7292_v49 = vld [vmem:[#allocation2 + $0x4d0] sm:$0xff]  }
 0xe45   :  { %6928 = vmatprep.subr.bf16.mxu1 %v7971_v54 }
 0xe46   :  { %6896 = vmatprep.mubr.bf16.mxu1 %v4237_v50  ;;  %v7293_v50 = vld [vmem:[#allocation2 + $0x4c8] sm:$0xff]  }
 0xe47   :  { %6897 = vmatmul.mubr.bf16.gmra.mxu1 %v4238_v51 }
 0xe48   :  { %6929 = vmatpush3.bf16.msra.mxu1 %v7971_v54  ;;  %6932 = vmatprep.mubr.msk.bf16.mxu1 %vm92_vm0, %v7263_v42  ;;  %v7294_v42 = vld [vmem:[#allocation2 + $0x4c0] sm:$0xff]  }
 0xe49   :  { %6930 = vmatprep.subr.bf16.mxu1 %v7973_v57 }
 0xe4c   :  { %6931 = vmatpush3.bf16.msra.mxu1 %v7973_v57 }
 0xe4d   :  { %6964 = vmatprep.subr.bf16.mxu1 %v7975_v8 }
 0xe4f   :  { %6933 = vmatmul.mubr.msk.bf16.vlgmr.msra.gmra.mxu1 %vm92_vm0, %v7264_v47 }
 0xe50   :  { %6965 = vmatpush3.bf16.msra.mxu1 %v7975_v8  ;;  %6936 = vmatprep.mubr.msk.bf16.mxu1 %vm92_vm0, %v7265_v52  ;;  %v7284_v8 = vld [vmem:[#allocation2 + $0x490] sm:$0xff]  }
 0xe51   :  { %6966 = vmatprep.subr.bf16.mxu1 %v7979_v12 }
 0xe54   :  { %6967 = vmatpush3.bf16.msra.mxu1 %v7979_v12 }
 0xe55   :  { %6968 = vmatprep.subr.bf16.mxu1 %v7971_v54 }
 0xe57   :  { %6937 = vmatmul.mubr.msk.bf16.gmra.mxu1 %vm92_vm0, %v7266_v53 }
 0xe58   :  { %6969 = vmatpush3.bf16.msra.mxu1 %v7971_v54  ;;  %6972 = vmatprep.mubr.msk.bf16.mxu1 %vm92_vm0, %v7267_v55  ;;  %v7270_v54 = vld [vmem:[%s8108_s1 + $0x258] sm:$0xff]  }
 0xe59   :  { %6970 = vmatprep.subr.bf16.mxu1 %v7973_v57 }
 0xe5c   :  { %6971 = vmatpush3.bf16.msra.mxu1 %v7973_v57  ;;  %v7273_v57 = vld [vmem:[#allocation2 + $0x468] sm:$0xff]  }
 0xe5d   :  { %6944 = vmatprep.subr.bf16.mxu0 %v7273_v57  ;;  %6980 = vmatprep.subr.bf16.mxu1 %v7276_v1 }
 0xe5e   :  { %6945 = vmatpush3.bf16.msra.mxu0 %v7273_v57 }
 0xe5f   :  { %6973 = vmatmul.mubr.msk.bf16.vlgmr.msra.gmra.mxu1 %vm92_vm0, %v7268_v56  ;;  %6946 = vmatprep.subr.bf16.mxu0 %v7274_v62 }
 0xe60   :  { %6976 = vmatprep.mubr.msk.bf16.mxu1 %vm92_vm0, %v7269_v59  ;;  %6981 = vmatpush3.bf16.msra.mxu1 %v7276_v1 }
 0xe61   :  { %6982 = vmatprep.subr.bf16.mxu1 %v7278_v58 }
 0xe62   :  { %6947 = vmatpush3.bf16.msra.mxu0 %v7274_v62 }
 0xe63   :  { %6948 = vmatprep.subr.bf16.mxu0 %v7275_v63 }
 0xe64   :  { %6983 = vmatpush3.bf16.msra.mxu1 %v7278_v58 }
 0xe65   :  { %6984 = vmatprep.subr.bf16.mxu1 %v7280_v4 }
 0xe66   :  { %6949 = vmatpush3.bf16.msra.mxu0 %v7275_v63 }
 0xe67   :  { %6977 = vmatmul.mubr.msk.bf16.gmra.mxu1 %vm92_vm0, %v7270_v54  ;;  %6950 = vmatprep.subr.bf16.mxu0 %v7277_v2 }
 0xe68   :  { %6985 = vmatpush3.bf16.msra.mxu1 %v7280_v4  ;;  %v5819_v4 = vld [vmem:[%s8110_s3 + $0x5] ss:$0 sm:$0xff] }
 0xe69   :  { %6986 = vmatprep.subr.bf16.mxu1 %v7282_v0 }
 0xe6a   :  { %6951 = vmatpush3.bf16.msra.mxu0 %v7277_v2 }
 0xe6b   :  { %6952 = vmatprep.subr.bf16.mxu0 %v7279_v3 }
 0xe6c   :  { %6987 = vmatpush3.bf16.msra.mxu1 %v7282_v0 }
 0xe6d   :  { %6988 = vmatprep.subr.bf16.mxu1 %v7283_v7 }
 0xe6e   :  { %6953 = vmatpush3.bf16.msra.mxu0 %v7279_v3 }
 0xe6f   :  { %6954 = vmatprep.subr.bf16.mxu0 %v7281_v6 }
 0xe70   :  { %6989 = vmatpush3.bf16.msra.mxu1 %v7283_v7 }
 0xe71   :  { %6990 = vmatprep.subr.bf16.mxu1 %v7284_v8 }
 0xe72   :  { %6955 = vmatpush3.bf16.msra.mxu0 %v7281_v6 }
 0xe73   :  { %7004 = vmatprep.subr.bf16.mxu0 %v7287_v43 }
 0xe74   :  { %6991 = vmatpush3.bf16.msra.mxu1 %v7284_v8 }
 0xe75   :  { %6992 = vmatprep.subr.bf16.mxu1 %v7285_v9 }
 0xe78   :  { %6993 = vmatpush3.bf16.msra.mxu1 %v7285_v9 }
 0xe79   :  { %6994 = vmatprep.subr.bf16.mxu1 %v7286_v48 }
 0xe7c   :  { %6995 = vmatpush3.bf16.msra.mxu1 %v7286_v48 }
 0xeef   :  { %v6918_v51 = vpop.f32.mrf.mxu0 }
 0xef1   :  { %v4451_v47 = vpop.f32.mrf.mxu0 }
 0xef3   :  { %v6919_v52 = vpop.f32.mrf.mxu0 }
 0xef5   :  { %v4454_v53 = vpop.f32.mrf.mxu0 }
 0xef7   :  { %v6922_v55 = vpop.f32.mrf.mxu0 }
 0xef9   :  { %v4467_v56 = vpop.f32.mrf.mxu0 }
 0xefb   :  { %v6923_v59 = vpop.f32.mrf.mxu0 }
 0xefd   :  { %v4470_v54 = vpop.f32.mrf.mxu0 }
 0xeff   :  { %v8071_v12 = vpop.f32.mrf.mxu1 }
 0xf00   :  { %v4460_v63 = vadd.f32 %v6918_v51, %v8071_v12 }
 0xf01   :  { %v8073_v13 = vpop.f32.mrf.mxu1 }
 0xf02   :  { %v4452_v1 = vadd.f32 %v4451_v47, %v8073_v13 }
 0xf03   :  { %v8075_v5 = vpop.f32.mrf.mxu1 }
 0xf04   :  { %v4463_v6 = vadd.f32 %v6919_v52, %v8075_v5 }
 0xf05   :  { %v8077_v14 = vpop.f32.mrf.mxu1 }
 0xf06   :  { %v4455_v12 = vadd.f32 %v4454_v53, %v8077_v14 }
 0xf07   :  { %v8079_v10 = vpop.f32.mrf.mxu1 }
 0xf08   :  { %v4476_v13 = vadd.f32 %v6922_v55, %v8079_v10 }
 0xf09   :  { %v8081_v15 = vpop.f32.mrf.mxu1 }
 0xf0b   :  { %v8083_v16 = vpop.f32.mrf.mxu1 }
 0xf0d   :  { %v8085_v17 = vpop.f32.mrf.mxu1 }
 0xf0f   :  { %v6934_v18 = vpop.f32.mrf.mxu1 }
 0xf11   :  { %v4557_v19 = vpop.f32.mrf.mxu1 }
 0xf13   :  { %v6935_v22 = vpop.f32.mrf.mxu1 }
 0xf14   :  { %v4589_v20 = vpack.c.bf16 %v6935_v22, %v6934_v18 }
 0xf15   :  { %v4560_v23 = vpop.f32.mrf.mxu1 }
 0xf16   :  { %v4588_v24 = vpack.c.bf16 %v4560_v23, %v4557_v19 }
 0xf17   :  { %v6938_v25 = vpop.f32.mrf.mxu1 }
 0xf18   :  { %6956 = vmatprep.mubr.bf16.mxu0 %v4588_v24 }
 0xf19   :  { %v4573_v26 = vpop.f32.mrf.mxu1  ;;  %6957 = vmatmul.mubr.bf16.vlgmr.msra.gmra.mxu0 %v4589_v20 }
 0xf1a   :  { %7005 = vmatpush3.bf16.msra.mxu0 %v7287_v43 }
 0xf1b   :  { %v6939_v28 = vpop.f32.mrf.mxu1  ;;  %7006 = vmatprep.subr.bf16.mxu0 %v7288_v44 }
 0xf1c   :  { %v4591_v30 = vpack.c.bf16 %v6939_v28, %v6938_v25  ;;  %v4468_v25 = vadd.f32 %v4467_v56, %v8081_v15 }
 0xf1d   :  { %v4576_v29 = vpop.f32.mrf.mxu1 }
 0xf1e   :  { %v4590_v21 = vpack.c.bf16 %v4576_v29, %v4573_v26  ;;  %7007 = vmatpush3.bf16.msra.mxu0 %v7288_v44 }
 0xf1f   :  { %v6974_v33 = vpop.f32.mrf.mxu1  ;;  %7008 = vmatprep.subr.bf16.mxu0 %v7289_v45 }
 0xf20   :  { %6960 = vmatprep.mubr.bf16.mxu0 %v4590_v21 }
 0xf21   :  { %6961 = vmatmul.mubr.bf16.gmra.mxu0 %v4591_v30  ;;  %v4805_v34 = vpop.f32.mrf.mxu1 }
 0xf22   :  { %7009 = vmatpush3.bf16.msra.mxu0 %v7289_v45 }
 0xf23   :  { %v6975_v35 = vpop.f32.mrf.mxu1  ;;  %7010 = vmatprep.subr.bf16.mxu0 %v7290_v46 }
 0xf24   :  { %v4837_v36 = vpack.c.bf16 %v6975_v35, %v6974_v33  ;;  %v4479_v35 = vadd.f32 %v6923_v59, %v8083_v16 }
 0xf25   :  { %v4808_v31 = vpop.f32.mrf.mxu1 }
 0xf26   :  { %v4836_v11 = vpack.c.bf16 %v4808_v31, %v4805_v34  ;;  %7011 = vmatpush3.bf16.msra.mxu0 %v7290_v46 }
 0xf27   :  { %v6978_v37 = vpop.f32.mrf.mxu1  ;;  %7012 = vmatprep.subr.bf16.mxu0 %v7291_v27 }
 0xf28   :  { %6996 = vmatprep.mubr.bf16.mxu1 %v4836_v11 }
 0xf29   :  { %v4821_v38 = vpop.f32.mrf.mxu1  ;;  %6997 = vmatmul.mubr.bf16.vlgmr.msra.gmra.mxu1 %v4837_v36 }
 0xf2a   :  { %7013 = vmatpush3.bf16.msra.mxu0 %v7291_v27 }
 0xf2b   :  { %v6979_v32 = vpop.f32.mrf.mxu1  ;;  %7014 = vmatprep.subr.bf16.mxu0 %v7292_v49 }
 0xf2c   :  { %v4839_v41 = vpack.c.bf16 %v6979_v32, %v6978_v37 }
 0xf2d   :  { %v4824_v39 = vpop.f32.mrf.mxu1 }
 0xf2e   :  { %v4838_v40 = vpack.c.bf16 %v4824_v39, %v4821_v38  ;;  %7015 = vmatpush3.bf16.msra.mxu0 %v7292_v49  ;;  %v4471_v39 = vadd.f32 %v4470_v54, %v8085_v17 }
 0xf2f   :  { %7016 = vmatprep.subr.bf16.mxu0 %v7293_v50 }
 0xf30   :  { %7000 = vmatprep.mubr.bf16.mxu1 %v4838_v40 }
 0xf31   :  { %7001 = vmatmul.mubr.bf16.gmra.mxu1 %v4839_v41 }
 0xf32   :  { %7017 = vmatpush3.bf16.msra.mxu0 %v7293_v50 }
 0xf33   :  { %7018 = vmatprep.subr.bf16.mxu0 %v7294_v42 }
 0xf36   :  { %7019 = vmatpush3.bf16.msra.mxu0 %v7294_v42 }
 0xfd9   :  { %v6958_v60 = vpop.f32.mrf.mxu0 }
 0xfda   :  { %v4724_v2 = vadd.f32 %v6958_v60, %v4460_v63 }
 0xfdb   :  { %v4691_v61 = vpop.f32.mrf.mxu0 }
 0xfdc   :  { %v4722_v0 = vadd.f32 %v4691_v61, %v4452_v1 }
 0xfdd   :  { %v6959_v57 = vpop.f32.mrf.mxu0 }
 0xfde   :  { %v4725_v9 = vadd.f32 %v6959_v57, %v4463_v6 }
 0xfdf   :  { %v4694_v62 = vpop.f32.mrf.mxu0 }
 0xfe0   :  { %v4723_v26 = vadd.f32 %v4694_v62, %v4455_v12 }
 0xfe1   :  { %v6962_v58 = vpop.f32.mrf.mxu0 }
 0xfe2   :  { %v4728_v5 = vadd.f32 %v6962_v58, %v4476_v13 }
 0xfe3   :  { %v4707_v48 = vpop.f32.mrf.mxu0 }
 0xfe4   :  { %v4726_v14 = vadd.f32 %v4707_v48, %v4468_v25 }
 0xfe5   :  { %v6963_v29 = vpop.f32.mrf.mxu0 }
 0xfe6   :  { %v4729_v37 = vadd.f32 %v6963_v29, %v4479_v35  ;;  %v7299_v35 = vld [vmem:[#allocation2 + $0x518] sm:$0xff]  }
 0xfe7   :  { %v4710_v38 = vpop.f32.mrf.mxu0 }
 0xfe8   :  { %v4727_v46 = vadd.f32 %v4710_v38, %v4471_v39 }
 0xfe9   :  { %v6998_v3 = vpop.f32.mrf.mxu1 }
 0xfea   :  { %v4972_v7 = vadd.f32 %v6998_v3, %v4724_v2 }
 0xfeb   :  { %v4939_v8 = vpop.f32.mrf.mxu1 }
 0xfec   :  { %v4988_v18 = vadd.f32 %v5819_v4, %v4972_v7  ;;  %v4970_v19 = vadd.f32 %v4939_v8, %v4722_v0 }
 0xfed   :  { %v6999_v22 = vpop.f32.mrf.mxu1 }
 0xfee   :  { %v5004_v23 = vmul.f32 0.70710677, %v4988_v18  ;;  %v4986_v24 = vadd.f32 %v5819_v4, %v4970_v19  ;;  %v4973_v20 = vadd.f32 %v6999_v22, %v4725_v9  ;;  %v4996_v56 = vmul.f32 0.5, %v4988_v18 }
 0xfef   :  { %v4942_v28 = vpop.f32.mrf.mxu1 }
 0xff0   :  { %7383 = verf.f32 %v5004_v23  ;;  %v5002_v21 = vmul.f32 0.70710677, %v4986_v24  ;;  %v4989_v30 = vadd.f32 %v5819_v4, %v4973_v20  ;;  %v4971_v33 = vadd.f32 %v4942_v28, %v4723_v26 }
 0xff1   :  { %v7002_v34 = vpop.f32.mrf.mxu1  ;;  %v4994_v1 = vmul.f32 0.5, %v4986_v24 }
 0xff2   :  { %v5005_v31 = vmul.f32 0.70710677, %v4989_v30  ;;  %v4976_v11 = vadd.f32 %v7002_v34, %v4728_v5  ;;  %7385 = verf.f32 %v5002_v21  ;;  %v4987_v10 = vadd.f32 %v5819_v4, %v4971_v33  ;;  %v7295_v21 = vld [vmem:[#allocation2 + $0x538] sm:$0xff]   ;;  %v7297_v33 = vld [vmem:[#allocation2 + $0x528] sm:$0xff]   ;;  %v7298_v34 = vld [vmem:[#allocation2 + $0x520] sm:$0xff]  }
 0xff3   :  { %v4955_v36 = vpop.f32.mrf.mxu1  ;;  %v4997_v59 = vmul.f32 0.5, %v4989_v30  ;;  %7028 = vmatprep.subr.bf16.mxu1 %v7295_v21  ;;  %v7296_v30 = vld [vmem:[#allocation2 + $0x530] sm:$0xff]  }
 0xff4   :  { %7387 = verf.f32 %v5005_v31  ;;  %v4992_v15 = vadd.f32 %v5819_v4, %v4976_v11  ;;  %v4974_v32 = vadd.f32 %v4955_v36, %v4726_v14  ;;  %v5003_v40 = vmul.f32 0.70710677, %v4987_v10  ;;  %7029 = vmatpush3.bf16.msra.mxu1 %v7295_v21  ;;  %v7300_v14 = vld [vmem:[#allocation2 + $0x510] sm:$0xff]   ;;  %v7301_v31 = vld [vmem:[#allocation2 + $0x508] sm:$0xff]   ;;  %v7302_v11 = vld [vmem:[#allocation2 + $0x500] sm:$0xff]  }
 0xff5   :  { %v7003_v41 = vpop.f32.mrf.mxu1  ;;  %v4995_v2 = vmul.f32 0.5, %v4987_v10  ;;  %7030 = vmatprep.subr.bf16.mxu1 %v7296_v30  ;;  %v5821_v10 = vld [vmem:[%s8110_s3 + $0x6] ss:$0 sm:$0xff] }
 0xff6   :  { %v5008_v43 = vmul.f32 0.70710677, %v4992_v15  ;;  %v4990_v44 = vadd.f32 %v5819_v4, %v4974_v32  ;;  %v4977_v45 = vadd.f32 %v7003_v41, %v4729_v37  ;;  %7389 = verf.f32 %v5003_v40 }
 0xff7   :  { %v4958_v16 = vpop.f32.mrf.mxu1  ;;  %v5000_v48 = vmul.f32 0.5, %v4992_v15 }
 0xff8   :  { %7391 = verf.f32 %v5008_v43  ;;  %v5006_v27 = vmul.f32 0.70710677, %v4990_v44  ;;  %v4993_v49 = vadd.f32 %v5819_v4, %v4977_v45  ;;  %v4975_v50 = vadd.f32 %v4958_v16, %v4727_v46  ;;  %7031 = vmatpush3.bf16.msra.mxu1 %v7296_v30 }
 0xff9   :  { %v4998_v20 = vmul.f32 0.5, %v4990_v44  ;;  %7032 = vmatprep.subr.bf16.mxu1 %v7297_v33 }
 0xffa   :  { %v5009_v42 = vmul.f32 0.70710677, %v4993_v49  ;;  %7393 = verf.f32 %v5006_v27  ;;  %v4991_v51 = vadd.f32 %v5819_v4, %v4975_v50  ;;  %v5001_v19 = vmul.f32 0.5, %v4993_v49 }
 0xffc   :  { %7395 = verf.f32 %v5009_v42  ;;  %v5007_v52 = vmul.f32 0.70710677, %v4991_v51  ;;  %v4999_v24 = vmul.f32 0.5, %v4991_v51  ;;  %7033 = vmatpush3.bf16.msra.mxu1 %v7297_v33 }
 0xffd   :  { %v7384_v47 = vpop.eup %7383  ;;  %7034 = vmatprep.subr.bf16.mxu1 %v7298_v34 }
 0xffe   :  { %7397 = verf.f32 %v5007_v52  ;;  %v5020_v53 = vadd.f32 1.0, %v7384_v47 }
 0xfff   :  { %v7386_v17 = vpop.eup %7385 }
0x1000   :  { %v5018_v60 = vadd.f32 1.0, %v7386_v17  ;;  %v5028_v57 = vmul.f32 %v5020_v53, %v4996_v56  ;;  %7035 = vmatpush3.bf16.msra.mxu1 %v7298_v34 }
0x1001   :  { %v7388_v55 = vpop.eup %7387  ;;  %7036 = vmatprep.subr.bf16.mxu1 %v7299_v35 }
0x1002   :  { %v5021_v54 = vadd.f32 1.0, %v7388_v55  ;;  %v5026_v4 = vmul.f32 %v5018_v60, %v4994_v1 }
0x1003   :  { %v7390_v61 = vpop.eup %7389 }
0x1004   :  { %v5029_v62 = vmul.f32 %v5021_v54, %v4997_v59  ;;  %v5019_v58 = vadd.f32 1.0, %v7390_v61  ;;  %7037 = vmatpush3.bf16.msra.mxu1 %v7299_v35 }
0x1005   :  { %v7392_v63 = vpop.eup %7391  ;;  %7038 = vmatprep.subr.bf16.mxu1 %v7300_v14 }
0x1006   :  { %v5035_v3 = vpack.c.bf16 %v5029_v62, %v5028_v57  ;;  %v5027_v6 = vmul.f32 %v5019_v58, %v4995_v2  ;;  %v5024_v7 = vadd.f32 1.0, %v7392_v63 }
0x1007   :  { %v7394_v0 = vpop.eup %7393 }
0x1008   :  { %v5034_v9 = vpack.c.bf16 %v5027_v6, %v5026_v4  ;;  %v5022_v12 = vadd.f32 1.0, %v7394_v0  ;;  %v5032_v13 = vmul.f32 %v5024_v7, %v5000_v48  ;;  %7039 = vmatpush3.bf16.msra.mxu1 %v7300_v14 }
0x1009   :  { %v7396_v8 = vpop.eup %7395  ;;  %7040 = vmatprep.subr.bf16.mxu1 %v7301_v31 }
0x100a   :  { %v5025_v18 = vadd.f32 1.0, %v7396_v8  ;;  %7020 = vmatprep.mubr.bf16.mxu0 %v5034_v9  ;;  %v5030_v28 = vmul.f32 %v5022_v12, %v4998_v20 }
0x100b   :  { %v7398_v22 = vpop.eup %7397  ;;  %7021 = vmatmul.mubr.bf16.vlgmr.msra.gmra.mxu0 %v5035_v3 }
0x100c   :  { %v5033_v23 = vmul.f32 %v5025_v18, %v5001_v19  ;;  %v5023_v25 = vadd.f32 1.0, %v7398_v22  ;;  %7041 = vmatpush3.bf16.msra.mxu1 %v7301_v31  ;;  %v5831_v31 = vld [vmem:[%s8110_s3 + $0x7] ss:$0 sm:$0xff] }
0x100d   :  { %7042 = vmatprep.subr.bf16.mxu1 %v7302_v11 }
0x100e   :  { %v5037_v26 = vpack.c.bf16 %v5033_v23, %v5032_v13  ;;  %v5031_v5 = vmul.f32 %v5023_v25, %v4999_v24 }
0x1010   :  { %v5036_v29 = vpack.c.bf16 %v5031_v5, %v5030_v28  ;;  %7043 = vmatpush3.bf16.msra.mxu1 %v7302_v11 }
0x1012   :  { %7024 = vmatprep.mubr.bf16.mxu0 %v5036_v29 }
0x1013   :  { %7025 = vmatmul.mubr.bf16.gmra.mxu0 %v5037_v26 }
0x10cb   :  { %v7022_v36 = vpop.f32.mrf.mxu0 }
0x10cc   :  { %v5154_v37 = vadd.f32 %v7022_v36, %v5821_v10 }
0x10cd   :  { %v5145_v38 = vpop.f32.mrf.mxu0 }
0x10ce   :  { %v5146_v15 = vadd.f32 %v5821_v10, %v5145_v38  ;;  %v5186_v32 = vmul.f32 0.70710677, %v5154_v37  ;;  %v5178_v4 = vmul.f32 0.5, %v5154_v37 }
0x10cf   :  { %v7023_v39 = vpop.f32.mrf.mxu0 }
0x10d0   :  { %v5184_v40 = vmul.f32 0.70710677, %v5146_v15  ;;  %v5157_v41 = vadd.f32 %v7023_v39, %v5821_v10  ;;  %v5176_v2 = vmul.f32 0.5, %v5146_v15 }
0x10d1   :  { %v5148_v43 = vpop.f32.mrf.mxu0 }
0x10d2   :  { %7399 = verf.f32 %v5184_v40  ;;  %v5187_v44 = vmul.f32 0.70710677, %v5157_v41  ;;  %v5149_v45 = vadd.f32 %v5821_v10, %v5148_v43  ;;  %v5179_v1 = vmul.f32 0.5, %v5157_v41 }
0x10d3   :  { %7401 = verf.f32 %v5186_v32  ;;  %v7026_v46 = vpop.f32.mrf.mxu0 }
0x10d4   :  { %7403 = verf.f32 %v5187_v44  ;;  %v5185_v16 = vmul.f32 0.70710677, %v5149_v45  ;;  %v5170_v27 = vadd.f32 %v7026_v46, %v5821_v10  ;;  %v5177_v58 = vmul.f32 0.5, %v5149_v45 }
0x10d5   :  { %v5161_v49 = vpop.f32.mrf.mxu0 }
0x10d6   :  { %7405 = verf.f32 %v5185_v16  ;;  %v5162_v50 = vadd.f32 %v5821_v10, %v5161_v49  ;;  %v5190_v42 = vmul.f32 0.70710677, %v5170_v27  ;;  %v5182_v5 = vmul.f32 0.5, %v5170_v27 }
0x10d7   :  { %v7027_v51 = vpop.f32.mrf.mxu0 }
0x10d8   :  { %v5188_v47 = vmul.f32 0.70710677, %v5162_v50  ;;  %v5173_v52 = vadd.f32 %v7027_v51, %v5821_v10  ;;  %v5180_v25 = vmul.f32 0.5, %v5162_v50 }
0x10d9   :  { %v5164_v17 = vpop.f32.mrf.mxu0 }
0x10da   :  { %7407 = verf.f32 %v5188_v47  ;;  %v5191_v53 = vmul.f32 0.70710677, %v5173_v52  ;;  %v5165_v55 = vadd.f32 %v5821_v10, %v5164_v17  ;;  %v5183_v24 = vmul.f32 0.5, %v5173_v52 }
0x10db   :  { %7409 = verf.f32 %v5190_v42 }
0x10dc   :  { %7411 = verf.f32 %v5191_v53  ;;  %v5189_v56 = vmul.f32 0.70710677, %v5165_v55  ;;  %v5181_v26 = vmul.f32 0.5, %v5165_v55 }
0x10de   :  { %7413 = verf.f32 %v5189_v56 }
0x10df   :  { %v7400_v59 = vpop.eup %7399 }
0x10e0   :  { %v7402_v54 = vpop.eup %7401  ;;  %v5200_v61 = vadd.f32 1.0, %v7400_v59 }
0x10e1   :  { %v7404_v60 = vpop.eup %7403  ;;  %v5202_v63 = vadd.f32 1.0, %v7402_v54 }
0x10e2   :  { %v5203_v57 = vadd.f32 1.0, %v7404_v60  ;;  %v5208_v0 = vmul.f32 %v5200_v61, %v5176_v2 }
0x10e3   :  { %v7406_v62 = vpop.eup %7405  ;;  %v5210_v9 = vmul.f32 %v5202_v63, %v5178_v4 }
0x10e4   :  { %v5201_v3 = vadd.f32 1.0, %v7406_v62  ;;  %v5211_v6 = vmul.f32 %v5203_v57, %v5179_v1 }
0x10e6   :  { %v5209_v7 = vmul.f32 %v5201_v3, %v5177_v58  ;;  %v5217_v12 = vpack.c.bf16 %v5211_v6, %v5210_v9 }
0x10e7   :  { %v7408_v8 = vpop.eup %7407 }
0x10e8   :  { %v7410_v48 = vpop.eup %7409  ;;  %v5216_v19 = vpack.c.bf16 %v5209_v7, %v5208_v0  ;;  %v5204_v22 = vadd.f32 1.0, %v7408_v8 }
0x10e9   :  { %v7412_v18 = vpop.eup %7411  ;;  %v5206_v20 = vadd.f32 1.0, %v7410_v48 }
0x10ea   :  { %v5207_v13 = vadd.f32 1.0, %v7412_v18  ;;  %7044 = vmatprep.mubr.bf16.mxu1 %v5216_v19  ;;  %v5212_v21 = vmul.f32 %v5204_v22, %v5180_v25 }
0x10eb   :  { %v7414_v23 = vpop.eup %7413  ;;  %7045 = vmatmul.mubr.bf16.vlgmr.msra.gmra.mxu1 %v5217_v12  ;;  %v5214_v33 = vmul.f32 %v5206_v20, %v5182_v5 }
0x10ec   :  { %v5205_v28 = vadd.f32 1.0, %v7414_v23  ;;  %v5215_v29 = vmul.f32 %v5207_v13, %v5183_v24 }
0x10ee   :  { %v5213_v30 = vmul.f32 %v5205_v28, %v5181_v26  ;;  %v5219_v35 = vpack.c.bf16 %v5215_v29, %v5214_v33 }
0x10f0   :  { %v5218_v34 = vpack.c.bf16 %v5213_v30, %v5212_v21 }
0x10f2   :  { %7048 = vmatprep.mubr.bf16.mxu1 %v5218_v34 }
0x10f3   :  { %7049 = vmatmul.mubr.bf16.gmra.mxu1 %v5219_v35 }
0x11ab   :  { %v7046_v14 = vpop.f32.mrf.mxu1 }
0x11ad   :  { %v5327_v11 = vpop.f32.mrf.mxu1 }
0x11ae   :  { %v5328_v10 = vadd.f32 %v5831_v31, %v5327_v11 }
0x11af   :  { %v7047_v36 = vpop.f32.mrf.mxu1 }
0x11b0   :  { %5351 = vst [vmem:[%s8111_s4] sm:$0xff] %v5328_v10 }
0x11b1   :  { %v5330_v37 = vpop.f32.mrf.mxu1 }
0x11b3   :  { %v7050_v38 = vpop.f32.mrf.mxu1 }
0x11b5   :  { %v5340_v15 = vpop.f32.mrf.mxu1 }
0x11b7   :  { %v7051_v32 = vpop.f32.mrf.mxu1 }
0x11b9   :  { %v5342_v39 = vpop.f32.mrf.mxu1 }
0x11ba   :  { %5356 = vsyncpa [#allocation3], 1 }

</bundles_post_ra>
